<compile_context>
chip_gen: v5e
topology: v5e:2x2
jax: 0.10.0
libtpu: 0.0.40
codegen_flags: <defaults>
</compile_context>

<pallas_src>
import jax
import jax.numpy as jnp
from jax.experimental import pallas as pl
from jax.experimental.pallas import tpu as pltpu  # noqa: F401  (no TPU-specific params needed at this size)

# ----------------------------- model dimensions -----------------------------
BATCH = 2
SEQ = 8
D_MODEL = 32
N_HEADS = 4
D_HEAD = D_MODEL // N_HEADS
D_FF = 64
LN_EPS = 1e-5
ROWS = BATCH * SEQ                      # flattened (B*S) row count


# ------------------------------- fused kernel -------------------------------
def _encoder_layer_kernel(
    x_ref, m_ref, smask_ref, omask_ref,              # activations / masks
    wqkv_ref, bqkv_ref, wo_ref, bo_ref,              # 3 attention blocks (stacked)
    w1_ref, b1_ref, w2_ref, b2_ref,                  # shared feed-forward
    lng_ref, lnb_ref,                                # 5 layernorms (stacked)
    ox_ref, om_ref,                                  # outputs
):
    """Whole EncoderLayer forward; every operand is a full-array VMEM ref."""

    def layer_norm(xv, i):
        g = lng_ref[i:i + 1, :]                      # (1, D)
        b = lnb_ref[i:i + 1, :]
        mu = jnp.mean(xv, axis=-1, keepdims=True)
        var = jnp.mean((xv - mu) ** 2, axis=-1, keepdims=True)
        return g * (xv - mu) * jax.lax.rsqrt(var + LN_EPS) + b

    def mha(a, q_in, kv_in, mask_ref, self_attn):
        """Multi-head attention block `a`; 1/sqrt(d_head) pre-folded into Wq/bq."""
        wqkv = wqkv_ref[a]                           # (D, 3D)
        bqkv = bqkv_ref[a]                           # (1, 3D)
        wo = wo_ref[a]                               # (D, D)
        bo = bo_ref[a]                               # (1, D)

        if self_attn:
            # one fused (ROWS, D) @ (D, 3D) projection
            qkv = jnp.dot(q_in, wqkv, preferred_element_type=jnp.float32) + bqkv
            q = qkv[:, :D_MODEL]
            k = qkv[:, D_MODEL:2 * D_MODEL]
            v = qkv[:, 2 * D_MODEL:]
        else:
            q = jnp.dot(q_in, wqkv[:, :D_MODEL],
                        preferred_element_type=jnp.float32) + bqkv[:, :D_MODEL]
            kv = jnp.dot(kv_in, wqkv[:, D_MODEL:],
                         preferred_element_type=jnp.float32) + bqkv[:, D_MODEL:]
            k = kv[:, :D_MODEL]
            v = kv[:, D_MODEL:]

        parts = []
        for b in range(BATCH):                       # static, fully unrolled
            keep = mask_ref[b] != 0.0                # (S, S); 0 == masked out
            qb = q[b * SEQ:(b + 1) * SEQ, :]
            kb = k[b * SEQ:(b + 1) * SEQ, :]
            vb = v[b * SEQ:(b + 1) * SEQ, :]
            acc = jnp.zeros((SEQ, D_MODEL), jnp.float32)
            for h in range(N_HEADS):                 # static, fully unrolled
                lo, hi = h * D_HEAD, (h + 1) * D_HEAD
                qs, ks, vs = qb[:, lo:hi], kb[:, lo:hi], vb[:, lo:hi]
                # scores = q_h @ k_h^T  (rhs-transposed contraction, no explicit .T)
                s = jax.lax.dot_general(qs, ks, (((1,), (1,)), ((), ())),
                                        preferred_element_type=jnp.float32)
                s = jnp.where(keep, s, -1e9)
                s = s - jnp.max(s, axis=-1, keepdims=True)
                p = jnp.exp(s)
                p = p * pl.reciprocal(jnp.sum(p, axis=-1, keepdims=True), approx=True)
                head = jnp.dot(p, vs, preferred_element_type=jnp.float32)   # (S, dh)
                # concat(heads) @ Wo  ==  sum_h head_h @ Wo[h*dh:(h+1)*dh, :]
                acc = acc + jnp.dot(head, wo[lo:hi, :],
                                    preferred_element_type=jnp.float32)
            parts.append(acc)
        return jnp.concatenate(parts, axis=0) + bo   # (ROWS, D)

    def feed_forward(xv):
        h = jnp.dot(xv, w1_ref[...], preferred_element_type=jnp.float32) + b1_ref[...]
        h = jnp.maximum(h, 0.0)
        return jnp.dot(h, w2_ref[...], preferred_element_type=jnp.float32) + b2_ref[...]

    x0 = x_ref[...]                                  # (ROWS, D)
    m0 = m_ref[...]                                  # (ROWS, D)

    # sublayer[0]: self-attention on x            (dropout == identity at inference)
    nx0 = layer_norm(x0, 0)
    x1 = x0 + mha(0, nx0, nx0, smask_ref, self_attn=True)
    pre_x = x1
    # sublayer[2]: src-attention  (x attends to raw embed)
    x2 = x1 + mha(1, layer_norm(x1, 2), m0, omask_ref, self_attn=False)
    # sublayer[3]: cross-attention (embed attends to raw pre_x)
    m1 = m0 + mha(2, layer_norm(m0, 3), pre_x, smask_ref, self_attn=False)
    # sublayer[1] / sublayer[4]: shared feed-forward, batched over both streams
    ff_in = jnp.concatenate([layer_norm(x2, 1), layer_norm(m1, 4)], axis=0)  # (2*ROWS, D)
    ff_out = feed_forward(ff_in)
    ox_ref[...] = x2 + ff_out[:ROWS, :]
    om_ref[...] = m1 + ff_out[ROWS:, :]


# ------------------------------ parameter packing -----------------------------
def _pack_params(params):
    """Fuse Wq|Wk|Wv, fold 1/sqrt(d_head) into Wq/bq, stack per-module tensors."""
    scale = 1.0 / (D_HEAD ** 0.5)
    wqkv, bqkv, wo, bo = [], [], [], []
    for name in ("self_attn", "src_attn", "cross_attn"):
        p = params[name]
        wqkv.append(jnp.concatenate([p["wq"] * scale, p["wk"], p["wv"]], axis=1))
        bqkv.append(jnp.concatenate([p["bq"] * scale, p["bk"], p["bv"]])[None, :])
        wo.append(p["wo"])
        bo.append(p["bo"][None, :])
    ff = params["ff"]
    return dict(
        wqkv=jnp.stack(wqkv),                        # (3, D, 3D)
        bqkv=jnp.stack(bqkv),                        # (3, 1, 3D)
        wo=jnp.stack(wo),                            # (3, D, D)
        bo=jnp.stack(bo),                            # (3, 1, D)
        w1=ff["w1"], b1=ff["b1"][None, :],
        w2=ff["w2"], b2=ff["b2"][None, :],
        lng=jnp.stack([ln["gamma"] for ln in params["ln"]], axis=0),   # (5, D)
        lnb=jnp.stack([ln["beta"] for ln in params["ln"]], axis=0),    # (5, D)
    )


def encoder_layer_forward(params, x, embed, src_mask, obd_enc_mask):
    B, S, D = x.shape
    pk = _pack_params(params)
    out_x, out_m = pl.pallas_call(
        _encoder_layer_kernel,
        out_shape=(jax.ShapeDtypeStruct((B * S, D), x.dtype),
                   jax.ShapeDtypeStruct((B * S, D), x.dtype)),
    )(x.reshape(B * S, D), embed.reshape(B * S, D),
      src_mask, obd_enc_mask,
      pk["wqkv"], pk["bqkv"], pk["wo"], pk["bo"],
      pk["w1"], pk["b1"], pk["w2"], pk["b2"],
      pk["lng"], pk["lnb"])
    return out_x.reshape(B, S, D), out_m.reshape(B, S, D)


# ----------------------------- pure-JAX reference -----------------------------
def _reference_forward(params, x, embed, src_mask, obd_enc_mask):
    def layer_norm(v, ln):
        mu = jnp.mean(v, axis=-1, keepdims=True)
        var = jnp.mean((v - mu) ** 2, axis=-1, keepdims=True)
        return ln["gamma"] * (v - mu) * jax.lax.rsqrt(var + LN_EPS) + ln["beta"]

    def mha(p, query, key, value, mask):
        B, Sq, D = query.shape

        def proj(t, w, b):
            y = t @ w + b
            return y.reshape(B, -1, N_HEADS, D_HEAD).transpose(0, 2, 1, 3)

        qh, kh, vh = proj(query, p["wq"], p["bq"]), proj(key, p["wk"], p["bk"]), proj(value, p["wv"], p["bv"])
        s = jnp.einsum("bhqd,bhkd->bhqk", qh, kh) / (D_HEAD ** 0.5)
        s = jnp.where(mask[:, None, :, :] == 0, -1e9, s)
        a = jax.nn.softmax(s, axis=-1)
        o = jnp.einsum("bhqk,bhkd->bhqd", a, vh).transpose(0, 2, 1, 3).reshape(B, Sq, D)
        return o @ p["wo"] + p["bo"]

    def ff(p, v):
        return jnp.maximum(v @ p["w1"] + p["b1"], 0.0) @ p["w2"] + p["b2"]

    m = embed
    nx = layer_norm(x, params["ln"][0])
    x1 = x + mha(params["self_attn"], nx, nx, nx, src_mask)
    pre_x = x1
    x2 = x1 + mha(params["src_attn"], layer_norm(x1, params["ln"][2]), m, m, obd_enc_mask)
    m1 = m + mha(params["cross_attn"], layer_norm(m, params["ln"][3]), pre_x, pre_x, src_mask)
    out_x = x2 + ff(params["ff"], layer_norm(x2, params["ln"][1]))
    out_m = m1 + ff(params["ff"], layer_norm(m1, params["ln"][4]))
    return out_x, out_m


# ------------------------------ parameter init --------------------------------
def _init_linear(key, din, dout):
    k1, k2 = jax.random.split(key)
    w = jax.random.normal(k1, (din, dout), jnp.float32) * 0.02
    b = jax.random.normal(k2, (dout,), jnp.float32) * 0.02
    return w, b


def init_params(key):
    ks = jax.random.split(key, 16)
    params = {}
    for name, kk in zip(("self_attn", "src_attn", "cross_attn"), ks[:3]):
        sub = jax.random.split(kk, 4)
        wq, bq = _init_linear(sub[0], D_MODEL, D_MODEL)
        wk, bk = _init_linear(sub[1], D_MODEL, D_MODEL)
        wv, bv = _init_linear(sub[2], D_MODEL, D_MODEL)
        wo, bo = _init_linear(sub[3], D_MODEL, D_MODEL)
        params[name] = dict(wq=wq, bq=bq, wk=wk, bk=bk, wv=wv, bv=bv, wo=wo, bo=bo)
    f1, f2 = jax.random.split(ks[3])
    w1, b1 = _init_linear(f1, D_MODEL, D_FF)
    w2, b2 = _init_linear(f2, D_FF, D_MODEL)
    params["ff"] = dict(w1=w1, b1=b1, w2=w2, b2=b2)
    params["ln"] = [dict(gamma=jnp.ones((D_MODEL,), jnp.float32),
                         beta=jnp.zeros((D_MODEL,), jnp.float32)) for _ in range(5)]
    return params


# ----------------------------------- main --------------------------------------
if __name__ == "__main__":
    key = jax.random.PRNGKey(0)
    kp, kx, ke = jax.random.split(key, 3)
    params = init_params(kp)

    x = jax.random.normal(kx, (BATCH, SEQ, D_MODEL), jnp.float32)
    embed = jax.random.normal(ke, (BATCH, SEQ, D_MODEL), jnp.float32)

    # src_mask: causal; obd_enc_mask: full visibility.  (B, S, S), nonzero == keep.
    src_mask = jnp.broadcast_to(
        jnp.tril(jnp.ones((SEQ, SEQ), jnp.float32)), (BATCH, SEQ, SEQ))
    obd_enc_mask = jnp.ones((BATCH, SEQ, SEQ), jnp.float32)

    fwd = jax.jit(encoder_layer_forward)
    out_x, out_m = fwd(params, x, embed, src_mask, obd_enc_mask)
    jax.block_until_ready((out_x, out_m))

    ref_x, ref_m = _reference_forward(params, x, embed, src_mask, obd_enc_mask)

    assert out_x.shape == (BATCH, SEQ, D_MODEL) and out_m.shape == (BATCH, SEQ, D_MODEL)
    assert bool(jnp.all(jnp.isfinite(out_x))) and bool(jnp.all(jnp.isfinite(out_m)))
    assert bool(jnp.allclose(out_x, ref_x, rtol=2e-3, atol=2e-3))
    assert bool(jnp.allclose(out_m, ref_m, rtol=2e-3, atol=2e-3))
    print("KERNEL_OK")
</pallas_src>

<mosaic_0001>
module attributes {stable_mosaic.version = 11 : i64} {
  func.func @_encoder_layer_kernel(%arg0: memref<16x32xf32, #tpu.memory_space<vmem>>, %arg1: memref<16x32xf32, #tpu.memory_space<vmem>>, %arg2: memref<2x8x8xf32, #tpu.memory_space<vmem>>, %arg3: memref<2x8x8xf32, #tpu.memory_space<vmem>>, %arg4: memref<3x32x96xf32, #tpu.memory_space<vmem>>, %arg5: memref<3x1x96xf32, #tpu.memory_space<vmem>>, %arg6: memref<3x32x32xf32, #tpu.memory_space<vmem>>, %arg7: memref<3x1x32xf32, #tpu.memory_space<vmem>>, %arg8: memref<32x64xf32, #tpu.memory_space<vmem>>, %arg9: memref<1x64xf32, #tpu.memory_space<vmem>>, %arg10: memref<64x32xf32, #tpu.memory_space<vmem>>, %arg11: memref<1x32xf32, #tpu.memory_space<vmem>>, %arg12: memref<5x32xf32, #tpu.memory_space<vmem>>, %arg13: memref<5x32xf32, #tpu.memory_space<vmem>>, %arg14: memref<16x32xf32, #tpu.memory_space<vmem>>, %arg15: memref<16x32xf32, #tpu.memory_space<vmem>>) attributes {dimension_semantics = [], scalar_prefetch = 0 : i64, scratch_operands = 0 : i64, tpu.core_type = #tpu.core_type<tc>} {
    %c0 = arith.constant 0 : index
    %c0_0 = arith.constant 0 : index
    %0 = vector.load %arg0[%c0, %c0_0] : memref<16x32xf32, #tpu.memory_space<vmem>>, vector<16x32xf32>
    %c0_1 = arith.constant 0 : index
    %c0_2 = arith.constant 0 : index
    %1 = vector.load %arg1[%c0_1, %c0_2] : memref<16x32xf32, #tpu.memory_space<vmem>>, vector<16x32xf32>
    %c0_3 = arith.constant 0 : index
    %c0_4 = arith.constant 0 : index
    %2 = vector.load %arg12[%c0_3, %c0_4] : memref<5x32xf32, #tpu.memory_space<vmem>>, vector<1x32xf32>
    %c0_5 = arith.constant 0 : index
    %c0_6 = arith.constant 0 : index
    %3 = vector.load %arg13[%c0_5, %c0_6] : memref<5x32xf32, #tpu.memory_space<vmem>>, vector<1x32xf32>
    %cst = arith.constant dense<0.000000e+00> : vector<16xf32>
    %4 = vector.multi_reduction <add>, %0, %cst [1] : vector<16x32xf32> to vector<16xf32>
    %5 = vector.shape_cast %4 : vector<16xf32> to vector<16x1xf32>
    %cst_7 = arith.constant 3.200000e+01 : f32
    %6 = vector.broadcast %cst_7 : f32 to vector<16x1xf32>
    %7 = arith.divf %5, %6 : vector<16x1xf32>
    %8 = vector.broadcast %7 : vector<16x1xf32> to vector<16x32xf32>
    %9 = arith.subf %0, %8 : vector<16x32xf32>
    %10 = arith.mulf %9, %9 : vector<16x32xf32>
    %cst_8 = arith.constant dense<0.000000e+00> : vector<16xf32>
    %11 = vector.multi_reduction <add>, %10, %cst_8 [1] : vector<16x32xf32> to vector<16xf32>
    %12 = vector.shape_cast %11 : vector<16xf32> to vector<16x1xf32>
    %cst_9 = arith.constant 3.200000e+01 : f32
    %13 = vector.broadcast %cst_9 : f32 to vector<16x1xf32>
    %14 = arith.divf %12, %13 : vector<16x1xf32>
    %15 = vector.broadcast %7 : vector<16x1xf32> to vector<16x32xf32>
    %16 = arith.subf %0, %15 : vector<16x32xf32>
    %17 = vector.broadcast %2 : vector<1x32xf32> to vector<16x32xf32>
    %18 = arith.mulf %17, %16 : vector<16x32xf32>
    %cst_10 = arith.constant 9.99999974E-6 : f32
    %19 = vector.broadcast %cst_10 : f32 to vector<16x1xf32>
    %20 = arith.addf %14, %19 : vector<16x1xf32>
    %21 = math.rsqrt %20 : vector<16x1xf32>
    %22 = vector.broadcast %21 : vector<16x1xf32> to vector<16x32xf32>
    %23 = arith.mulf %18, %22 : vector<16x32xf32>
    %24 = vector.broadcast %3 : vector<1x32xf32> to vector<16x32xf32>
    %25 = arith.addf %23, %24 : vector<16x32xf32>
    %c0_11 = arith.constant 0 : index
    %c0_12 = arith.constant 0 : index
    %c0_13 = arith.constant 0 : index
    %26 = vector.load %arg4[%c0_11, %c0_12, %c0_13] : memref<3x32x96xf32, #tpu.memory_space<vmem>>, vector<1x32x96xf32>
    %27 = vector.shape_cast %26 : vector<1x32x96xf32> to vector<32x96xf32>
    %c0_14 = arith.constant 0 : index
    %c0_15 = arith.constant 0 : index
    %c0_16 = arith.constant 0 : index
    %28 = vector.load %arg5[%c0_14, %c0_15, %c0_16] : memref<3x1x96xf32, #tpu.memory_space<vmem>>, vector<1x1x96xf32>
    %29 = vector.shape_cast %28 : vector<1x1x96xf32> to vector<1x96xf32>
    %c0_17 = arith.constant 0 : index
    %c0_18 = arith.constant 0 : index
    %c0_19 = arith.constant 0 : index
    %30 = vector.load %arg6[%c0_17, %c0_18, %c0_19] : memref<3x32x32xf32, #tpu.memory_space<vmem>>, vector<1x32x32xf32>
    %31 = vector.shape_cast %30 : vector<1x32x32xf32> to vector<32x32xf32>
    %c0_20 = arith.constant 0 : index
    %c0_21 = arith.constant 0 : index
    %c0_22 = arith.constant 0 : index
    %32 = vector.load %arg7[%c0_20, %c0_21, %c0_22] : memref<3x1x32xf32, #tpu.memory_space<vmem>>, vector<1x1x32xf32>
    %33 = vector.shape_cast %32 : vector<1x1x32xf32> to vector<1x32xf32>
    %cst_23 = arith.constant dense<0.000000e+00> : vector<16x96xf32>
    %34 = tpu.matmul %25, %27, %cst_23 {dimension_numbers = #tpu.dot_dimension_numbers<[1], [0], [0], [1], [0, 0, 1, 1], [], []>} : vector<16x32xf32>, vector<32x96xf32>, vector<16x96xf32> -> vector<16x96xf32>
    %35 = vector.broadcast %29 : vector<1x96xf32> to vector<16x96xf32>
    %36 = arith.addf %34, %35 : vector<16x96xf32>
    %37 = vector.extract_strided_slice %36 {offsets = [0, 0], sizes = [16, 32], strides = [1, 1]} : vector<16x96xf32> to vector<16x32xf32>
    %38 = vector.extract_strided_slice %36 {offsets = [0, 32], sizes = [16, 32], strides = [1, 1]} : vector<16x96xf32> to vector<16x32xf32>
    %39 = vector.extract_strided_slice %36 {offsets = [0, 64], sizes = [16, 32], strides = [1, 1]} : vector<16x96xf32> to vector<16x32xf32>
    %c0_24 = arith.constant 0 : index
    %c0_25 = arith.constant 0 : index
    %c0_26 = arith.constant 0 : index
    %40 = vector.load %arg2[%c0_24, %c0_25, %c0_26] : memref<2x8x8xf32, #tpu.memory_space<vmem>>, vector<1x8x8xf32>
    %41 = vector.shape_cast %40 : vector<1x8x8xf32> to vector<8x8xf32>
    %cst_27 = arith.constant 0.000000e+00 : f32
    %42 = vector.broadcast %cst_27 : f32 to vector<8x8xf32>
    %43 = arith.cmpf one, %41, %42 : vector<8x8xf32>
    %44 = vector.extract_strided_slice %37 {offsets = [0, 0], sizes = [8, 32], strides = [1, 1]} : vector<16x32xf32> to vector<8x32xf32>
    %45 = vector.extract_strided_slice %38 {offsets = [0, 0], sizes = [8, 32], strides = [1, 1]} : vector<16x32xf32> to vector<8x32xf32>
    %46 = vector.extract_strided_slice %39 {offsets = [0, 0], sizes = [8, 32], strides = [1, 1]} : vector<16x32xf32> to vector<8x32xf32>
    %cst_28 = arith.constant 0.000000e+00 : f32
    %47 = vector.broadcast %cst_28 : f32 to vector<8x32xf32>
    %48 = vector.extract_strided_slice %44 {offsets = [0, 0], sizes = [8, 8], strides = [1, 1]} : vector<8x32xf32> to vector<8x8xf32>
    %49 = vector.extract_strided_slice %45 {offsets = [0, 0], sizes = [8, 8], strides = [1, 1]} : vector<8x32xf32> to vector<8x8xf32>
    %50 = vector.extract_strided_slice %46 {offsets = [0, 0], sizes = [8, 8], strides = [1, 1]} : vector<8x32xf32> to vector<8x8xf32>
    %cst_29 = arith.constant dense<0.000000e+00> : vector<8x8xf32>
    %51 = tpu.matmul %48, %49, %cst_29 {dimension_numbers = #tpu.dot_dimension_numbers<[1], [1], [0], [0], [0, 0, 1, 0], [], []>} : vector<8x8xf32>, vector<8x8xf32>, vector<8x8xf32> -> vector<8x8xf32>
    %cst_30 = arith.constant -1.000000e+09 : f32
    %52 = vector.broadcast %cst_30 : f32 to vector<8x8xf32>
    %53 = arith.select %43, %51, %52 : vector<8x8xi1>, vector<8x8xf32>
    %cst_31 = arith.constant dense<0xFF800000> : vector<8xf32>
    %54 = vector.multi_reduction <maximumf>, %53, %cst_31 [1] : vector<8x8xf32> to vector<8xf32>
    %55 = vector.shape_cast %54 : vector<8xf32> to vector<8x1xf32>
    %56 = vector.broadcast %55 : vector<8x1xf32> to vector<8x8xf32>
    %57 = arith.subf %53, %56 : vector<8x8xf32>
    %58 = math.exp %57 : vector<8x8xf32>
    %cst_32 = arith.constant dense<0.000000e+00> : vector<8xf32>
    %59 = vector.multi_reduction <add>, %58, %cst_32 [1] : vector<8x8xf32> to vector<8xf32>
    %60 = vector.shape_cast %59 : vector<8xf32> to vector<8x1xf32>
    %61 = tpu.reciprocal %60 {approx = true} : vector<8x1xf32> -> vector<8x1xf32>
    %62 = vector.broadcast %61 : vector<8x1xf32> to vector<8x8xf32>
    %63 = arith.mulf %58, %62 : vector<8x8xf32>
    %cst_33 = arith.constant dense<0.000000e+00> : vector<8x8xf32>
    %64 = tpu.matmul %63, %50, %cst_33 {dimension_numbers = #tpu.dot_dimension_numbers<[1], [0], [0], [1], [0, 0, 1, 1], [], []>} : vector<8x8xf32>, vector<8x8xf32>, vector<8x8xf32> -> vector<8x8xf32>
    %65 = vector.extract_strided_slice %31 {offsets = [0, 0], sizes = [8, 32], strides = [1, 1]} : vector<32x32xf32> to vector<8x32xf32>
    %cst_34 = arith.constant dense<0.000000e+00> : vector<8x32xf32>
    %66 = tpu.matmul %64, %65, %cst_34 {dimension_numbers = #tpu.dot_dimension_numbers<[1], [0], [0], [1], [0, 0, 1, 1], [], []>} : vector<8x8xf32>, vector<8x32xf32>, vector<8x32xf32> -> vector<8x32xf32>
    %67 = arith.addf %47, %66 : vector<8x32xf32>
    %68 = vector.extract_strided_slice %44 {offsets = [0, 8], sizes = [8, 8], strides = [1, 1]} : vector<8x32xf32> to vector<8x8xf32>
    %69 = vector.extract_strided_slice %45 {offsets = [0, 8], sizes = [8, 8], strides = [1, 1]} : vector<8x32xf32> to vector<8x8xf32>
    %70 = vector.extract_strided_slice %46 {offsets = [0, 8], sizes = [8, 8], strides = [1, 1]} : vector<8x32xf32> to vector<8x8xf32>
    %cst_35 = arith.constant dense<0.000000e+00> : vector<8x8xf32>
    %71 = tpu.matmul %68, %69, %cst_35 {dimension_numbers = #tpu.dot_dimension_numbers<[1], [1], [0], [0], [0, 0, 1, 0], [], []>} : vector<8x8xf32>, vector<8x8xf32>, vector<8x8xf32> -> vector<8x8xf32>
    %cst_36 = arith.constant -1.000000e+09 : f32
    %72 = vector.broadcast %cst_36 : f32 to vector<8x8xf32>
    %73 = arith.select %43, %71, %72 : vector<8x8xi1>, vector<8x8xf32>
    %cst_37 = arith.constant dense<0xFF800000> : vector<8xf32>
    %74 = vector.multi_reduction <maximumf>, %73, %cst_37 [1] : vector<8x8xf32> to vector<8xf32>
    %75 = vector.shape_cast %74 : vector<8xf32> to vector<8x1xf32>
    %76 = vector.broadcast %75 : vector<8x1xf32> to vector<8x8xf32>
    %77 = arith.subf %73, %76 : vector<8x8xf32>
    %78 = math.exp %77 : vector<8x8xf32>
    %cst_38 = arith.constant dense<0.000000e+00> : vector<8xf32>
    %79 = vector.multi_reduction <add>, %78, %cst_38 [1] : vector<8x8xf32> to vector<8xf32>
    %80 = vector.shape_cast %79 : vector<8xf32> to vector<8x1xf32>
    %81 = tpu.reciprocal %80 {approx = true} : vector<8x1xf32> -> vector<8x1xf32>
    %82 = vector.broadcast %81 : vector<8x1xf32> to vector<8x8xf32>
    %83 = arith.mulf %78, %82 : vector<8x8xf32>
    %cst_39 = arith.constant dense<0.000000e+00> : vector<8x8xf32>
    %84 = tpu.matmul %83, %70, %cst_39 {dimension_numbers = #tpu.dot_dimension_numbers<[1], [0], [0], [1], [0, 0, 1, 1], [], []>} : vector<8x8xf32>, vector<8x8xf32>, vector<8x8xf32> -> vector<8x8xf32>
    %85 = vector.extract_strided_slice %31 {offsets = [8, 0], sizes = [8, 32], strides = [1, 1]} : vector<32x32xf32> to vector<8x32xf32>
    %cst_40 = arith.constant dense<0.000000e+00> : vector<8x32xf32>
    %86 = tpu.matmul %84, %85, %cst_40 {dimension_numbers = #tpu.dot_dimension_numbers<[1], [0], [0], [1], [0, 0, 1, 1], [], []>} : vector<8x8xf32>, vector<8x32xf32>, vector<8x32xf32> -> vector<8x32xf32>
    %87 = arith.addf %67, %86 : vector<8x32xf32>
    %88 = vector.extract_strided_slice %44 {offsets = [0, 16], sizes = [8, 8], strides = [1, 1]} : vector<8x32xf32> to vector<8x8xf32>
    %89 = vector.extract_strided_slice %45 {offsets = [0, 16], sizes = [8, 8], strides = [1, 1]} : vector<8x32xf32> to vector<8x8xf32>
    %90 = vector.extract_strided_slice %46 {offsets = [0, 16], sizes = [8, 8], strides = [1, 1]} : vector<8x32xf32> to vector<8x8xf32>
    %cst_41 = arith.constant dense<0.000000e+00> : vector<8x8xf32>
    %91 = tpu.matmul %88, %89, %cst_41 {dimension_numbers = #tpu.dot_dimension_numbers<[1], [1], [0], [0], [0, 0, 1, 0], [], []>} : vector<8x8xf32>, vector<8x8xf32>, vector<8x8xf32> -> vector<8x8xf32>
    %cst_42 = arith.constant -1.000000e+09 : f32
    %92 = vector.broadcast %cst_42 : f32 to vector<8x8xf32>
    %93 = arith.select %43, %91, %92 : vector<8x8xi1>, vector<8x8xf32>
    %cst_43 = arith.constant dense<0xFF800000> : vector<8xf32>
    %94 = vector.multi_reduction <maximumf>, %93, %cst_43 [1] : vector<8x8xf32> to vector<8xf32>
    %95 = vector.shape_cast %94 : vector<8xf32> to vector<8x1xf32>
    %96 = vector.broadcast %95 : vector<8x1xf32> to vector<8x8xf32>
    %97 = arith.subf %93, %96 : vector<8x8xf32>
    %98 = math.exp %97 : vector<8x8xf32>
    %cst_44 = arith.constant dense<0.000000e+00> : vector<8xf32>
    %99 = vector.multi_reduction <add>, %98, %cst_44 [1] : vector<8x8xf32> to vector<8xf32>
    %100 = vector.shape_cast %99 : vector<8xf32> to vector<8x1xf32>
    %101 = tpu.reciprocal %100 {approx = true} : vector<8x1xf32> -> vector<8x1xf32>
    %102 = vector.broadcast %101 : vector<8x1xf32> to vector<8x8xf32>
    %103 = arith.mulf %98, %102 : vector<8x8xf32>
    %cst_45 = arith.constant dense<0.000000e+00> : vector<8x8xf32>
    %104 = tpu.matmul %103, %90, %cst_45 {dimension_numbers = #tpu.dot_dimension_numbers<[1], [0], [0], [1], [0, 0, 1, 1], [], []>} : vector<8x8xf32>, vector<8x8xf32>, vector<8x8xf32> -> vector<8x8xf32>
    %105 = vector.extract_strided_slice %31 {offsets = [16, 0], sizes = [8, 32], strides = [1, 1]} : vector<32x32xf32> to vector<8x32xf32>
    %cst_46 = arith.constant dense<0.000000e+00> : vector<8x32xf32>
    %106 = tpu.matmul %104, %105, %cst_46 {dimension_numbers = #tpu.dot_dimension_numbers<[1], [0], [0], [1], [0, 0, 1, 1], [], []>} : vector<8x8xf32>, vector<8x32xf32>, vector<8x32xf32> -> vector<8x32xf32>
    %107 = arith.addf %87, %106 : vector<8x32xf32>
    %108 = vector.extract_strided_slice %44 {offsets = [0, 24], sizes = [8, 8], strides = [1, 1]} : vector<8x32xf32> to vector<8x8xf32>
    %109 = vector.extract_strided_slice %45 {offsets = [0, 24], sizes = [8, 8], strides = [1, 1]} : vector<8x32xf32> to vector<8x8xf32>
    %110 = vector.extract_strided_slice %46 {offsets = [0, 24], sizes = [8, 8], strides = [1, 1]} : vector<8x32xf32> to vector<8x8xf32>
    %cst_47 = arith.constant dense<0.000000e+00> : vector<8x8xf32>
    %111 = tpu.matmul %108, %109, %cst_47 {dimension_numbers = #tpu.dot_dimension_numbers<[1], [1], [0], [0], [0, 0, 1, 0], [], []>} : vector<8x8xf32>, vector<8x8xf32>, vector<8x8xf32> -> vector<8x8xf32>
    %cst_48 = arith.constant -1.000000e+09 : f32
    %112 = vector.broadcast %cst_48 : f32 to vector<8x8xf32>
    %113 = arith.select %43, %111, %112 : vector<8x8xi1>, vector<8x8xf32>
    %cst_49 = arith.constant dense<0xFF800000> : vector<8xf32>
    %114 = vector.multi_reduction <maximumf>, %113, %cst_49 [1] : vector<8x8xf32> to vector<8xf32>
    %115 = vector.shape_cast %114 : vector<8xf32> to vector<8x1xf32>
    %116 = vector.broadcast %115 : vector<8x1xf32> to vector<8x8xf32>
    %117 = arith.subf %113, %116 : vector<8x8xf32>
    %118 = math.exp %117 : vector<8x8xf32>
    %cst_50 = arith.constant dense<0.000000e+00> : vector<8xf32>
    %119 = vector.multi_reduction <add>, %118, %cst_50 [1] : vector<8x8xf32> to vector<8xf32>
    %120 = vector.shape_cast %119 : vector<8xf32> to vector<8x1xf32>
    %121 = tpu.reciprocal %120 {approx = true} : vector<8x1xf32> -> vector<8x1xf32>
    %122 = vector.broadcast %121 : vector<8x1xf32> to vector<8x8xf32>
    %123 = arith.mulf %118, %122 : vector<8x8xf32>
    %cst_51 = arith.constant dense<0.000000e+00> : vector<8x8xf32>
    %124 = tpu.matmul %123, %110, %cst_51 {dimension_numbers = #tpu.dot_dimension_numbers<[1], [0], [0], [1], [0, 0, 1, 1], [], []>} : vector<8x8xf32>, vector<8x8xf32>, vector<8x8xf32> -> vector<8x8xf32>
    %125 = vector.extract_strided_slice %31 {offsets = [24, 0], sizes = [8, 32], strides = [1, 1]} : vector<32x32xf32> to vector<8x32xf32>
    %cst_52 = arith.constant dense<0.000000e+00> : vector<8x32xf32>
    %126 = tpu.matmul %124, %125, %cst_52 {dimension_numbers = #tpu.dot_dimension_numbers<[1], [0], [0], [1], [0, 0, 1, 1], [], []>} : vector<8x8xf32>, vector<8x32xf32>, vector<8x32xf32> -> vector<8x32xf32>
    %127 = arith.addf %107, %126 : vector<8x32xf32>
    %c1 = arith.constant 1 : index
    %c0_53 = arith.constant 0 : index
    %c0_54 = arith.constant 0 : index
    %128 = vector.load %arg2[%c1, %c0_53, %c0_54] : memref<2x8x8xf32, #tpu.memory_space<vmem>>, vector<1x8x8xf32>
    %129 = vector.shape_cast %128 : vector<1x8x8xf32> to vector<8x8xf32>
    %cst_55 = arith.constant 0.000000e+00 : f32
    %130 = vector.broadcast %cst_55 : f32 to vector<8x8xf32>
    %131 = arith.cmpf one, %129, %130 : vector<8x8xf32>
    %132 = vector.extract_strided_slice %37 {offsets = [8, 0], sizes = [8, 32], strides = [1, 1]} : vector<16x32xf32> to vector<8x32xf32>
    %133 = vector.extract_strided_slice %38 {offsets = [8, 0], sizes = [8, 32], strides = [1, 1]} : vector<16x32xf32> to vector<8x32xf32>
    %134 = vector.extract_strided_slice %39 {offsets = [8, 0], sizes = [8, 32], strides = [1, 1]} : vector<16x32xf32> to vector<8x32xf32>
    %cst_56 = arith.constant 0.000000e+00 : f32
    %135 = vector.broadcast %cst_56 : f32 to vector<8x32xf32>
    %136 = vector.extract_strided_slice %132 {offsets = [0, 0], sizes = [8, 8], strides = [1, 1]} : vector<8x32xf32> to vector<8x8xf32>
    %137 = vector.extract_strided_slice %133 {offsets = [0, 0], sizes = [8, 8], strides = [1, 1]} : vector<8x32xf32> to vector<8x8xf32>
    %138 = vector.extract_strided_slice %134 {offsets = [0, 0], sizes = [8, 8], strides = [1, 1]} : vector<8x32xf32> to vector<8x8xf32>
    %cst_57 = arith.constant dense<0.000000e+00> : vector<8x8xf32>
    %139 = tpu.matmul %136, %137, %cst_57 {dimension_numbers = #tpu.dot_dimension_numbers<[1], [1], [0], [0], [0, 0, 1, 0], [], []>} : vector<8x8xf32>, vector<8x8xf32>, vector<8x8xf32> -> vector<8x8xf32>
    %cst_58 = arith.constant -1.000000e+09 : f32
    %140 = vector.broadcast %cst_58 : f32 to vector<8x8xf32>
    %141 = arith.select %131, %139, %140 : vector<8x8xi1>, vector<8x8xf32>
    %cst_59 = arith.constant dense<0xFF800000> : vector<8xf32>
    %142 = vector.multi_reduction <maximumf>, %141, %cst_59 [1] : vector<8x8xf32> to vector<8xf32>
    %143 = vector.shape_cast %142 : vector<8xf32> to vector<8x1xf32>
    %144 = vector.broadcast %143 : vector<8x1xf32> to vector<8x8xf32>
    %145 = arith.subf %141, %144 : vector<8x8xf32>
    %146 = math.exp %145 : vector<8x8xf32>
    %cst_60 = arith.constant dense<0.000000e+00> : vector<8xf32>
    %147 = vector.multi_reduction <add>, %146, %cst_60 [1] : vector<8x8xf32> to vector<8xf32>
    %148 = vector.shape_cast %147 : vector<8xf32> to vector<8x1xf32>
    %149 = tpu.reciprocal %148 {approx = true} : vector<8x1xf32> -> vector<8x1xf32>
    %150 = vector.broadcast %149 : vector<8x1xf32> to vector<8x8xf32>
    %151 = arith.mulf %146, %150 : vector<8x8xf32>
    %cst_61 = arith.constant dense<0.000000e+00> : vector<8x8xf32>
    %152 = tpu.matmul %151, %138, %cst_61 {dimension_numbers = #tpu.dot_dimension_numbers<[1], [0], [0], [1], [0, 0, 1, 1], [], []>} : vector<8x8xf32>, vector<8x8xf32>, vector<8x8xf32> -> vector<8x8xf32>
    %153 = vector.extract_strided_slice %31 {offsets = [0, 0], sizes = [8, 32], strides = [1, 1]} : vector<32x32xf32> to vector<8x32xf32>
    %cst_62 = arith.constant dense<0.000000e+00> : vector<8x32xf32>
    %154 = tpu.matmul %152, %153, %cst_62 {dimension_numbers = #tpu.dot_dimension_numbers<[1], [0], [0], [1], [0, 0, 1, 1], [], []>} : vector<8x8xf32>, vector<8x32xf32>, vector<8x32xf32> -> vector<8x32xf32>
    %155 = arith.addf %135, %154 : vector<8x32xf32>
    %156 = vector.extract_strided_slice %132 {offsets = [0, 8], sizes = [8, 8], strides = [1, 1]} : vector<8x32xf32> to vector<8x8xf32>
    %157 = vector.extract_strided_slice %133 {offsets = [0, 8], sizes = [8, 8], strides = [1, 1]} : vector<8x32xf32> to vector<8x8xf32>
    %158 = vector.extract_strided_slice %134 {offsets = [0, 8], sizes = [8, 8], strides = [1, 1]} : vector<8x32xf32> to vector<8x8xf32>
    %cst_63 = arith.constant dense<0.000000e+00> : vector<8x8xf32>
    %159 = tpu.matmul %156, %157, %cst_63 {dimension_numbers = #tpu.dot_dimension_numbers<[1], [1], [0], [0], [0, 0, 1, 0], [], []>} : vector<8x8xf32>, vector<8x8xf32>, vector<8x8xf32> -> vector<8x8xf32>
    %cst_64 = arith.constant -1.000000e+09 : f32
    %160 = vector.broadcast %cst_64 : f32 to vector<8x8xf32>
    %161 = arith.select %131, %159, %160 : vector<8x8xi1>, vector<8x8xf32>
    %cst_65 = arith.constant dense<0xFF800000> : vector<8xf32>
    %162 = vector.multi_reduction <maximumf>, %161, %cst_65 [1] : vector<8x8xf32> to vector<8xf32>
    %163 = vector.shape_cast %162 : vector<8xf32> to vector<8x1xf32>
    %164 = vector.broadcast %163 : vector<8x1xf32> to vector<8x8xf32>
    %165 = arith.subf %161, %164 : vector<8x8xf32>
    %166 = math.exp %165 : vector<8x8xf32>
    %cst_66 = arith.constant dense<0.000000e+00> : vector<8xf32>
    %167 = vector.multi_reduction <add>, %166, %cst_66 [1] : vector<8x8xf32> to vector<8xf32>
    %168 = vector.shape_cast %167 : vector<8xf32> to vector<8x1xf32>
    %169 = tpu.reciprocal %168 {approx = true} : vector<8x1xf32> -> vector<8x1xf32>
    %170 = vector.broadcast %169 : vector<8x1xf32> to vector<8x8xf32>
    %171 = arith.mulf %166, %170 : vector<8x8xf32>
    %cst_67 = arith.constant dense<0.000000e+00> : vector<8x8xf32>
    %172 = tpu.matmul %171, %158, %cst_67 {dimension_numbers = #tpu.dot_dimension_numbers<[1], [0], [0], [1], [0, 0, 1, 1], [], []>} : vector<8x8xf32>, vector<8x8xf32>, vector<8x8xf32> -> vector<8x8xf32>
    %173 = vector.extract_strided_slice %31 {offsets = [8, 0], sizes = [8, 32], strides = [1, 1]} : vector<32x32xf32> to vector<8x32xf32>
    %cst_68 = arith.constant dense<0.000000e+00> : vector<8x32xf32>
    %174 = tpu.matmul %172, %173, %cst_68 {dimension_numbers = #tpu.dot_dimension_numbers<[1], [0], [0], [1], [0, 0, 1, 1], [], []>} : vector<8x8xf32>, vector<8x32xf32>, vector<8x32xf32> -> vector<8x32xf32>
    %175 = arith.addf %155, %174 : vector<8x32xf32>
    %176 = vector.extract_strided_slice %132 {offsets = [0, 16], sizes = [8, 8], strides = [1, 1]} : vector<8x32xf32> to vector<8x8xf32>
    %177 = vector.extract_strided_slice %133 {offsets = [0, 16], sizes = [8, 8], strides = [1, 1]} : vector<8x32xf32> to vector<8x8xf32>
    %178 = vector.extract_strided_slice %134 {offsets = [0, 16], sizes = [8, 8], strides = [1, 1]} : vector<8x32xf32> to vector<8x8xf32>
    %cst_69 = arith.constant dense<0.000000e+00> : vector<8x8xf32>
    %179 = tpu.matmul %176, %177, %cst_69 {dimension_numbers = #tpu.dot_dimension_numbers<[1], [1], [0], [0], [0, 0, 1, 0], [], []>} : vector<8x8xf32>, vector<8x8xf32>, vector<8x8xf32> -> vector<8x8xf32>
    %cst_70 = arith.constant -1.000000e+09 : f32
    %180 = vector.broadcast %cst_70 : f32 to vector<8x8xf32>
    %181 = arith.select %131, %179, %180 : vector<8x8xi1>, vector<8x8xf32>
    %cst_71 = arith.constant dense<0xFF800000> : vector<8xf32>
    %182 = vector.multi_reduction <maximumf>, %181, %cst_71 [1] : vector<8x8xf32> to vector<8xf32>
    %183 = vector.shape_cast %182 : vector<8xf32> to vector<8x1xf32>
    %184 = vector.broadcast %183 : vector<8x1xf32> to vector<8x8xf32>
    %185 = arith.subf %181, %184 : vector<8x8xf32>
    %186 = math.exp %185 : vector<8x8xf32>
    %cst_72 = arith.constant dense<0.000000e+00> : vector<8xf32>
    %187 = vector.multi_reduction <add>, %186, %cst_72 [1] : vector<8x8xf32> to vector<8xf32>
    %188 = vector.shape_cast %187 : vector<8xf32> to vector<8x1xf32>
    %189 = tpu.reciprocal %188 {approx = true} : vector<8x1xf32> -> vector<8x1xf32>
    %190 = vector.broadcast %189 : vector<8x1xf32> to vector<8x8xf32>
    %191 = arith.mulf %186, %190 : vector<8x8xf32>
    %cst_73 = arith.constant dense<0.000000e+00> : vector<8x8xf32>
    %192 = tpu.matmul %191, %178, %cst_73 {dimension_numbers = #tpu.dot_dimension_numbers<[1], [0], [0], [1], [0, 0, 1, 1], [], []>} : vector<8x8xf32>, vector<8x8xf32>, vector<8x8xf32> -> vector<8x8xf32>
    %193 = vector.extract_strided_slice %31 {offsets = [16, 0], sizes = [8, 32], strides = [1, 1]} : vector<32x32xf32> to vector<8x32xf32>
    %cst_74 = arith.constant dense<0.000000e+00> : vector<8x32xf32>
    %194 = tpu.matmul %192, %193, %cst_74 {dimension_numbers = #tpu.dot_dimension_numbers<[1], [0], [0], [1], [0, 0, 1, 1], [], []>} : vector<8x8xf32>, vector<8x32xf32>, vector<8x32xf32> -> vector<8x32xf32>
    %195 = arith.addf %175, %194 : vector<8x32xf32>
    %196 = vector.extract_strided_slice %132 {offsets = [0, 24], sizes = [8, 8], strides = [1, 1]} : vector<8x32xf32> to vector<8x8xf32>
    %197 = vector.extract_strided_slice %133 {offsets = [0, 24], sizes = [8, 8], strides = [1, 1]} : vector<8x32xf32> to vector<8x8xf32>
    %198 = vector.extract_strided_slice %134 {offsets = [0, 24], sizes = [8, 8], strides = [1, 1]} : vector<8x32xf32> to vector<8x8xf32>
    %cst_75 = arith.constant dense<0.000000e+00> : vector<8x8xf32>
    %199 = tpu.matmul %196, %197, %cst_75 {dimension_numbers = #tpu.dot_dimension_numbers<[1], [1], [0], [0], [0, 0, 1, 0], [], []>} : vector<8x8xf32>, vector<8x8xf32>, vector<8x8xf32> -> vector<8x8xf32>
    %cst_76 = arith.constant -1.000000e+09 : f32
    %200 = vector.broadcast %cst_76 : f32 to vector<8x8xf32>
    %201 = arith.select %131, %199, %200 : vector<8x8xi1>, vector<8x8xf32>
    %cst_77 = arith.constant dense<0xFF800000> : vector<8xf32>
    %202 = vector.multi_reduction <maximumf>, %201, %cst_77 [1] : vector<8x8xf32> to vector<8xf32>
    %203 = vector.shape_cast %202 : vector<8xf32> to vector<8x1xf32>
    %204 = vector.broadcast %203 : vector<8x1xf32> to vector<8x8xf32>
    %205 = arith.subf %201, %204 : vector<8x8xf32>
    %206 = math.exp %205 : vector<8x8xf32>
    %cst_78 = arith.constant dense<0.000000e+00> : vector<8xf32>
    %207 = vector.multi_reduction <add>, %206, %cst_78 [1] : vector<8x8xf32> to vector<8xf32>
    %208 = vector.shape_cast %207 : vector<8xf32> to vector<8x1xf32>
    %209 = tpu.reciprocal %208 {approx = true} : vector<8x1xf32> -> vector<8x1xf32>
    %210 = vector.broadcast %209 : vector<8x1xf32> to vector<8x8xf32>
    %211 = arith.mulf %206, %210 : vector<8x8xf32>
    %cst_79 = arith.constant dense<0.000000e+00> : vector<8x8xf32>
    %212 = tpu.matmul %211, %198, %cst_79 {dimension_numbers = #tpu.dot_dimension_numbers<[1], [0], [0], [1], [0, 0, 1, 1], [], []>} : vector<8x8xf32>, vector<8x8xf32>, vector<8x8xf32> -> vector<8x8xf32>
    %213 = vector.extract_strided_slice %31 {offsets = [24, 0], sizes = [8, 32], strides = [1, 1]} : vector<32x32xf32> to vector<8x32xf32>
    %cst_80 = arith.constant dense<0.000000e+00> : vector<8x32xf32>
    %214 = tpu.matmul %212, %213, %cst_80 {dimension_numbers = #tpu.dot_dimension_numbers<[1], [0], [0], [1], [0, 0, 1, 1], [], []>} : vector<8x8xf32>, vector<8x32xf32>, vector<8x32xf32> -> vector<8x32xf32>
    %215 = arith.addf %195, %214 : vector<8x32xf32>
    %216 = tpu.concatenate %127, %215 in 0 : vector<8x32xf32>, vector<8x32xf32> -> vector<16x32xf32>
    %217 = vector.broadcast %33 : vector<1x32xf32> to vector<16x32xf32>
    %218 = arith.addf %216, %217 : vector<16x32xf32>
    %219 = arith.addf %0, %218 : vector<16x32xf32>
    %c2 = arith.constant 2 : index
    %c0_81 = arith.constant 0 : index
    %220 = vector.load %arg12[%c2, %c0_81] : memref<5x32xf32, #tpu.memory_space<vmem>>, vector<1x32xf32>
    %c2_82 = arith.constant 2 : index
    %c0_83 = arith.constant 0 : index
    %221 = vector.load %arg13[%c2_82, %c0_83] : memref<5x32xf32, #tpu.memory_space<vmem>>, vector<1x32xf32>
    %cst_84 = arith.constant dense<0.000000e+00> : vector<16xf32>
    %222 = vector.multi_reduction <add>, %219, %cst_84 [1] : vector<16x32xf32> to vector<16xf32>
    %223 = vector.shape_cast %222 : vector<16xf32> to vector<16x1xf32>
    %cst_85 = arith.constant 3.200000e+01 : f32
    %224 = vector.broadcast %cst_85 : f32 to vector<16x1xf32>
    %225 = arith.divf %223, %224 : vector<16x1xf32>
    %226 = vector.broadcast %225 : vector<16x1xf32> to vector<16x32xf32>
    %227 = arith.subf %219, %226 : vector<16x32xf32>
    %228 = arith.mulf %227, %227 : vector<16x32xf32>
    %cst_86 = arith.constant dense<0.000000e+00> : vector<16xf32>
    %229 = vector.multi_reduction <add>, %228, %cst_86 [1] : vector<16x32xf32> to vector<16xf32>
    %230 = vector.shape_cast %229 : vector<16xf32> to vector<16x1xf32>
    %cst_87 = arith.constant 3.200000e+01 : f32
    %231 = vector.broadcast %cst_87 : f32 to vector<16x1xf32>
    %232 = arith.divf %230, %231 : vector<16x1xf32>
    %233 = vector.broadcast %225 : vector<16x1xf32> to vector<16x32xf32>
    %234 = arith.subf %219, %233 : vector<16x32xf32>
    %235 = vector.broadcast %220 : vector<1x32xf32> to vector<16x32xf32>
    %236 = arith.mulf %235, %234 : vector<16x32xf32>
    %cst_88 = arith.constant 9.99999974E-6 : f32
    %237 = vector.broadcast %cst_88 : f32 to vector<16x1xf32>
    %238 = arith.addf %232, %237 : vector<16x1xf32>
    %239 = math.rsqrt %238 : vector<16x1xf32>
    %240 = vector.broadcast %239 : vector<16x1xf32> to vector<16x32xf32>
    %241 = arith.mulf %236, %240 : vector<16x32xf32>
    %242 = vector.broadcast %221 : vector<1x32xf32> to vector<16x32xf32>
    %243 = arith.addf %241, %242 : vector<16x32xf32>
    %c1_89 = arith.constant 1 : index
    %c0_90 = arith.constant 0 : index
    %c0_91 = arith.constant 0 : index
    %244 = vector.load %arg4[%c1_89, %c0_90, %c0_91] : memref<3x32x96xf32, #tpu.memory_space<vmem>>, vector<1x32x96xf32>
    %245 = vector.shape_cast %244 : vector<1x32x96xf32> to vector<32x96xf32>
    %c1_92 = arith.constant 1 : index
    %c0_93 = arith.constant 0 : index
    %c0_94 = arith.constant 0 : index
    %246 = vector.load %arg5[%c1_92, %c0_93, %c0_94] : memref<3x1x96xf32, #tpu.memory_space<vmem>>, vector<1x1x96xf32>
    %247 = vector.shape_cast %246 : vector<1x1x96xf32> to vector<1x96xf32>
    %c1_95 = arith.constant 1 : index
    %c0_96 = arith.constant 0 : index
    %c0_97 = arith.constant 0 : index
    %248 = vector.load %arg6[%c1_95, %c0_96, %c0_97] : memref<3x32x32xf32, #tpu.memory_space<vmem>>, vector<1x32x32xf32>
    %249 = vector.shape_cast %248 : vector<1x32x32xf32> to vector<32x32xf32>
    %c1_98 = arith.constant 1 : index
    %c0_99 = arith.constant 0 : index
    %c0_100 = arith.constant 0 : index
    %250 = vector.load %arg7[%c1_98, %c0_99, %c0_100] : memref<3x1x32xf32, #tpu.memory_space<vmem>>, vector<1x1x32xf32>
    %251 = vector.shape_cast %250 : vector<1x1x32xf32> to vector<1x32xf32>
    %252 = vector.extract_strided_slice %245 {offsets = [0, 0], sizes = [32, 32], strides = [1, 1]} : vector<32x96xf32> to vector<32x32xf32>
    %cst_101 = arith.constant dense<0.000000e+00> : vector<16x32xf32>
    %253 = tpu.matmul %243, %252, %cst_101 {dimension_numbers = #tpu.dot_dimension_numbers<[1], [0], [0], [1], [0, 0, 1, 1], [], []>} : vector<16x32xf32>, vector<32x32xf32>, vector<16x32xf32> -> vector<16x32xf32>
    %254 = vector.extract_strided_slice %247 {offsets = [0, 0], sizes = [1, 32], strides = [1, 1]} : vector<1x96xf32> to vector<1x32xf32>
    %255 = vector.broadcast %254 : vector<1x32xf32> to vector<16x32xf32>
    %256 = arith.addf %253, %255 : vector<16x32xf32>
    %257 = vector.extract_strided_slice %245 {offsets = [0, 32], sizes = [32, 64], strides = [1, 1]} : vector<32x96xf32> to vector<32x64xf32>
    %cst_102 = arith.constant dense<0.000000e+00> : vector<16x64xf32>
    %258 = tpu.matmul %1, %257, %cst_102 {dimension_numbers = #tpu.dot_dimension_numbers<[1], [0], [0], [1], [0, 0, 1, 1], [], []>} : vector<16x32xf32>, vector<32x64xf32>, vector<16x64xf32> -> vector<16x64xf32>
    %259 = vector.extract_strided_slice %247 {offsets = [0, 32], sizes = [1, 64], strides = [1, 1]} : vector<1x96xf32> to vector<1x64xf32>
    %260 = vector.broadcast %259 : vector<1x64xf32> to vector<16x64xf32>
    %261 = arith.addf %258, %260 : vector<16x64xf32>
    %262 = vector.extract_strided_slice %261 {offsets = [0, 0], sizes = [16, 32], strides = [1, 1]} : vector<16x64xf32> to vector<16x32xf32>
    %263 = vector.extract_strided_slice %261 {offsets = [0, 32], sizes = [16, 32], strides = [1, 1]} : vector<16x64xf32> to vector<16x32xf32>
    %c0_103 = arith.constant 0 : index
    %c0_104 = arith.constant 0 : index
    %c0_105 = arith.constant 0 : index
    %264 = vector.load %arg3[%c0_103, %c0_104, %c0_105] : memref<2x8x8xf32, #tpu.memory_space<vmem>>, vector<1x8x8xf32>
    %265 = vector.shape_cast %264 : vector<1x8x8xf32> to vector<8x8xf32>
    %cst_106 = arith.constant 0.000000e+00 : f32
    %266 = vector.broadcast %cst_106 : f32 to vector<8x8xf32>
    %267 = arith.cmpf one, %265, %266 : vector<8x8xf32>
    %268 = vector.extract_strided_slice %256 {offsets = [0, 0], sizes = [8, 32], strides = [1, 1]} : vector<16x32xf32> to vector<8x32xf32>
    %269 = vector.extract_strided_slice %262 {offsets = [0, 0], sizes = [8, 32], strides = [1, 1]} : vector<16x32xf32> to vector<8x32xf32>
    %270 = vector.extract_strided_slice %263 {offsets = [0, 0], sizes = [8, 32], strides = [1, 1]} : vector<16x32xf32> to vector<8x32xf32>
    %cst_107 = arith.constant 0.000000e+00 : f32
    %271 = vector.broadcast %cst_107 : f32 to vector<8x32xf32>
    %272 = vector.extract_strided_slice %268 {offsets = [0, 0], sizes = [8, 8], strides = [1, 1]} : vector<8x32xf32> to vector<8x8xf32>
    %273 = vector.extract_strided_slice %269 {offsets = [0, 0], sizes = [8, 8], strides = [1, 1]} : vector<8x32xf32> to vector<8x8xf32>
    %274 = vector.extract_strided_slice %270 {offsets = [0, 0], sizes = [8, 8], strides = [1, 1]} : vector<8x32xf32> to vector<8x8xf32>
    %cst_108 = arith.constant dense<0.000000e+00> : vector<8x8xf32>
    %275 = tpu.matmul %272, %273, %cst_108 {dimension_numbers = #tpu.dot_dimension_numbers<[1], [1], [0], [0], [0, 0, 1, 0], [], []>} : vector<8x8xf32>, vector<8x8xf32>, vector<8x8xf32> -> vector<8x8xf32>
    %cst_109 = arith.constant -1.000000e+09 : f32
    %276 = vector.broadcast %cst_109 : f32 to vector<8x8xf32>
    %277 = arith.select %267, %275, %276 : vector<8x8xi1>, vector<8x8xf32>
    %cst_110 = arith.constant dense<0xFF800000> : vector<8xf32>
    %278 = vector.multi_reduction <maximumf>, %277, %cst_110 [1] : vector<8x8xf32> to vector<8xf32>
    %279 = vector.shape_cast %278 : vector<8xf32> to vector<8x1xf32>
    %280 = vector.broadcast %279 : vector<8x1xf32> to vector<8x8xf32>
    %281 = arith.subf %277, %280 : vector<8x8xf32>
    %282 = math.exp %281 : vector<8x8xf32>
    %cst_111 = arith.constant dense<0.000000e+00> : vector<8xf32>
    %283 = vector.multi_reduction <add>, %282, %cst_111 [1] : vector<8x8xf32> to vector<8xf32>
    %284 = vector.shape_cast %283 : vector<8xf32> to vector<8x1xf32>
    %285 = tpu.reciprocal %284 {approx = true} : vector<8x1xf32> -> vector<8x1xf32>
    %286 = vector.broadcast %285 : vector<8x1xf32> to vector<8x8xf32>
    %287 = arith.mulf %282, %286 : vector<8x8xf32>
    %cst_112 = arith.constant dense<0.000000e+00> : vector<8x8xf32>
    %288 = tpu.matmul %287, %274, %cst_112 {dimension_numbers = #tpu.dot_dimension_numbers<[1], [0], [0], [1], [0, 0, 1, 1], [], []>} : vector<8x8xf32>, vector<8x8xf32>, vector<8x8xf32> -> vector<8x8xf32>
    %289 = vector.extract_strided_slice %249 {offsets = [0, 0], sizes = [8, 32], strides = [1, 1]} : vector<32x32xf32> to vector<8x32xf32>
    %cst_113 = arith.constant dense<0.000000e+00> : vector<8x32xf32>
    %290 = tpu.matmul %288, %289, %cst_113 {dimension_numbers = #tpu.dot_dimension_numbers<[1], [0], [0], [1], [0, 0, 1, 1], [], []>} : vector<8x8xf32>, vector<8x32xf32>, vector<8x32xf32> -> vector<8x32xf32>
    %291 = arith.addf %271, %290 : vector<8x32xf32>
    %292 = vector.extract_strided_slice %268 {offsets = [0, 8], sizes = [8, 8], strides = [1, 1]} : vector<8x32xf32> to vector<8x8xf32>
    %293 = vector.extract_strided_slice %269 {offsets = [0, 8], sizes = [8, 8], strides = [1, 1]} : vector<8x32xf32> to vector<8x8xf32>
    %294 = vector.extract_strided_slice %270 {offsets = [0, 8], sizes = [8, 8], strides = [1, 1]} : vector<8x32xf32> to vector<8x8xf32>
    %cst_114 = arith.constant dense<0.000000e+00> : vector<8x8xf32>
    %295 = tpu.matmul %292, %293, %cst_114 {dimension_numbers = #tpu.dot_dimension_numbers<[1], [1], [0], [0], [0, 0, 1, 0], [], []>} : vector<8x8xf32>, vector<8x8xf32>, vector<8x8xf32> -> vector<8x8xf32>
    %cst_115 = arith.constant -1.000000e+09 : f32
    %296 = vector.broadcast %cst_115 : f32 to vector<8x8xf32>
    %297 = arith.select %267, %295, %296 : vector<8x8xi1>, vector<8x8xf32>
    %cst_116 = arith.constant dense<0xFF800000> : vector<8xf32>
    %298 = vector.multi_reduction <maximumf>, %297, %cst_116 [1] : vector<8x8xf32> to vector<8xf32>
    %299 = vector.shape_cast %298 : vector<8xf32> to vector<8x1xf32>
    %300 = vector.broadcast %299 : vector<8x1xf32> to vector<8x8xf32>
    %301 = arith.subf %297, %300 : vector<8x8xf32>
    %302 = math.exp %301 : vector<8x8xf32>
    %cst_117 = arith.constant dense<0.000000e+00> : vector<8xf32>
    %303 = vector.multi_reduction <add>, %302, %cst_117 [1] : vector<8x8xf32> to vector<8xf32>
    %304 = vector.shape_cast %303 : vector<8xf32> to vector<8x1xf32>
    %305 = tpu.reciprocal %304 {approx = true} : vector<8x1xf32> -> vector<8x1xf32>
    %306 = vector.broadcast %305 : vector<8x1xf32> to vector<8x8xf32>
    %307 = arith.mulf %302, %306 : vector<8x8xf32>
    %cst_118 = arith.constant dense<0.000000e+00> : vector<8x8xf32>
    %308 = tpu.matmul %307, %294, %cst_118 {dimension_numbers = #tpu.dot_dimension_numbers<[1], [0], [0], [1], [0, 0, 1, 1], [], []>} : vector<8x8xf32>, vector<8x8xf32>, vector<8x8xf32> -> vector<8x8xf32>
    %309 = vector.extract_strided_slice %249 {offsets = [8, 0], sizes = [8, 32], strides = [1, 1]} : vector<32x32xf32> to vector<8x32xf32>
    %cst_119 = arith.constant dense<0.000000e+00> : vector<8x32xf32>
    %310 = tpu.matmul %308, %309, %cst_119 {dimension_numbers = #tpu.dot_dimension_numbers<[1], [0], [0], [1], [0, 0, 1, 1], [], []>} : vector<8x8xf32>, vector<8x32xf32>, vector<8x32xf32> -> vector<8x32xf32>
    %311 = arith.addf %291, %310 : vector<8x32xf32>
    %312 = vector.extract_strided_slice %268 {offsets = [0, 16], sizes = [8, 8], strides = [1, 1]} : vector<8x32xf32> to vector<8x8xf32>
    %313 = vector.extract_strided_slice %269 {offsets = [0, 16], sizes = [8, 8], strides = [1, 1]} : vector<8x32xf32> to vector<8x8xf32>
    %314 = vector.extract_strided_slice %270 {offsets = [0, 16], sizes = [8, 8], strides = [1, 1]} : vector<8x32xf32> to vector<8x8xf32>
    %cst_120 = arith.constant dense<0.000000e+00> : vector<8x8xf32>
    %315 = tpu.matmul %312, %313, %cst_120 {dimension_numbers = #tpu.dot_dimension_numbers<[1], [1], [0], [0], [0, 0, 1, 0], [], []>} : vector<8x8xf32>, vector<8x8xf32>, vector<8x8xf32> -> vector<8x8xf32>
    %cst_121 = arith.constant -1.000000e+09 : f32
    %316 = vector.broadcast %cst_121 : f32 to vector<8x8xf32>
    %317 = arith.select %267, %315, %316 : vector<8x8xi1>, vector<8x8xf32>
    %cst_122 = arith.constant dense<0xFF800000> : vector<8xf32>
    %318 = vector.multi_reduction <maximumf>, %317, %cst_122 [1] : vector<8x8xf32> to vector<8xf32>
    %319 = vector.shape_cast %318 : vector<8xf32> to vector<8x1xf32>
    %320 = vector.broadcast %319 : vector<8x1xf32> to vector<8x8xf32>
    %321 = arith.subf %317, %320 : vector<8x8xf32>
    %322 = math.exp %321 : vector<8x8xf32>
    %cst_123 = arith.constant dense<0.000000e+00> : vector<8xf32>
    %323 = vector.multi_reduction <add>, %322, %cst_123 [1] : vector<8x8xf32> to vector<8xf32>
    %324 = vector.shape_cast %323 : vector<8xf32> to vector<8x1xf32>
    %325 = tpu.reciprocal %324 {approx = true} : vector<8x1xf32> -> vector<8x1xf32>
    %326 = vector.broadcast %325 : vector<8x1xf32> to vector<8x8xf32>
    %327 = arith.mulf %322, %326 : vector<8x8xf32>
    %cst_124 = arith.constant dense<0.000000e+00> : vector<8x8xf32>
    %328 = tpu.matmul %327, %314, %cst_124 {dimension_numbers = #tpu.dot_dimension_numbers<[1], [0], [0], [1], [0, 0, 1, 1], [], []>} : vector<8x8xf32>, vector<8x8xf32>, vector<8x8xf32> -> vector<8x8xf32>
    %329 = vector.extract_strided_slice %249 {offsets = [16, 0], sizes = [8, 32], strides = [1, 1]} : vector<32x32xf32> to vector<8x32xf32>
    %cst_125 = arith.constant dense<0.000000e+00> : vector<8x32xf32>
    %330 = tpu.matmul %328, %329, %cst_125 {dimension_numbers = #tpu.dot_dimension_numbers<[1], [0], [0], [1], [0, 0, 1, 1], [], []>} : vector<8x8xf32>, vector<8x32xf32>, vector<8x32xf32> -> vector<8x32xf32>
    %331 = arith.addf %311, %330 : vector<8x32xf32>
    %332 = vector.extract_strided_slice %268 {offsets = [0, 24], sizes = [8, 8], strides = [1, 1]} : vector<8x32xf32> to vector<8x8xf32>
    %333 = vector.extract_strided_slice %269 {offsets = [0, 24], sizes = [8, 8], strides = [1, 1]} : vector<8x32xf32> to vector<8x8xf32>
    %334 = vector.extract_strided_slice %270 {offsets = [0, 24], sizes = [8, 8], strides = [1, 1]} : vector<8x32xf32> to vector<8x8xf32>
    %cst_126 = arith.constant dense<0.000000e+00> : vector<8x8xf32>
    %335 = tpu.matmul %332, %333, %cst_126 {dimension_numbers = #tpu.dot_dimension_numbers<[1], [1], [0], [0], [0, 0, 1, 0], [], []>} : vector<8x8xf32>, vector<8x8xf32>, vector<8x8xf32> -> vector<8x8xf32>
    %cst_127 = arith.constant -1.000000e+09 : f32
    %336 = vector.broadcast %cst_127 : f32 to vector<8x8xf32>
    %337 = arith.select %267, %335, %336 : vector<8x8xi1>, vector<8x8xf32>
    %cst_128 = arith.constant dense<0xFF800000> : vector<8xf32>
    %338 = vector.multi_reduction <maximumf>, %337, %cst_128 [1] : vector<8x8xf32> to vector<8xf32>
    %339 = vector.shape_cast %338 : vector<8xf32> to vector<8x1xf32>
    %340 = vector.broadcast %339 : vector<8x1xf32> to vector<8x8xf32>
    %341 = arith.subf %337, %340 : vector<8x8xf32>
    %342 = math.exp %341 : vector<8x8xf32>
    %cst_129 = arith.constant dense<0.000000e+00> : vector<8xf32>
    %343 = vector.multi_reduction <add>, %342, %cst_129 [1] : vector<8x8xf32> to vector<8xf32>
    %344 = vector.shape_cast %343 : vector<8xf32> to vector<8x1xf32>
    %345 = tpu.reciprocal %344 {approx = true} : vector<8x1xf32> -> vector<8x1xf32>
    %346 = vector.broadcast %345 : vector<8x1xf32> to vector<8x8xf32>
    %347 = arith.mulf %342, %346 : vector<8x8xf32>
    %cst_130 = arith.constant dense<0.000000e+00> : vector<8x8xf32>
    %348 = tpu.matmul %347, %334, %cst_130 {dimension_numbers = #tpu.dot_dimension_numbers<[1], [0], [0], [1], [0, 0, 1, 1], [], []>} : vector<8x8xf32>, vector<8x8xf32>, vector<8x8xf32> -> vector<8x8xf32>
    %349 = vector.extract_strided_slice %249 {offsets = [24, 0], sizes = [8, 32], strides = [1, 1]} : vector<32x32xf32> to vector<8x32xf32>
    %cst_131 = arith.constant dense<0.000000e+00> : vector<8x32xf32>
    %350 = tpu.matmul %348, %349, %cst_131 {dimension_numbers = #tpu.dot_dimension_numbers<[1], [0], [0], [1], [0, 0, 1, 1], [], []>} : vector<8x8xf32>, vector<8x32xf32>, vector<8x32xf32> -> vector<8x32xf32>
    %351 = arith.addf %331, %350 : vector<8x32xf32>
    %c1_132 = arith.constant 1 : index
    %c0_133 = arith.constant 0 : index
    %c0_134 = arith.constant 0 : index
    %352 = vector.load %arg3[%c1_132, %c0_133, %c0_134] : memref<2x8x8xf32, #tpu.memory_space<vmem>>, vector<1x8x8xf32>
    %353 = vector.shape_cast %352 : vector<1x8x8xf32> to vector<8x8xf32>
    %cst_135 = arith.constant 0.000000e+00 : f32
    %354 = vector.broadcast %cst_135 : f32 to vector<8x8xf32>
    %355 = arith.cmpf one, %353, %354 : vector<8x8xf32>
    %356 = vector.extract_strided_slice %256 {offsets = [8, 0], sizes = [8, 32], strides = [1, 1]} : vector<16x32xf32> to vector<8x32xf32>
    %357 = vector.extract_strided_slice %262 {offsets = [8, 0], sizes = [8, 32], strides = [1, 1]} : vector<16x32xf32> to vector<8x32xf32>
    %358 = vector.extract_strided_slice %263 {offsets = [8, 0], sizes = [8, 32], strides = [1, 1]} : vector<16x32xf32> to vector<8x32xf32>
    %cst_136 = arith.constant 0.000000e+00 : f32
    %359 = vector.broadcast %cst_136 : f32 to vector<8x32xf32>
    %360 = vector.extract_strided_slice %356 {offsets = [0, 0], sizes = [8, 8], strides = [1, 1]} : vector<8x32xf32> to vector<8x8xf32>
    %361 = vector.extract_strided_slice %357 {offsets = [0, 0], sizes = [8, 8], strides = [1, 1]} : vector<8x32xf32> to vector<8x8xf32>
    %362 = vector.extract_strided_slice %358 {offsets = [0, 0], sizes = [8, 8], strides = [1, 1]} : vector<8x32xf32> to vector<8x8xf32>
    %cst_137 = arith.constant dense<0.000000e+00> : vector<8x8xf32>
    %363 = tpu.matmul %360, %361, %cst_137 {dimension_numbers = #tpu.dot_dimension_numbers<[1], [1], [0], [0], [0, 0, 1, 0], [], []>} : vector<8x8xf32>, vector<8x8xf32>, vector<8x8xf32> -> vector<8x8xf32>
    %cst_138 = arith.constant -1.000000e+09 : f32
    %364 = vector.broadcast %cst_138 : f32 to vector<8x8xf32>
    %365 = arith.select %355, %363, %364 : vector<8x8xi1>, vector<8x8xf32>
    %cst_139 = arith.constant dense<0xFF800000> : vector<8xf32>
    %366 = vector.multi_reduction <maximumf>, %365, %cst_139 [1] : vector<8x8xf32> to vector<8xf32>
    %367 = vector.shape_cast %366 : vector<8xf32> to vector<8x1xf32>
    %368 = vector.broadcast %367 : vector<8x1xf32> to vector<8x8xf32>
    %369 = arith.subf %365, %368 : vector<8x8xf32>
    %370 = math.exp %369 : vector<8x8xf32>
    %cst_140 = arith.constant dense<0.000000e+00> : vector<8xf32>
    %371 = vector.multi_reduction <add>, %370, %cst_140 [1] : vector<8x8xf32> to vector<8xf32>
    %372 = vector.shape_cast %371 : vector<8xf32> to vector<8x1xf32>
    %373 = tpu.reciprocal %372 {approx = true} : vector<8x1xf32> -> vector<8x1xf32>
    %374 = vector.broadcast %373 : vector<8x1xf32> to vector<8x8xf32>
    %375 = arith.mulf %370, %374 : vector<8x8xf32>
    %cst_141 = arith.constant dense<0.000000e+00> : vector<8x8xf32>
    %376 = tpu.matmul %375, %362, %cst_141 {dimension_numbers = #tpu.dot_dimension_numbers<[1], [0], [0], [1], [0, 0, 1, 1], [], []>} : vector<8x8xf32>, vector<8x8xf32>, vector<8x8xf32> -> vector<8x8xf32>
    %377 = vector.extract_strided_slice %249 {offsets = [0, 0], sizes = [8, 32], strides = [1, 1]} : vector<32x32xf32> to vector<8x32xf32>
    %cst_142 = arith.constant dense<0.000000e+00> : vector<8x32xf32>
    %378 = tpu.matmul %376, %377, %cst_142 {dimension_numbers = #tpu.dot_dimension_numbers<[1], [0], [0], [1], [0, 0, 1, 1], [], []>} : vector<8x8xf32>, vector<8x32xf32>, vector<8x32xf32> -> vector<8x32xf32>
    %379 = arith.addf %359, %378 : vector<8x32xf32>
    %380 = vector.extract_strided_slice %356 {offsets = [0, 8], sizes = [8, 8], strides = [1, 1]} : vector<8x32xf32> to vector<8x8xf32>
    %381 = vector.extract_strided_slice %357 {offsets = [0, 8], sizes = [8, 8], strides = [1, 1]} : vector<8x32xf32> to vector<8x8xf32>
    %382 = vector.extract_strided_slice %358 {offsets = [0, 8], sizes = [8, 8], strides = [1, 1]} : vector<8x32xf32> to vector<8x8xf32>
    %cst_143 = arith.constant dense<0.000000e+00> : vector<8x8xf32>
    %383 = tpu.matmul %380, %381, %cst_143 {dimension_numbers = #tpu.dot_dimension_numbers<[1], [1], [0], [0], [0, 0, 1, 0], [], []>} : vector<8x8xf32>, vector<8x8xf32>, vector<8x8xf32> -> vector<8x8xf32>
    %cst_144 = arith.constant -1.000000e+09 : f32
    %384 = vector.broadcast %cst_144 : f32 to vector<8x8xf32>
    %385 = arith.select %355, %383, %384 : vector<8x8xi1>, vector<8x8xf32>
    %cst_145 = arith.constant dense<0xFF800000> : vector<8xf32>
    %386 = vector.multi_reduction <maximumf>, %385, %cst_145 [1] : vector<8x8xf32> to vector<8xf32>
    %387 = vector.shape_cast %386 : vector<8xf32> to vector<8x1xf32>
    %388 = vector.broadcast %387 : vector<8x1xf32> to vector<8x8xf32>
    %389 = arith.subf %385, %388 : vector<8x8xf32>
    %390 = math.exp %389 : vector<8x8xf32>
    %cst_146 = arith.constant dense<0.000000e+00> : vector<8xf32>
    %391 = vector.multi_reduction <add>, %390, %cst_146 [1] : vector<8x8xf32> to vector<8xf32>
    %392 = vector.shape_cast %391 : vector<8xf32> to vector<8x1xf32>
    %393 = tpu.reciprocal %392 {approx = true} : vector<8x1xf32> -> vector<8x1xf32>
    %394 = vector.broadcast %393 : vector<8x1xf32> to vector<8x8xf32>
    %395 = arith.mulf %390, %394 : vector<8x8xf32>
    %cst_147 = arith.constant dense<0.000000e+00> : vector<8x8xf32>
    %396 = tpu.matmul %395, %382, %cst_147 {dimension_numbers = #tpu.dot_dimension_numbers<[1], [0], [0], [1], [0, 0, 1, 1], [], []>} : vector<8x8xf32>, vector<8x8xf32>, vector<8x8xf32> -> vector<8x8xf32>
    %397 = vector.extract_strided_slice %249 {offsets = [8, 0], sizes = [8, 32], strides = [1, 1]} : vector<32x32xf32> to vector<8x32xf32>
    %cst_148 = arith.constant dense<0.000000e+00> : vector<8x32xf32>
    %398 = tpu.matmul %396, %397, %cst_148 {dimension_numbers = #tpu.dot_dimension_numbers<[1], [0], [0], [1], [0, 0, 1, 1], [], []>} : vector<8x8xf32>, vector<8x32xf32>, vector<8x32xf32> -> vector<8x32xf32>
    %399 = arith.addf %379, %398 : vector<8x32xf32>
    %400 = vector.extract_strided_slice %356 {offsets = [0, 16], sizes = [8, 8], strides = [1, 1]} : vector<8x32xf32> to vector<8x8xf32>
    %401 = vector.extract_strided_slice %357 {offsets = [0, 16], sizes = [8, 8], strides = [1, 1]} : vector<8x32xf32> to vector<8x8xf32>
    %402 = vector.extract_strided_slice %358 {offsets = [0, 16], sizes = [8, 8], strides = [1, 1]} : vector<8x32xf32> to vector<8x8xf32>
    %cst_149 = arith.constant dense<0.000000e+00> : vector<8x8xf32>
    %403 = tpu.matmul %400, %401, %cst_149 {dimension_numbers = #tpu.dot_dimension_numbers<[1], [1], [0], [0], [0, 0, 1, 0], [], []>} : vector<8x8xf32>, vector<8x8xf32>, vector<8x8xf32> -> vector<8x8xf32>
    %cst_150 = arith.constant -1.000000e+09 : f32
    %404 = vector.broadcast %cst_150 : f32 to vector<8x8xf32>
    %405 = arith.select %355, %403, %404 : vector<8x8xi1>, vector<8x8xf32>
    %cst_151 = arith.constant dense<0xFF800000> : vector<8xf32>
    %406 = vector.multi_reduction <maximumf>, %405, %cst_151 [1] : vector<8x8xf32> to vector<8xf32>
    %407 = vector.shape_cast %406 : vector<8xf32> to vector<8x1xf32>
    %408 = vector.broadcast %407 : vector<8x1xf32> to vector<8x8xf32>
    %409 = arith.subf %405, %408 : vector<8x8xf32>
    %410 = math.exp %409 : vector<8x8xf32>
    %cst_152 = arith.constant dense<0.000000e+00> : vector<8xf32>
    %411 = vector.multi_reduction <add>, %410, %cst_152 [1] : vector<8x8xf32> to vector<8xf32>
    %412 = vector.shape_cast %411 : vector<8xf32> to vector<8x1xf32>
    %413 = tpu.reciprocal %412 {approx = true} : vector<8x1xf32> -> vector<8x1xf32>
    %414 = vector.broadcast %413 : vector<8x1xf32> to vector<8x8xf32>
    %415 = arith.mulf %410, %414 : vector<8x8xf32>
    %cst_153 = arith.constant dense<0.000000e+00> : vector<8x8xf32>
    %416 = tpu.matmul %415, %402, %cst_153 {dimension_numbers = #tpu.dot_dimension_numbers<[1], [0], [0], [1], [0, 0, 1, 1], [], []>} : vector<8x8xf32>, vector<8x8xf32>, vector<8x8xf32> -> vector<8x8xf32>
    %417 = vector.extract_strided_slice %249 {offsets = [16, 0], sizes = [8, 32], strides = [1, 1]} : vector<32x32xf32> to vector<8x32xf32>
    %cst_154 = arith.constant dense<0.000000e+00> : vector<8x32xf32>
    %418 = tpu.matmul %416, %417, %cst_154 {dimension_numbers = #tpu.dot_dimension_numbers<[1], [0], [0], [1], [0, 0, 1, 1], [], []>} : vector<8x8xf32>, vector<8x32xf32>, vector<8x32xf32> -> vector<8x32xf32>
    %419 = arith.addf %399, %418 : vector<8x32xf32>
    %420 = vector.extract_strided_slice %356 {offsets = [0, 24], sizes = [8, 8], strides = [1, 1]} : vector<8x32xf32> to vector<8x8xf32>
    %421 = vector.extract_strided_slice %357 {offsets = [0, 24], sizes = [8, 8], strides = [1, 1]} : vector<8x32xf32> to vector<8x8xf32>
    %422 = vector.extract_strided_slice %358 {offsets = [0, 24], sizes = [8, 8], strides = [1, 1]} : vector<8x32xf32> to vector<8x8xf32>
    %cst_155 = arith.constant dense<0.000000e+00> : vector<8x8xf32>
    %423 = tpu.matmul %420, %421, %cst_155 {dimension_numbers = #tpu.dot_dimension_numbers<[1], [1], [0], [0], [0, 0, 1, 0], [], []>} : vector<8x8xf32>, vector<8x8xf32>, vector<8x8xf32> -> vector<8x8xf32>
    %cst_156 = arith.constant -1.000000e+09 : f32
    %424 = vector.broadcast %cst_156 : f32 to vector<8x8xf32>
    %425 = arith.select %355, %423, %424 : vector<8x8xi1>, vector<8x8xf32>
    %cst_157 = arith.constant dense<0xFF800000> : vector<8xf32>
    %426 = vector.multi_reduction <maximumf>, %425, %cst_157 [1] : vector<8x8xf32> to vector<8xf32>
    %427 = vector.shape_cast %426 : vector<8xf32> to vector<8x1xf32>
    %428 = vector.broadcast %427 : vector<8x1xf32> to vector<8x8xf32>
    %429 = arith.subf %425, %428 : vector<8x8xf32>
    %430 = math.exp %429 : vector<8x8xf32>
    %cst_158 = arith.constant dense<0.000000e+00> : vector<8xf32>
    %431 = vector.multi_reduction <add>, %430, %cst_158 [1] : vector<8x8xf32> to vector<8xf32>
    %432 = vector.shape_cast %431 : vector<8xf32> to vector<8x1xf32>
    %433 = tpu.reciprocal %432 {approx = true} : vector<8x1xf32> -> vector<8x1xf32>
    %434 = vector.broadcast %433 : vector<8x1xf32> to vector<8x8xf32>
    %435 = arith.mulf %430, %434 : vector<8x8xf32>
    %cst_159 = arith.constant dense<0.000000e+00> : vector<8x8xf32>
    %436 = tpu.matmul %435, %422, %cst_159 {dimension_numbers = #tpu.dot_dimension_numbers<[1], [0], [0], [1], [0, 0, 1, 1], [], []>} : vector<8x8xf32>, vector<8x8xf32>, vector<8x8xf32> -> vector<8x8xf32>
    %437 = vector.extract_strided_slice %249 {offsets = [24, 0], sizes = [8, 32], strides = [1, 1]} : vector<32x32xf32> to vector<8x32xf32>
    %cst_160 = arith.constant dense<0.000000e+00> : vector<8x32xf32>
    %438 = tpu.matmul %436, %437, %cst_160 {dimension_numbers = #tpu.dot_dimension_numbers<[1], [0], [0], [1], [0, 0, 1, 1], [], []>} : vector<8x8xf32>, vector<8x32xf32>, vector<8x32xf32> -> vector<8x32xf32>
    %439 = arith.addf %419, %438 : vector<8x32xf32>
    %440 = tpu.concatenate %351, %439 in 0 : vector<8x32xf32>, vector<8x32xf32> -> vector<16x32xf32>
    %441 = vector.broadcast %251 : vector<1x32xf32> to vector<16x32xf32>
    %442 = arith.addf %440, %441 : vector<16x32xf32>
    %443 = arith.addf %219, %442 : vector<16x32xf32>
    %c3 = arith.constant 3 : index
    %c0_161 = arith.constant 0 : index
    %444 = vector.load %arg12[%c3, %c0_161] : memref<5x32xf32, #tpu.memory_space<vmem>>, vector<1x32xf32>
    %c3_162 = arith.constant 3 : index
    %c0_163 = arith.constant 0 : index
    %445 = vector.load %arg13[%c3_162, %c0_163] : memref<5x32xf32, #tpu.memory_space<vmem>>, vector<1x32xf32>
    %cst_164 = arith.constant dense<0.000000e+00> : vector<16xf32>
    %446 = vector.multi_reduction <add>, %1, %cst_164 [1] : vector<16x32xf32> to vector<16xf32>
    %447 = vector.shape_cast %446 : vector<16xf32> to vector<16x1xf32>
    %cst_165 = arith.constant 3.200000e+01 : f32
    %448 = vector.broadcast %cst_165 : f32 to vector<16x1xf32>
    %449 = arith.divf %447, %448 : vector<16x1xf32>
    %450 = vector.broadcast %449 : vector<16x1xf32> to vector<16x32xf32>
    %451 = arith.subf %1, %450 : vector<16x32xf32>
    %452 = arith.mulf %451, %451 : vector<16x32xf32>
    %cst_166 = arith.constant dense<0.000000e+00> : vector<16xf32>
    %453 = vector.multi_reduction <add>, %452, %cst_166 [1] : vector<16x32xf32> to vector<16xf32>
    %454 = vector.shape_cast %453 : vector<16xf32> to vector<16x1xf32>
    %cst_167 = arith.constant 3.200000e+01 : f32
    %455 = vector.broadcast %cst_167 : f32 to vector<16x1xf32>
    %456 = arith.divf %454, %455 : vector<16x1xf32>
    %457 = vector.broadcast %449 : vector<16x1xf32> to vector<16x32xf32>
    %458 = arith.subf %1, %457 : vector<16x32xf32>
    %459 = vector.broadcast %444 : vector<1x32xf32> to vector<16x32xf32>
    %460 = arith.mulf %459, %458 : vector<16x32xf32>
    %cst_168 = arith.constant 9.99999974E-6 : f32
    %461 = vector.broadcast %cst_168 : f32 to vector<16x1xf32>
    %462 = arith.addf %456, %461 : vector<16x1xf32>
    %463 = math.rsqrt %462 : vector<16x1xf32>
    %464 = vector.broadcast %463 : vector<16x1xf32> to vector<16x32xf32>
    %465 = arith.mulf %460, %464 : vector<16x32xf32>
    %466 = vector.broadcast %445 : vector<1x32xf32> to vector<16x32xf32>
    %467 = arith.addf %465, %466 : vector<16x32xf32>
    %c2_169 = arith.constant 2 : index
    %c0_170 = arith.constant 0 : index
    %c0_171 = arith.constant 0 : index
    %468 = vector.load %arg4[%c2_169, %c0_170, %c0_171] : memref<3x32x96xf32, #tpu.memory_space<vmem>>, vector<1x32x96xf32>
    %469 = vector.shape_cast %468 : vector<1x32x96xf32> to vector<32x96xf32>
    %c2_172 = arith.constant 2 : index
    %c0_173 = arith.constant 0 : index
    %c0_174 = arith.constant 0 : index
    %470 = vector.load %arg5[%c2_172, %c0_173, %c0_174] : memref<3x1x96xf32, #tpu.memory_space<vmem>>, vector<1x1x96xf32>
    %471 = vector.shape_cast %470 : vector<1x1x96xf32> to vector<1x96xf32>
    %c2_175 = arith.constant 2 : index
    %c0_176 = arith.constant 0 : index
    %c0_177 = arith.constant 0 : index
    %472 = vector.load %arg6[%c2_175, %c0_176, %c0_177] : memref<3x32x32xf32, #tpu.memory_space<vmem>>, vector<1x32x32xf32>
    %473 = vector.shape_cast %472 : vector<1x32x32xf32> to vector<32x32xf32>
    %c2_178 = arith.constant 2 : index
    %c0_179 = arith.constant 0 : index
    %c0_180 = arith.constant 0 : index
    %474 = vector.load %arg7[%c2_178, %c0_179, %c0_180] : memref<3x1x32xf32, #tpu.memory_space<vmem>>, vector<1x1x32xf32>
    %475 = vector.shape_cast %474 : vector<1x1x32xf32> to vector<1x32xf32>
    %476 = vector.extract_strided_slice %469 {offsets = [0, 0], sizes = [32, 32], strides = [1, 1]} : vector<32x96xf32> to vector<32x32xf32>
    %cst_181 = arith.constant dense<0.000000e+00> : vector<16x32xf32>
    %477 = tpu.matmul %467, %476, %cst_181 {dimension_numbers = #tpu.dot_dimension_numbers<[1], [0], [0], [1], [0, 0, 1, 1], [], []>} : vector<16x32xf32>, vector<32x32xf32>, vector<16x32xf32> -> vector<16x32xf32>
    %478 = vector.extract_strided_slice %471 {offsets = [0, 0], sizes = [1, 32], strides = [1, 1]} : vector<1x96xf32> to vector<1x32xf32>
    %479 = vector.broadcast %478 : vector<1x32xf32> to vector<16x32xf32>
    %480 = arith.addf %477, %479 : vector<16x32xf32>
    %481 = vector.extract_strided_slice %469 {offsets = [0, 32], sizes = [32, 64], strides = [1, 1]} : vector<32x96xf32> to vector<32x64xf32>
    %cst_182 = arith.constant dense<0.000000e+00> : vector<16x64xf32>
    %482 = tpu.matmul %219, %481, %cst_182 {dimension_numbers = #tpu.dot_dimension_numbers<[1], [0], [0], [1], [0, 0, 1, 1], [], []>} : vector<16x32xf32>, vector<32x64xf32>, vector<16x64xf32> -> vector<16x64xf32>
    %483 = vector.extract_strided_slice %471 {offsets = [0, 32], sizes = [1, 64], strides = [1, 1]} : vector<1x96xf32> to vector<1x64xf32>
    %484 = vector.broadcast %483 : vector<1x64xf32> to vector<16x64xf32>
    %485 = arith.addf %482, %484 : vector<16x64xf32>
    %486 = vector.extract_strided_slice %485 {offsets = [0, 0], sizes = [16, 32], strides = [1, 1]} : vector<16x64xf32> to vector<16x32xf32>
    %487 = vector.extract_strided_slice %485 {offsets = [0, 32], sizes = [16, 32], strides = [1, 1]} : vector<16x64xf32> to vector<16x32xf32>
    %c0_183 = arith.constant 0 : index
    %c0_184 = arith.constant 0 : index
    %c0_185 = arith.constant 0 : index
    %488 = vector.load %arg2[%c0_183, %c0_184, %c0_185] : memref<2x8x8xf32, #tpu.memory_space<vmem>>, vector<1x8x8xf32>
    %489 = vector.shape_cast %488 : vector<1x8x8xf32> to vector<8x8xf32>
    %cst_186 = arith.constant 0.000000e+00 : f32
    %490 = vector.broadcast %cst_186 : f32 to vector<8x8xf32>
    %491 = arith.cmpf one, %489, %490 : vector<8x8xf32>
    %492 = vector.extract_strided_slice %480 {offsets = [0, 0], sizes = [8, 32], strides = [1, 1]} : vector<16x32xf32> to vector<8x32xf32>
    %493 = vector.extract_strided_slice %486 {offsets = [0, 0], sizes = [8, 32], strides = [1, 1]} : vector<16x32xf32> to vector<8x32xf32>
    %494 = vector.extract_strided_slice %487 {offsets = [0, 0], sizes = [8, 32], strides = [1, 1]} : vector<16x32xf32> to vector<8x32xf32>
    %cst_187 = arith.constant 0.000000e+00 : f32
    %495 = vector.broadcast %cst_187 : f32 to vector<8x32xf32>
    %496 = vector.extract_strided_slice %492 {offsets = [0, 0], sizes = [8, 8], strides = [1, 1]} : vector<8x32xf32> to vector<8x8xf32>
    %497 = vector.extract_strided_slice %493 {offsets = [0, 0], sizes = [8, 8], strides = [1, 1]} : vector<8x32xf32> to vector<8x8xf32>
    %498 = vector.extract_strided_slice %494 {offsets = [0, 0], sizes = [8, 8], strides = [1, 1]} : vector<8x32xf32> to vector<8x8xf32>
    %cst_188 = arith.constant dense<0.000000e+00> : vector<8x8xf32>
    %499 = tpu.matmul %496, %497, %cst_188 {dimension_numbers = #tpu.dot_dimension_numbers<[1], [1], [0], [0], [0, 0, 1, 0], [], []>} : vector<8x8xf32>, vector<8x8xf32>, vector<8x8xf32> -> vector<8x8xf32>
    %cst_189 = arith.constant -1.000000e+09 : f32
    %500 = vector.broadcast %cst_189 : f32 to vector<8x8xf32>
    %501 = arith.select %491, %499, %500 : vector<8x8xi1>, vector<8x8xf32>
    %cst_190 = arith.constant dense<0xFF800000> : vector<8xf32>
    %502 = vector.multi_reduction <maximumf>, %501, %cst_190 [1] : vector<8x8xf32> to vector<8xf32>
    %503 = vector.shape_cast %502 : vector<8xf32> to vector<8x1xf32>
    %504 = vector.broadcast %503 : vector<8x1xf32> to vector<8x8xf32>
    %505 = arith.subf %501, %504 : vector<8x8xf32>
    %506 = math.exp %505 : vector<8x8xf32>
    %cst_191 = arith.constant dense<0.000000e+00> : vector<8xf32>
    %507 = vector.multi_reduction <add>, %506, %cst_191 [1] : vector<8x8xf32> to vector<8xf32>
    %508 = vector.shape_cast %507 : vector<8xf32> to vector<8x1xf32>
    %509 = tpu.reciprocal %508 {approx = true} : vector<8x1xf32> -> vector<8x1xf32>
    %510 = vector.broadcast %509 : vector<8x1xf32> to vector<8x8xf32>
    %511 = arith.mulf %506, %510 : vector<8x8xf32>
    %cst_192 = arith.constant dense<0.000000e+00> : vector<8x8xf32>
    %512 = tpu.matmul %511, %498, %cst_192 {dimension_numbers = #tpu.dot_dimension_numbers<[1], [0], [0], [1], [0, 0, 1, 1], [], []>} : vector<8x8xf32>, vector<8x8xf32>, vector<8x8xf32> -> vector<8x8xf32>
    %513 = vector.extract_strided_slice %473 {offsets = [0, 0], sizes = [8, 32], strides = [1, 1]} : vector<32x32xf32> to vector<8x32xf32>
    %cst_193 = arith.constant dense<0.000000e+00> : vector<8x32xf32>
    %514 = tpu.matmul %512, %513, %cst_193 {dimension_numbers = #tpu.dot_dimension_numbers<[1], [0], [0], [1], [0, 0, 1, 1], [], []>} : vector<8x8xf32>, vector<8x32xf32>, vector<8x32xf32> -> vector<8x32xf32>
    %515 = arith.addf %495, %514 : vector<8x32xf32>
    %516 = vector.extract_strided_slice %492 {offsets = [0, 8], sizes = [8, 8], strides = [1, 1]} : vector<8x32xf32> to vector<8x8xf32>
    %517 = vector.extract_strided_slice %493 {offsets = [0, 8], sizes = [8, 8], strides = [1, 1]} : vector<8x32xf32> to vector<8x8xf32>
    %518 = vector.extract_strided_slice %494 {offsets = [0, 8], sizes = [8, 8], strides = [1, 1]} : vector<8x32xf32> to vector<8x8xf32>
    %cst_194 = arith.constant dense<0.000000e+00> : vector<8x8xf32>
    %519 = tpu.matmul %516, %517, %cst_194 {dimension_numbers = #tpu.dot_dimension_numbers<[1], [1], [0], [0], [0, 0, 1, 0], [], []>} : vector<8x8xf32>, vector<8x8xf32>, vector<8x8xf32> -> vector<8x8xf32>
    %cst_195 = arith.constant -1.000000e+09 : f32
    %520 = vector.broadcast %cst_195 : f32 to vector<8x8xf32>
    %521 = arith.select %491, %519, %520 : vector<8x8xi1>, vector<8x8xf32>
    %cst_196 = arith.constant dense<0xFF800000> : vector<8xf32>
    %522 = vector.multi_reduction <maximumf>, %521, %cst_196 [1] : vector<8x8xf32> to vector<8xf32>
    %523 = vector.shape_cast %522 : vector<8xf32> to vector<8x1xf32>
    %524 = vector.broadcast %523 : vector<8x1xf32> to vector<8x8xf32>
    %525 = arith.subf %521, %524 : vector<8x8xf32>
    %526 = math.exp %525 : vector<8x8xf32>
    %cst_197 = arith.constant dense<0.000000e+00> : vector<8xf32>
    %527 = vector.multi_reduction <add>, %526, %cst_197 [1] : vector<8x8xf32> to vector<8xf32>
    %528 = vector.shape_cast %527 : vector<8xf32> to vector<8x1xf32>
    %529 = tpu.reciprocal %528 {approx = true} : vector<8x1xf32> -> vector<8x1xf32>
    %530 = vector.broadcast %529 : vector<8x1xf32> to vector<8x8xf32>
    %531 = arith.mulf %526, %530 : vector<8x8xf32>
    %cst_198 = arith.constant dense<0.000000e+00> : vector<8x8xf32>
    %532 = tpu.matmul %531, %518, %cst_198 {dimension_numbers = #tpu.dot_dimension_numbers<[1], [0], [0], [1], [0, 0, 1, 1], [], []>} : vector<8x8xf32>, vector<8x8xf32>, vector<8x8xf32> -> vector<8x8xf32>
    %533 = vector.extract_strided_slice %473 {offsets = [8, 0], sizes = [8, 32], strides = [1, 1]} : vector<32x32xf32> to vector<8x32xf32>
    %cst_199 = arith.constant dense<0.000000e+00> : vector<8x32xf32>
    %534 = tpu.matmul %532, %533, %cst_199 {dimension_numbers = #tpu.dot_dimension_numbers<[1], [0], [0], [1], [0, 0, 1, 1], [], []>} : vector<8x8xf32>, vector<8x32xf32>, vector<8x32xf32> -> vector<8x32xf32>
    %535 = arith.addf %515, %534 : vector<8x32xf32>
    %536 = vector.extract_strided_slice %492 {offsets = [0, 16], sizes = [8, 8], strides = [1, 1]} : vector<8x32xf32> to vector<8x8xf32>
    %537 = vector.extract_strided_slice %493 {offsets = [0, 16], sizes = [8, 8], strides = [1, 1]} : vector<8x32xf32> to vector<8x8xf32>
    %538 = vector.extract_strided_slice %494 {offsets = [0, 16], sizes = [8, 8], strides = [1, 1]} : vector<8x32xf32> to vector<8x8xf32>
    %cst_200 = arith.constant dense<0.000000e+00> : vector<8x8xf32>
    %539 = tpu.matmul %536, %537, %cst_200 {dimension_numbers = #tpu.dot_dimension_numbers<[1], [1], [0], [0], [0, 0, 1, 0], [], []>} : vector<8x8xf32>, vector<8x8xf32>, vector<8x8xf32> -> vector<8x8xf32>
    %cst_201 = arith.constant -1.000000e+09 : f32
    %540 = vector.broadcast %cst_201 : f32 to vector<8x8xf32>
    %541 = arith.select %491, %539, %540 : vector<8x8xi1>, vector<8x8xf32>
    %cst_202 = arith.constant dense<0xFF800000> : vector<8xf32>
    %542 = vector.multi_reduction <maximumf>, %541, %cst_202 [1] : vector<8x8xf32> to vector<8xf32>
    %543 = vector.shape_cast %542 : vector<8xf32> to vector<8x1xf32>
    %544 = vector.broadcast %543 : vector<8x1xf32> to vector<8x8xf32>
    %545 = arith.subf %541, %544 : vector<8x8xf32>
    %546 = math.exp %545 : vector<8x8xf32>
    %cst_203 = arith.constant dense<0.000000e+00> : vector<8xf32>
    %547 = vector.multi_reduction <add>, %546, %cst_203 [1] : vector<8x8xf32> to vector<8xf32>
    %548 = vector.shape_cast %547 : vector<8xf32> to vector<8x1xf32>
    %549 = tpu.reciprocal %548 {approx = true} : vector<8x1xf32> -> vector<8x1xf32>
    %550 = vector.broadcast %549 : vector<8x1xf32> to vector<8x8xf32>
    %551 = arith.mulf %546, %550 : vector<8x8xf32>
    %cst_204 = arith.constant dense<0.000000e+00> : vector<8x8xf32>
    %552 = tpu.matmul %551, %538, %cst_204 {dimension_numbers = #tpu.dot_dimension_numbers<[1], [0], [0], [1], [0, 0, 1, 1], [], []>} : vector<8x8xf32>, vector<8x8xf32>, vector<8x8xf32> -> vector<8x8xf32>
    %553 = vector.extract_strided_slice %473 {offsets = [16, 0], sizes = [8, 32], strides = [1, 1]} : vector<32x32xf32> to vector<8x32xf32>
    %cst_205 = arith.constant dense<0.000000e+00> : vector<8x32xf32>
    %554 = tpu.matmul %552, %553, %cst_205 {dimension_numbers = #tpu.dot_dimension_numbers<[1], [0], [0], [1], [0, 0, 1, 1], [], []>} : vector<8x8xf32>, vector<8x32xf32>, vector<8x32xf32> -> vector<8x32xf32>
    %555 = arith.addf %535, %554 : vector<8x32xf32>
    %556 = vector.extract_strided_slice %492 {offsets = [0, 24], sizes = [8, 8], strides = [1, 1]} : vector<8x32xf32> to vector<8x8xf32>
    %557 = vector.extract_strided_slice %493 {offsets = [0, 24], sizes = [8, 8], strides = [1, 1]} : vector<8x32xf32> to vector<8x8xf32>
    %558 = vector.extract_strided_slice %494 {offsets = [0, 24], sizes = [8, 8], strides = [1, 1]} : vector<8x32xf32> to vector<8x8xf32>
    %cst_206 = arith.constant dense<0.000000e+00> : vector<8x8xf32>
    %559 = tpu.matmul %556, %557, %cst_206 {dimension_numbers = #tpu.dot_dimension_numbers<[1], [1], [0], [0], [0, 0, 1, 0], [], []>} : vector<8x8xf32>, vector<8x8xf32>, vector<8x8xf32> -> vector<8x8xf32>
    %cst_207 = arith.constant -1.000000e+09 : f32
    %560 = vector.broadcast %cst_207 : f32 to vector<8x8xf32>
    %561 = arith.select %491, %559, %560 : vector<8x8xi1>, vector<8x8xf32>
    %cst_208 = arith.constant dense<0xFF800000> : vector<8xf32>
    %562 = vector.multi_reduction <maximumf>, %561, %cst_208 [1] : vector<8x8xf32> to vector<8xf32>
    %563 = vector.shape_cast %562 : vector<8xf32> to vector<8x1xf32>
    %564 = vector.broadcast %563 : vector<8x1xf32> to vector<8x8xf32>
    %565 = arith.subf %561, %564 : vector<8x8xf32>
    %566 = math.exp %565 : vector<8x8xf32>
    %cst_209 = arith.constant dense<0.000000e+00> : vector<8xf32>
    %567 = vector.multi_reduction <add>, %566, %cst_209 [1] : vector<8x8xf32> to vector<8xf32>
    %568 = vector.shape_cast %567 : vector<8xf32> to vector<8x1xf32>
    %569 = tpu.reciprocal %568 {approx = true} : vector<8x1xf32> -> vector<8x1xf32>
    %570 = vector.broadcast %569 : vector<8x1xf32> to vector<8x8xf32>
    %571 = arith.mulf %566, %570 : vector<8x8xf32>
    %cst_210 = arith.constant dense<0.000000e+00> : vector<8x8xf32>
    %572 = tpu.matmul %571, %558, %cst_210 {dimension_numbers = #tpu.dot_dimension_numbers<[1], [0], [0], [1], [0, 0, 1, 1], [], []>} : vector<8x8xf32>, vector<8x8xf32>, vector<8x8xf32> -> vector<8x8xf32>
    %573 = vector.extract_strided_slice %473 {offsets = [24, 0], sizes = [8, 32], strides = [1, 1]} : vector<32x32xf32> to vector<8x32xf32>
    %cst_211 = arith.constant dense<0.000000e+00> : vector<8x32xf32>
    %574 = tpu.matmul %572, %573, %cst_211 {dimension_numbers = #tpu.dot_dimension_numbers<[1], [0], [0], [1], [0, 0, 1, 1], [], []>} : vector<8x8xf32>, vector<8x32xf32>, vector<8x32xf32> -> vector<8x32xf32>
    %575 = arith.addf %555, %574 : vector<8x32xf32>
    %c1_212 = arith.constant 1 : index
    %c0_213 = arith.constant 0 : index
    %c0_214 = arith.constant 0 : index
    %576 = vector.load %arg2[%c1_212, %c0_213, %c0_214] : memref<2x8x8xf32, #tpu.memory_space<vmem>>, vector<1x8x8xf32>
    %577 = vector.shape_cast %576 : vector<1x8x8xf32> to vector<8x8xf32>
    %cst_215 = arith.constant 0.000000e+00 : f32
    %578 = vector.broadcast %cst_215 : f32 to vector<8x8xf32>
    %579 = arith.cmpf one, %577, %578 : vector<8x8xf32>
    %580 = vector.extract_strided_slice %480 {offsets = [8, 0], sizes = [8, 32], strides = [1, 1]} : vector<16x32xf32> to vector<8x32xf32>
    %581 = vector.extract_strided_slice %486 {offsets = [8, 0], sizes = [8, 32], strides = [1, 1]} : vector<16x32xf32> to vector<8x32xf32>
    %582 = vector.extract_strided_slice %487 {offsets = [8, 0], sizes = [8, 32], strides = [1, 1]} : vector<16x32xf32> to vector<8x32xf32>
    %cst_216 = arith.constant 0.000000e+00 : f32
    %583 = vector.broadcast %cst_216 : f32 to vector<8x32xf32>
    %584 = vector.extract_strided_slice %580 {offsets = [0, 0], sizes = [8, 8], strides = [1, 1]} : vector<8x32xf32> to vector<8x8xf32>
    %585 = vector.extract_strided_slice %581 {offsets = [0, 0], sizes = [8, 8], strides = [1, 1]} : vector<8x32xf32> to vector<8x8xf32>
    %586 = vector.extract_strided_slice %582 {offsets = [0, 0], sizes = [8, 8], strides = [1, 1]} : vector<8x32xf32> to vector<8x8xf32>
    %cst_217 = arith.constant dense<0.000000e+00> : vector<8x8xf32>
    %587 = tpu.matmul %584, %585, %cst_217 {dimension_numbers = #tpu.dot_dimension_numbers<[1], [1], [0], [0], [0, 0, 1, 0], [], []>} : vector<8x8xf32>, vector<8x8xf32>, vector<8x8xf32> -> vector<8x8xf32>
    %cst_218 = arith.constant -1.000000e+09 : f32
    %588 = vector.broadcast %cst_218 : f32 to vector<8x8xf32>
    %589 = arith.select %579, %587, %588 : vector<8x8xi1>, vector<8x8xf32>
    %cst_219 = arith.constant dense<0xFF800000> : vector<8xf32>
    %590 = vector.multi_reduction <maximumf>, %589, %cst_219 [1] : vector<8x8xf32> to vector<8xf32>
    %591 = vector.shape_cast %590 : vector<8xf32> to vector<8x1xf32>
    %592 = vector.broadcast %591 : vector<8x1xf32> to vector<8x8xf32>
    %593 = arith.subf %589, %592 : vector<8x8xf32>
    %594 = math.exp %593 : vector<8x8xf32>
    %cst_220 = arith.constant dense<0.000000e+00> : vector<8xf32>
    %595 = vector.multi_reduction <add>, %594, %cst_220 [1] : vector<8x8xf32> to vector<8xf32>
    %596 = vector.shape_cast %595 : vector<8xf32> to vector<8x1xf32>
    %597 = tpu.reciprocal %596 {approx = true} : vector<8x1xf32> -> vector<8x1xf32>
    %598 = vector.broadcast %597 : vector<8x1xf32> to vector<8x8xf32>
    %599 = arith.mulf %594, %598 : vector<8x8xf32>
    %cst_221 = arith.constant dense<0.000000e+00> : vector<8x8xf32>
    %600 = tpu.matmul %599, %586, %cst_221 {dimension_numbers = #tpu.dot_dimension_numbers<[1], [0], [0], [1], [0, 0, 1, 1], [], []>} : vector<8x8xf32>, vector<8x8xf32>, vector<8x8xf32> -> vector<8x8xf32>
    %601 = vector.extract_strided_slice %473 {offsets = [0, 0], sizes = [8, 32], strides = [1, 1]} : vector<32x32xf32> to vector<8x32xf32>
    %cst_222 = arith.constant dense<0.000000e+00> : vector<8x32xf32>
    %602 = tpu.matmul %600, %601, %cst_222 {dimension_numbers = #tpu.dot_dimension_numbers<[1], [0], [0], [1], [0, 0, 1, 1], [], []>} : vector<8x8xf32>, vector<8x32xf32>, vector<8x32xf32> -> vector<8x32xf32>
    %603 = arith.addf %583, %602 : vector<8x32xf32>
    %604 = vector.extract_strided_slice %580 {offsets = [0, 8], sizes = [8, 8], strides = [1, 1]} : vector<8x32xf32> to vector<8x8xf32>
    %605 = vector.extract_strided_slice %581 {offsets = [0, 8], sizes = [8, 8], strides = [1, 1]} : vector<8x32xf32> to vector<8x8xf32>
    %606 = vector.extract_strided_slice %582 {offsets = [0, 8], sizes = [8, 8], strides = [1, 1]} : vector<8x32xf32> to vector<8x8xf32>
    %cst_223 = arith.constant dense<0.000000e+00> : vector<8x8xf32>
    %607 = tpu.matmul %604, %605, %cst_223 {dimension_numbers = #tpu.dot_dimension_numbers<[1], [1], [0], [0], [0, 0, 1, 0], [], []>} : vector<8x8xf32>, vector<8x8xf32>, vector<8x8xf32> -> vector<8x8xf32>
    %cst_224 = arith.constant -1.000000e+09 : f32
    %608 = vector.broadcast %cst_224 : f32 to vector<8x8xf32>
    %609 = arith.select %579, %607, %608 : vector<8x8xi1>, vector<8x8xf32>
    %cst_225 = arith.constant dense<0xFF800000> : vector<8xf32>
    %610 = vector.multi_reduction <maximumf>, %609, %cst_225 [1] : vector<8x8xf32> to vector<8xf32>
    %611 = vector.shape_cast %610 : vector<8xf32> to vector<8x1xf32>
    %612 = vector.broadcast %611 : vector<8x1xf32> to vector<8x8xf32>
    %613 = arith.subf %609, %612 : vector<8x8xf32>
    %614 = math.exp %613 : vector<8x8xf32>
    %cst_226 = arith.constant dense<0.000000e+00> : vector<8xf32>
    %615 = vector.multi_reduction <add>, %614, %cst_226 [1] : vector<8x8xf32> to vector<8xf32>
    %616 = vector.shape_cast %615 : vector<8xf32> to vector<8x1xf32>
    %617 = tpu.reciprocal %616 {approx = true} : vector<8x1xf32> -> vector<8x1xf32>
    %618 = vector.broadcast %617 : vector<8x1xf32> to vector<8x8xf32>
    %619 = arith.mulf %614, %618 : vector<8x8xf32>
    %cst_227 = arith.constant dense<0.000000e+00> : vector<8x8xf32>
    %620 = tpu.matmul %619, %606, %cst_227 {dimension_numbers = #tpu.dot_dimension_numbers<[1], [0], [0], [1], [0, 0, 1, 1], [], []>} : vector<8x8xf32>, vector<8x8xf32>, vector<8x8xf32> -> vector<8x8xf32>
    %621 = vector.extract_strided_slice %473 {offsets = [8, 0], sizes = [8, 32], strides = [1, 1]} : vector<32x32xf32> to vector<8x32xf32>
    %cst_228 = arith.constant dense<0.000000e+00> : vector<8x32xf32>
    %622 = tpu.matmul %620, %621, %cst_228 {dimension_numbers = #tpu.dot_dimension_numbers<[1], [0], [0], [1], [0, 0, 1, 1], [], []>} : vector<8x8xf32>, vector<8x32xf32>, vector<8x32xf32> -> vector<8x32xf32>
    %623 = arith.addf %603, %622 : vector<8x32xf32>
    %624 = vector.extract_strided_slice %580 {offsets = [0, 16], sizes = [8, 8], strides = [1, 1]} : vector<8x32xf32> to vector<8x8xf32>
    %625 = vector.extract_strided_slice %581 {offsets = [0, 16], sizes = [8, 8], strides = [1, 1]} : vector<8x32xf32> to vector<8x8xf32>
    %626 = vector.extract_strided_slice %582 {offsets = [0, 16], sizes = [8, 8], strides = [1, 1]} : vector<8x32xf32> to vector<8x8xf32>
    %cst_229 = arith.constant dense<0.000000e+00> : vector<8x8xf32>
    %627 = tpu.matmul %624, %625, %cst_229 {dimension_numbers = #tpu.dot_dimension_numbers<[1], [1], [0], [0], [0, 0, 1, 0], [], []>} : vector<8x8xf32>, vector<8x8xf32>, vector<8x8xf32> -> vector<8x8xf32>
    %cst_230 = arith.constant -1.000000e+09 : f32
    %628 = vector.broadcast %cst_230 : f32 to vector<8x8xf32>
    %629 = arith.select %579, %627, %628 : vector<8x8xi1>, vector<8x8xf32>
    %cst_231 = arith.constant dense<0xFF800000> : vector<8xf32>
    %630 = vector.multi_reduction <maximumf>, %629, %cst_231 [1] : vector<8x8xf32> to vector<8xf32>
    %631 = vector.shape_cast %630 : vector<8xf32> to vector<8x1xf32>
    %632 = vector.broadcast %631 : vector<8x1xf32> to vector<8x8xf32>
    %633 = arith.subf %629, %632 : vector<8x8xf32>
    %634 = math.exp %633 : vector<8x8xf32>
    %cst_232 = arith.constant dense<0.000000e+00> : vector<8xf32>
    %635 = vector.multi_reduction <add>, %634, %cst_232 [1] : vector<8x8xf32> to vector<8xf32>
    %636 = vector.shape_cast %635 : vector<8xf32> to vector<8x1xf32>
    %637 = tpu.reciprocal %636 {approx = true} : vector<8x1xf32> -> vector<8x1xf32>
    %638 = vector.broadcast %637 : vector<8x1xf32> to vector<8x8xf32>
    %639 = arith.mulf %634, %638 : vector<8x8xf32>
    %cst_233 = arith.constant dense<0.000000e+00> : vector<8x8xf32>
    %640 = tpu.matmul %639, %626, %cst_233 {dimension_numbers = #tpu.dot_dimension_numbers<[1], [0], [0], [1], [0, 0, 1, 1], [], []>} : vector<8x8xf32>, vector<8x8xf32>, vector<8x8xf32> -> vector<8x8xf32>
    %641 = vector.extract_strided_slice %473 {offsets = [16, 0], sizes = [8, 32], strides = [1, 1]} : vector<32x32xf32> to vector<8x32xf32>
    %cst_234 = arith.constant dense<0.000000e+00> : vector<8x32xf32>
    %642 = tpu.matmul %640, %641, %cst_234 {dimension_numbers = #tpu.dot_dimension_numbers<[1], [0], [0], [1], [0, 0, 1, 1], [], []>} : vector<8x8xf32>, vector<8x32xf32>, vector<8x32xf32> -> vector<8x32xf32>
    %643 = arith.addf %623, %642 : vector<8x32xf32>
    %644 = vector.extract_strided_slice %580 {offsets = [0, 24], sizes = [8, 8], strides = [1, 1]} : vector<8x32xf32> to vector<8x8xf32>
    %645 = vector.extract_strided_slice %581 {offsets = [0, 24], sizes = [8, 8], strides = [1, 1]} : vector<8x32xf32> to vector<8x8xf32>
    %646 = vector.extract_strided_slice %582 {offsets = [0, 24], sizes = [8, 8], strides = [1, 1]} : vector<8x32xf32> to vector<8x8xf32>
    %cst_235 = arith.constant dense<0.000000e+00> : vector<8x8xf32>
    %647 = tpu.matmul %644, %645, %cst_235 {dimension_numbers = #tpu.dot_dimension_numbers<[1], [1], [0], [0], [0, 0, 1, 0], [], []>} : vector<8x8xf32>, vector<8x8xf32>, vector<8x8xf32> -> vector<8x8xf32>
    %cst_236 = arith.constant -1.000000e+09 : f32
    %648 = vector.broadcast %cst_236 : f32 to vector<8x8xf32>
    %649 = arith.select %579, %647, %648 : vector<8x8xi1>, vector<8x8xf32>
    %cst_237 = arith.constant dense<0xFF800000> : vector<8xf32>
    %650 = vector.multi_reduction <maximumf>, %649, %cst_237 [1] : vector<8x8xf32> to vector<8xf32>
    %651 = vector.shape_cast %650 : vector<8xf32> to vector<8x1xf32>
    %652 = vector.broadcast %651 : vector<8x1xf32> to vector<8x8xf32>
    %653 = arith.subf %649, %652 : vector<8x8xf32>
    %654 = math.exp %653 : vector<8x8xf32>
    %cst_238 = arith.constant dense<0.000000e+00> : vector<8xf32>
    %655 = vector.multi_reduction <add>, %654, %cst_238 [1] : vector<8x8xf32> to vector<8xf32>
    %656 = vector.shape_cast %655 : vector<8xf32> to vector<8x1xf32>
    %657 = tpu.reciprocal %656 {approx = true} : vector<8x1xf32> -> vector<8x1xf32>
    %658 = vector.broadcast %657 : vector<8x1xf32> to vector<8x8xf32>
    %659 = arith.mulf %654, %658 : vector<8x8xf32>
    %cst_239 = arith.constant dense<0.000000e+00> : vector<8x8xf32>
    %660 = tpu.matmul %659, %646, %cst_239 {dimension_numbers = #tpu.dot_dimension_numbers<[1], [0], [0], [1], [0, 0, 1, 1], [], []>} : vector<8x8xf32>, vector<8x8xf32>, vector<8x8xf32> -> vector<8x8xf32>
    %661 = vector.extract_strided_slice %473 {offsets = [24, 0], sizes = [8, 32], strides = [1, 1]} : vector<32x32xf32> to vector<8x32xf32>
    %cst_240 = arith.constant dense<0.000000e+00> : vector<8x32xf32>
    %662 = tpu.matmul %660, %661, %cst_240 {dimension_numbers = #tpu.dot_dimension_numbers<[1], [0], [0], [1], [0, 0, 1, 1], [], []>} : vector<8x8xf32>, vector<8x32xf32>, vector<8x32xf32> -> vector<8x32xf32>
    %663 = arith.addf %643, %662 : vector<8x32xf32>
    %664 = tpu.concatenate %575, %663 in 0 : vector<8x32xf32>, vector<8x32xf32> -> vector<16x32xf32>
    %665 = vector.broadcast %475 : vector<1x32xf32> to vector<16x32xf32>
    %666 = arith.addf %664, %665 : vector<16x32xf32>
    %667 = arith.addf %1, %666 : vector<16x32xf32>
    %c1_241 = arith.constant 1 : index
    %c0_242 = arith.constant 0 : index
    %668 = vector.load %arg12[%c1_241, %c0_242] : memref<5x32xf32, #tpu.memory_space<vmem>>, vector<1x32xf32>
    %c1_243 = arith.constant 1 : index
    %c0_244 = arith.constant 0 : index
    %669 = vector.load %arg13[%c1_243, %c0_244] : memref<5x32xf32, #tpu.memory_space<vmem>>, vector<1x32xf32>
    %cst_245 = arith.constant dense<0.000000e+00> : vector<16xf32>
    %670 = vector.multi_reduction <add>, %443, %cst_245 [1] : vector<16x32xf32> to vector<16xf32>
    %671 = vector.shape_cast %670 : vector<16xf32> to vector<16x1xf32>
    %cst_246 = arith.constant 3.200000e+01 : f32
    %672 = vector.broadcast %cst_246 : f32 to vector<16x1xf32>
    %673 = arith.divf %671, %672 : vector<16x1xf32>
    %674 = vector.broadcast %673 : vector<16x1xf32> to vector<16x32xf32>
    %675 = arith.subf %443, %674 : vector<16x32xf32>
    %676 = arith.mulf %675, %675 : vector<16x32xf32>
    %cst_247 = arith.constant dense<0.000000e+00> : vector<16xf32>
    %677 = vector.multi_reduction <add>, %676, %cst_247 [1] : vector<16x32xf32> to vector<16xf32>
    %678 = vector.shape_cast %677 : vector<16xf32> to vector<16x1xf32>
    %cst_248 = arith.constant 3.200000e+01 : f32
    %679 = vector.broadcast %cst_248 : f32 to vector<16x1xf32>
    %680 = arith.divf %678, %679 : vector<16x1xf32>
    %681 = vector.broadcast %673 : vector<16x1xf32> to vector<16x32xf32>
    %682 = arith.subf %443, %681 : vector<16x32xf32>
    %683 = vector.broadcast %668 : vector<1x32xf32> to vector<16x32xf32>
    %684 = arith.mulf %683, %682 : vector<16x32xf32>
    %cst_249 = arith.constant 9.99999974E-6 : f32
    %685 = vector.broadcast %cst_249 : f32 to vector<16x1xf32>
    %686 = arith.addf %680, %685 : vector<16x1xf32>
    %687 = math.rsqrt %686 : vector<16x1xf32>
    %688 = vector.broadcast %687 : vector<16x1xf32> to vector<16x32xf32>
    %689 = arith.mulf %684, %688 : vector<16x32xf32>
    %690 = vector.broadcast %669 : vector<1x32xf32> to vector<16x32xf32>
    %691 = arith.addf %689, %690 : vector<16x32xf32>
    %c4 = arith.constant 4 : index
    %c0_250 = arith.constant 0 : index
    %692 = vector.load %arg12[%c4, %c0_250] : memref<5x32xf32, #tpu.memory_space<vmem>>, vector<1x32xf32>
    %c4_251 = arith.constant 4 : index
    %c0_252 = arith.constant 0 : index
    %693 = vector.load %arg13[%c4_251, %c0_252] : memref<5x32xf32, #tpu.memory_space<vmem>>, vector<1x32xf32>
    %cst_253 = arith.constant dense<0.000000e+00> : vector<16xf32>
    %694 = vector.multi_reduction <add>, %667, %cst_253 [1] : vector<16x32xf32> to vector<16xf32>
    %695 = vector.shape_cast %694 : vector<16xf32> to vector<16x1xf32>
    %cst_254 = arith.constant 3.200000e+01 : f32
    %696 = vector.broadcast %cst_254 : f32 to vector<16x1xf32>
    %697 = arith.divf %695, %696 : vector<16x1xf32>
    %698 = vector.broadcast %697 : vector<16x1xf32> to vector<16x32xf32>
    %699 = arith.subf %667, %698 : vector<16x32xf32>
    %700 = arith.mulf %699, %699 : vector<16x32xf32>
    %cst_255 = arith.constant dense<0.000000e+00> : vector<16xf32>
    %701 = vector.multi_reduction <add>, %700, %cst_255 [1] : vector<16x32xf32> to vector<16xf32>
    %702 = vector.shape_cast %701 : vector<16xf32> to vector<16x1xf32>
    %cst_256 = arith.constant 3.200000e+01 : f32
    %703 = vector.broadcast %cst_256 : f32 to vector<16x1xf32>
    %704 = arith.divf %702, %703 : vector<16x1xf32>
    %705 = vector.broadcast %697 : vector<16x1xf32> to vector<16x32xf32>
    %706 = arith.subf %667, %705 : vector<16x32xf32>
    %707 = vector.broadcast %692 : vector<1x32xf32> to vector<16x32xf32>
    %708 = arith.mulf %707, %706 : vector<16x32xf32>
    %cst_257 = arith.constant 9.99999974E-6 : f32
    %709 = vector.broadcast %cst_257 : f32 to vector<16x1xf32>
    %710 = arith.addf %704, %709 : vector<16x1xf32>
    %711 = math.rsqrt %710 : vector<16x1xf32>
    %712 = vector.broadcast %711 : vector<16x1xf32> to vector<16x32xf32>
    %713 = arith.mulf %708, %712 : vector<16x32xf32>
    %714 = vector.broadcast %693 : vector<1x32xf32> to vector<16x32xf32>
    %715 = arith.addf %713, %714 : vector<16x32xf32>
    %716 = tpu.concatenate %691, %715 in 0 : vector<16x32xf32>, vector<16x32xf32> -> vector<32x32xf32>
    %c0_258 = arith.constant 0 : index
    %c0_259 = arith.constant 0 : index
    %717 = vector.load %arg8[%c0_258, %c0_259] : memref<32x64xf32, #tpu.memory_space<vmem>>, vector<32x64xf32>
    %cst_260 = arith.constant dense<0.000000e+00> : vector<32x64xf32>
    %718 = tpu.matmul %716, %717, %cst_260 {dimension_numbers = #tpu.dot_dimension_numbers<[1], [0], [0], [1], [0, 0, 1, 1], [], []>} : vector<32x32xf32>, vector<32x64xf32>, vector<32x64xf32> -> vector<32x64xf32>
    %c0_261 = arith.constant 0 : index
    %c0_262 = arith.constant 0 : index
    %719 = vector.load %arg9[%c0_261, %c0_262] : memref<1x64xf32, #tpu.memory_space<vmem>>, vector<1x64xf32>
    %720 = vector.broadcast %719 : vector<1x64xf32> to vector<32x64xf32>
    %721 = arith.addf %718, %720 : vector<32x64xf32>
    %cst_263 = arith.constant 0.000000e+00 : f32
    %722 = vector.broadcast %cst_263 : f32 to vector<32x64xf32>
    %723 = arith.maximumf %721, %722 : vector<32x64xf32>
    %c0_264 = arith.constant 0 : index
    %c0_265 = arith.constant 0 : index
    %724 = vector.load %arg10[%c0_264, %c0_265] : memref<64x32xf32, #tpu.memory_space<vmem>>, vector<64x32xf32>
    %cst_266 = arith.constant dense<0.000000e+00> : vector<32x32xf32>
    %725 = tpu.matmul %723, %724, %cst_266 {dimension_numbers = #tpu.dot_dimension_numbers<[1], [0], [0], [1], [0, 0, 1, 1], [], []>} : vector<32x64xf32>, vector<64x32xf32>, vector<32x32xf32> -> vector<32x32xf32>
    %c0_267 = arith.constant 0 : index
    %c0_268 = arith.constant 0 : index
    %726 = vector.load %arg11[%c0_267, %c0_268] : memref<1x32xf32, #tpu.memory_space<vmem>>, vector<1x32xf32>
    %727 = vector.broadcast %726 : vector<1x32xf32> to vector<32x32xf32>
    %728 = arith.addf %725, %727 : vector<32x32xf32>
    %729 = vector.extract_strided_slice %728 {offsets = [0, 0], sizes = [16, 32], strides = [1, 1]} : vector<32x32xf32> to vector<16x32xf32>
    %730 = arith.addf %443, %729 : vector<16x32xf32>
    %c0_269 = arith.constant 0 : index
    %c0_270 = arith.constant 0 : index
    %731 = vector.load %arg14[%c0_269, %c0_270] : memref<16x32xf32, #tpu.memory_space<vmem>>, vector<16x32xf32>
    tpu.vector_store %arg14[%c0_269, %c0_270], %730 {strides = array<i32>} : memref<16x32xf32, #tpu.memory_space<vmem>>, vector<16x32xf32>,
    %732 = vector.extract_strided_slice %728 {offsets = [16, 0], sizes = [16, 32], strides = [1, 1]} : vector<32x32xf32> to vector<16x32xf32>
    %733 = arith.addf %667, %732 : vector<16x32xf32>
    %c0_271 = arith.constant 0 : index
    %c0_272 = arith.constant 0 : index
    %734 = vector.load %arg15[%c0_271, %c0_272] : memref<16x32xf32, #tpu.memory_space<vmem>>, vector<16x32xf32>
    tpu.vector_store %arg15[%c0_271, %c0_272], %733 {strides = array<i32>} : memref<16x32xf32, #tpu.memory_space<vmem>>, vector<16x32xf32>,
    return
  }
}

</mosaic_0001>

<bundles_post_ra>
// kernel: encoder_layer_forward.1
= control target key start
LH: loop header
LB: loop body
LE: loop exit
PB: predicated region body
PF: predicated region fallthrough
CT: control target
= control target key end

     0   :  { %21 = vsyncpa [#allocation3], 0  ;;  %vm57_vm0 = vcmask 261120   ;;  %s4133_s0 = inlined_call_operand.vmem [shape: f32[16,32], index: 0, kind: input, shape index: {}]   ;;  %s4134_s1 = inlined_call_operand.vmem [shape: f32[16,32], index: 1, kind: input, shape index: {}]   ;;  %s4135_s2 = inlined_call_operand.vmem [shape: f32[2,8,8], index: 2, kind: input, shape index: {}]   ;;  %s4136_s3 = inlined_call_operand.vmem [shape: f32[2,8,8], index: 3, kind: input, shape index: {}]   ;;  %s4137_s4 = inlined_call_operand.vmem [shape: f32[3,32,96], index: 4, kind: input, shape index: {}]   ;;  %s4138_s5 = inlined_call_operand.vmem [shape: f32[3,1,96], index: 5, kind: input, shape index: {}]   ;;  %s4139_s6 = inlined_call_operand.vmem [shape: f32[3,32,32], index: 6, kind: input, shape index: {}]   ;;  %s4140_s7 = inlined_call_operand.vmem [shape: f32[3,1,32], index: 7, kind: input, shape index: {}]   ;;  %s4141_s8 = inlined_call_operand.vmem [shape: f32[32,64], index: 8, kind: input, shape index: {}]   ;;  %s4142_s9 = inlined_call_operand.vmem [shape: f32[1,64], index: 9, kind: input, shape index: {}]   ;;  %s4143_s10 = inlined_call_operand.vmem [shape: f32[64,32], index: 10, kind: input, shape index: {}]   ;;  %s4144_s11 = inlined_call_operand.vmem [shape: f32[1,32], index: 11, kind: input, shape index: {}]   ;;  %s4145_s12 = inlined_call_operand.vmem [shape: f32[5,32], index: 12, kind: input, shape index: {}]   ;;  %s4146_s13 = inlined_call_operand.vmem [shape: f32[5,32], index: 13, kind: input, shape index: {}]   ;;  %s4147_s14 = inlined_call_operand.hbm [shape: f32[16,32], index: 14, kind: output, shape index: {0}]   ;;  %s4148_s15 = inlined_call_operand.hbm [shape: f32[16,32], index: 15, kind: output, shape index: {1}]  }
   0x1   :  { %v3335_v0 = vld [vmem:[%s4133_s0] sm:$0xff] }
   0x2   :  { %v58_v1 = vsel %vm57_vm0, %v3335_v0, 0.0 }
   0x3   :  { %59 = vadd.xlane.f32.xlu0 %v58_v1 }
   0x4   :  { %22 = vsyncpa [#allocation5], 0  ;;  %v3236_v2 = vmov 32.0   ;;  %v118_v14 = vld [vmem:[%s4137_s4 + $0x18] sm:$0xff]  ;;  %v117_v15 = vld [vmem:[%s4137_s4 + $0x10] sm:$0xff]  ;;  %s3237_s19 = smov 88  }
   0x5   :  { %3064 = vrcp.f32 %v3236_v2  ;;  %146 = vmatpush.msra.mxu2 %v118_v14  ;;  %v116_v16 = vld [vmem:[%s4137_s4 + $0x8] sm:$0xff]  ;;  %v115_v17 = vld [vmem:[%s4137_s4] sm:$0xff]  ;;  %s3238_s20 = smov 64   ;;  %s3239_s21 = smov 96   ;;  %vm162_vm5 = vcmask 64512  }
   0x6   :  { %v3360_v25 = vld [vmem:[%s4145_s12] ss:$0 sm:$0xff]  ;;  %v3387_v36 = vld [vmem:[%s4133_s0 + $0x8] sm:$0xff]  ;;  %s3240_s24 = smov 80   ;;  %s3241_s25 = smov 72  }
   0x7   :  { %147 = vmatpush.msra.mxu2 %v117_v15  ;;  %v3366_v29 = vld [vmem:[%s4146_s13] ss:$0 sm:$0xff]  ;;  %v61_v37 = vsel %vm57_vm0, %v3387_v36, 0.0  ;;  %s3242_s26 = smov 104   ;;  %s3243_s27 = smov 48  }
   0x8   :  { %v3373_v33 = vld [vmem:[%s4138_s5] ss:$0 sm:$0xff]  ;;  %s3244_s29 = smov 120   ;;  %s3245_s22 = smov 112  }
   0x9   :  { %148 = vmatpush.msra.mxu2 %v116_v16  ;;  %v3410_v45 = vld [vmem:[%s4135_s2] sm:$0xff]  ;;  %s3247_s28 = smov 40  }
   0xa   :  { %vm158_vm6 = vcmp.ne.f32.partialorder %v3410_v45, 0.0 }
   0xb   :  { %v3065_v3 = vpop.eup %3064  ;;  %149 = vmatpush.msra.mxu2 %v115_v17 }
   0xc   :  { %v65_v4 = vmul.f32 32.0, %v3065_v3  ;;  %vm69_vm1 = vweird.f32 %v3065_v3 }
   0xe   :  { %v66_v5 = vsub.f32 1.0, %v65_v4 }
  0x10   :  { %v67_v6 = vmul.f32 %v3065_v3, %v66_v5 }
  0x12   :  { %v68_v7 = vadd.f32 %v3065_v3, %v67_v6 }
  0x14   :  { %v3339_v8 = vsel %vm69_vm1, %v3065_v3, %v68_v7 }
  0x76   :  { %v60_v9 = vpop.xlane.xlu0 %59 }
  0x77   :  { %v71_v10 = vmul.f32 %v3339_v8, %v60_v9 }
  0x79   :  { %v73_v11 = vsub.f32 %v3335_v0, %v71_v10 }
  0x7b   :  { %v75_v12 = vmul.f32 %v73_v11, %v73_v11  ;;  %v86_v28 = vmul.f32 %v3360_v25, %v73_v11 }
  0x7d   :  { %v77_v13 = vsel %vm57_vm0, %v75_v12, 0.0  ;;  %v3429_v12 = vld [vmem:[%s4139_s6 + $0x8] sm:$0xff] }
  0x7e   :  { %78 = vadd.xlane.f32.xlu0 %v77_v13 }
  0xf1   :  { %v79_v18 = vpop.xlane.xlu0 %78 }
  0xf2   :  { %v83_v19 = vmul.f32 %v79_v18, %v3339_v8 }
  0xf4   :  { %v88_v20 = vadd.f32 1e-05, %v83_v19 }
  0xf6   :  { %3066 = vrsqrt.f32 %v88_v20  ;;  %vm96_vm3 = vweird.f32 %v88_v20 }
  0xfc   :  { %v3067_v21 = vpop.eup %3066 }
  0xfd   :  { %v91_v22 = vmul.f32 %v3067_v21, %v88_v20  ;;  %vm97_vm2 = vweird.f32 %v3067_v21  ;;  %v120_v20 = vld [vmem:[%s4139_s6] sm:$0xff] }
  0xfe   :  { %vm98_vm4 = vmor %vm96_vm3, %vm97_vm2  ;;  %332 = vmatpush.msra.mxu3 %v120_v20 }
  0xff   :  { %v92_v23 = vmul.f32 %v3067_v21, %v91_v22 }
 0x101   :  { %v93_v24 = vmul.f32 0.5, %v92_v23 }
 0x103   :  { %v94_v26 = vsub.f32 1.5, %v93_v24 }
 0x105   :  { %v95_v27 = vmul.f32 %v3067_v21, %v94_v26 }
 0x107   :  { %v99_v30 = vsel %vm98_vm4, %v3067_v21, %v95_v27 }
 0x108   :  { %v110_v31 = vmul.f32 %v99_v30, %v86_v28 }
 0x10a   :  { %v113_v32 = vadd.f32 %v3366_v29, %v110_v31 }
 0x10c   :  { %2874 = vmatmul.msk.f32.vlgmr.msra.gmra.mxu2 %vm57_vm0, %v113_v32 }
 0x18f   :  { %v151_v34 = vpop.f32.mrf.mxu2 }
 0x190   :  { %v3376_v35 = vadd.f32 %v3373_v33, %v151_v34 }
 0x192   :  { %227 = vrot.lane.b32.xlu0 %v3376_v35, %s3237_s19  ;;  %199 = vrot.lane.b32.xlu2 %v3376_v35, %s3238_s20 }
 0x193   :  { %160 = vrot.lane.b32.xlu1 %v3376_v35, %s3239_s21 }
 0x1bc   :  { %62 = vadd.xlane.f32.xlu0 %v61_v37 }
 0x1d0   :  { %339 = vrot.lane.b32.xlu0 %v3376_v35, %s3240_s24 }
 0x1d8   :  { %429 = vrot.lane.b32.xlu0 %v3376_v35, %s3241_s25 }
 0x1e0   :  { %427 = vrot.lane.b32.xlu0 %v3376_v35, %s3242_s26 }
 0x1e8   :  { %377 = vrot.lane.b32.xlu0 %v3376_v35, %s3243_s27 }
 0x1ec   :  { %v200_v39 = vpop.permute.xlu2 %199 }
 0x204   :  { %v228_v40 = vpop.permute.xlu0 %227 }
 0x205   :  { %v161_v38 = vpop.permute.xlu1 %160 }
 0x206   :  { %2876 = vmatpush.xpose.msk.msra.mxu1 %vm162_vm5, %v161_v38 }
 0x209   :  { %2877 = vmatmul.msk.f32.vlgmr.msra.gmra.mxu1 %vm162_vm5, %v3376_v35 }
 0x20a   :  { %220 = vmatpush.msrb.mxu1 %v200_v39 }
 0x20c   :  { %2879 = vmatpush.xpose.msk.msra.mxu1 %vm162_vm5, %v228_v40 }
 0x22f   :  { %v63_v41 = vpop.xlane.xlu0 %62 }
 0x230   :  { %v72_v46 = vmul.f32 %v3339_v8, %v63_v41 }
 0x232   :  { %v74_v47 = vsub.f32 %v3387_v36, %v72_v46 }
 0x234   :  { %v76_v51 = vmul.f32 %v74_v47, %v74_v47  ;;  %v87_v3 = vmul.f32 %v3360_v25, %v74_v47 }
 0x236   :  { %v80_v52 = vsel %vm57_vm0, %v76_v51, 0.0 }
 0x242   :  { %v3403_v42 = vpop.permute.xlu0 %339 }
 0x24a   :  { %v430_v43 = vpop.permute.xlu0 %429 }
 0x24b   :  { %2888 = vmatpush.xpose.msk.msra.mxu0 %vm162_vm5, %v430_v43 }
 0x252   :  { %v428_v44 = vpop.permute.xlu0 %427 }
 0x253   :  { %2889 = vmatmul.msk.f32.vlgmr.msra.gmra.mxu0 %vm162_vm5, %v428_v44 }
 0x25a   :  { %v378_v14 = vpop.permute.xlu0 %377 }
 0x286   :  { %v184_v48 = vpop.f32.mrf.mxu1 }
 0x287   :  { %v187_v49 = vsel %vm158_vm6, %v184_v48, -1e+09 }
 0x288   :  { %v188_v50 = vsel %vm162_vm5, %v187_v49, -inf }
 0x289   :  { %189 = vmax.xlane.f32.xlu1 %v188_v50 }
 0x291   :  { %81 = vadd.xlane.f32.xlu1 %v80_v52 }
 0x2d0   :  { %v452_v17 = vpop.f32.mrf.mxu0 }
 0x2d1   :  { %v455_v18 = vsel %vm158_vm6, %v452_v17, -1e+09 }
 0x2d2   :  { %v456_v19 = vsel %vm162_vm5, %v455_v18, -inf }
 0x2fc   :  { %v190_v53 = vpop.xlane.xlu1 %189 }
 0x2fd   :  { %v191_v54 = vsub.f32 %v187_v49, %v190_v53 }
 0x2ff   :  { %v192_v55 = vmul.f32 1.442695, %v191_v54 }
 0x301   :  { %3068 = vpow2.f32 %v192_v55 }
 0x304   :  { %v82_v56 = vpop.xlane.xlu1 %81 }
 0x305   :  { %v84_v57 = vmul.f32 %v82_v56, %v3339_v8 }
 0x307   :  { %v3069_v58 = vpop.eup %3068  ;;  %v89_v59 = vadd.f32 1e-05, %v84_v57 }
 0x308   :  { %v194_v60 = vsel %vm162_vm5, %v3069_v58, 0.0 }
 0x309   :  { %3070 = vrsqrt.f32 %v89_v59  ;;  %195 = vadd.xlane.f32.xlu2 %v194_v60  ;;  %vm106_vm7 = vweird.f32 %v89_v59  ;;  %v3487_v60 = vld [vmem:[%s4139_s6 + $0x18] sm:$0xff] }
 0x30f   :  { %v3071_v61 = vpop.eup %3070 }
 0x310   :  { %v101_v62 = vmul.f32 %v3071_v61, %v89_v59  ;;  %vm107_vm8 = vweird.f32 %v3071_v61 }
 0x311   :  { %vm108_vm9 = vmor %vm106_vm7, %vm107_vm8 }
 0x312   :  { %v102_v63 = vmul.f32 %v3071_v61, %v101_v62 }
 0x314   :  { %v103_v1 = vmul.f32 0.5, %v102_v63 }
 0x316   :  { %v104_v2 = vsub.f32 1.5, %v103_v1 }
 0x318   :  { %v105_v4 = vmul.f32 %v3071_v61, %v104_v2 }
 0x31a   :  { %v109_v5 = vsel %vm108_vm9, %v3071_v61, %v105_v4 }
 0x31b   :  { %v111_v6 = vmul.f32 %v109_v5, %v87_v3 }
 0x31d   :  { %v114_v7 = vadd.f32 %v3366_v29, %v111_v6  ;;  %v3501_v6 = vld [vmem:[%s4135_s2 + $0x8] sm:$0xff] }
 0x31e   :  { %vm519_vm10 = vcmp.ne.f32.partialorder %v3501_v6, 0.0 }
 0x31f   :  { %2875 = vmatmul.msk.f32.gmra.mxu2 %vm57_vm0, %v114_v7 }
 0x321   :  { %225 = vrot.lane.b32.xlu2 %v3376_v35, %s3244_s29 }
 0x37c   :  { %v196_v9 = vpop.xlane.xlu2 %195 }
 0x37d   :  { %3072 = vrcp.f32 %v196_v9 }
 0x383   :  { %v3073_v10 = vpop.eup %3072 }
 0x384   :  { %v198_v11 = vmul.f32 %v3073_v10, %v3069_v58  ;;  %v226_v13 = vpop.permute.xlu2 %225 }
 0x386   :  { %2878 = vmatmul.msk.f32.vlgmr.msrb.gmra.mxu1 %vm162_vm5, %v198_v11 }
 0x387   :  { %309 = vmatpush.msrb.mxu1 %v3429_v12 }
 0x38e   :  { %2880 = vmatmul.msk.f32.vlgmr.msra.gmra.mxu1 %vm162_vm5, %v226_v13 }
 0x38f   :  { %398 = vmatpush.msra.mxu1 %v378_v14 }
 0x3a2   :  { %v154_v15 = vpop.f32.mrf.mxu2 }
 0x3a3   :  { %v3435_v16 = vadd.f32 %v3373_v33, %v154_v15  ;;  %v3461_v33 = vld [vmem:[%s4139_s6 + $0x10] sm:$0xff] }
 0x3a4   :  { %421 = vmatpush.msrb.mxu3 %v3461_v33 }
 0x3a5   :  { %521 = vrot.lane.b32.xlu0 %v3435_v16, %s3239_s21 }
 0x3cf   :  { %457 = vmax.xlane.f32.xlu0 %v456_v19 }
 0x3e3   :  { %697 = vrot.lane.b32.xlu0 %v3435_v16, %s3245_s22 }
 0x3eb   :  { %559 = vrot.lane.b32.xlu0 %v3435_v16, %s3238_s20  ;;  %s3246_s20 = smov 56  }
 0x403   :  { %v222_v21 = vpop.f32.mrf.mxu1 }
 0x404   :  { %2883 = vmatmul.msk.f32.vlgmr.msra.gmra.mxu3 %vm162_vm5, %v222_v21 }
 0x40b   :  { %v250_v22 = vpop.f32.mrf.mxu1 }
 0x40c   :  { %v253_v23 = vsel %vm158_vm6, %v250_v22, -1e+09 }
 0x40d   :  { %v254_v24 = vsel %vm162_vm5, %v253_v23, -inf }
 0x40e   :  { %255 = vmax.xlane.f32.xlu2 %v254_v24 }
 0x417   :  { %v522_v30 = vpop.permute.xlu0 %521 }
 0x418   :  { %2893 = vmatpush.xpose.msk.msra.mxu3 %vm162_vm5, %v522_v30 }
 0x426   :  { %337 = vrot.lane.b32.xlu2 %v3376_v35, %s3245_s22 }
 0x442   :  { %v458_v31 = vpop.xlane.xlu0 %457 }
 0x443   :  { %v459_v44 = vsub.f32 %v455_v18, %v458_v31 }
 0x445   :  { %v460_v46 = vmul.f32 1.442695, %v459_v44 }
 0x455   :  { %v698_v32 = vpop.permute.xlu0 %697 }
 0x45d   :  { %v560_v34 = vpop.permute.xlu0 %559 }
 0x45e   :  { %580 = vmatpush.msrb.mxu0 %v560_v34 }
 0x460   :  { %692 = vmatpush.msra.mxu0 %v120_v20 }
 0x481   :  { %v256_v25 = vpop.xlane.xlu2 %255 }
 0x482   :  { %v257_v26 = vsub.f32 %v253_v23, %v256_v25 }
 0x484   :  { %v258_v27 = vmul.f32 1.442695, %v257_v26 }
 0x486   :  { %3074 = vpow2.f32 %v258_v27 }
 0x487   :  { %v334_v11 = vpop.f32.mrf.mxu3 }
 0x489   :  { %v338_v41 = vpop.permute.xlu2 %337 }
 0x48c   :  { %v3075_v28 = vpop.eup %3074 }
 0x48d   :  { %v260_v29 = vsel %vm162_vm5, %v3075_v28, 0.0 }
 0x48e   :  { %261 = vadd.xlane.f32.xlu1 %v260_v29 }
 0x4a7   :  { %265 = vrot.lane.b32.xlu1 %v3376_v35, %s3246_s20 }
 0x501   :  { %v262_v37 = vpop.xlane.xlu1 %261 }
 0x502   :  { %3076 = vrcp.f32 %v262_v37 }
 0x503   :  { %3078 = vpow2.f32 %v460_v46 }
 0x508   :  { %v3077_v38 = vpop.eup %3076 }
 0x509   :  { %v264_v40 = vmul.f32 %v3077_v38, %v3075_v28  ;;  %v3079_v50 = vpop.eup %3078 }
 0x50a   :  { %v462_v51 = vsel %vm162_vm5, %v3079_v50, 0.0 }
 0x519   :  { %v266_v39 = vpop.permute.xlu1 %265 }
 0x51a   :  { %286 = vmatpush.msrb.mxu2 %v266_v39 }
 0x51b   :  { %2881 = vmatmul.msk.f32.vlgmr.msrb.gmra.mxu2 %vm162_vm5, %v264_v40 }
 0x51c   :  { %2884 = vmatpush.xpose.msk.msra.mxu2 %vm162_vm5, %v3403_v42 }
 0x523   :  { %2885 = vmatmul.msk.f32.vlgmr.msra.gmra.mxu2 %vm162_vm5, %v338_v41  ;;  %v3530_v41 = vld [vmem:[%s4140_s7] ss:$0 sm:$0xff] }
 0x59e   :  { %v288_v43 = vpop.f32.mrf.mxu2 }
 0x59f   :  { %2882 = vmatmul.msk.f32.vlgmr.msrb.gmra.mxu1 %vm162_vm5, %v288_v43 }
 0x5a0   :  { %511 = vmatpush.msrb.mxu1 %v3487_v60 }
 0x5a6   :  { %v362_v47 = vpop.f32.mrf.mxu2 }
 0x5a7   :  { %v365_v48 = vsel %vm158_vm6, %v362_v47, -1e+09 }
 0x5a8   :  { %v366_v49 = vsel %vm162_vm5, %v365_v48, -inf }
 0x5a9   :  { %367 = vmax.xlane.f32.xlu1 %v366_v49 }
 0x5b1   :  { %463 = vadd.xlane.f32.xlu1 %v462_v51 }
 0x5ca   :  { %467 = vrot.lane.b32.xlu1 %v3376_v35, %s3247_s28 }
 0x5d2   :  { %585 = vrot.lane.b32.xlu1 %v3435_v16, %s3244_s29 }
 0x61c   :  { %v368_v42 = vpop.xlane.xlu1 %367  ;;  %v311_v4 = vpop.f32.mrf.mxu1 }
 0x61d   :  { %v369_v52 = vsub.f32 %v365_v48, %v368_v42  ;;  %v335_v37 = vadd.f32 %v334_v11, %v311_v4  ;;  %v2910_v4 = vld [vmem:[%s4137_s4 + $0x28] sm:$0xff] }
 0x61f   :  { %v370_v53 = vmul.f32 1.442695, %v369_v52 }
 0x621   :  { %3080 = vpow2.f32 %v370_v53 }
 0x624   :  { %v464_v56 = vpop.xlane.xlu1 %463 }
 0x625   :  { %3082 = vrcp.f32 %v464_v56 }
 0x627   :  { %v3081_v54 = vpop.eup %3080 }
 0x628   :  { %v372_v55 = vsel %vm162_vm5, %v3081_v54, 0.0 }
 0x629   :  { %373 = vadd.xlane.f32.xlu2 %v372_v55 }
 0x62b   :  { %v3083_v57 = vpop.eup %3082 }
 0x62c   :  { %v466_v58 = vmul.f32 %v3083_v57, %v3079_v50 }
 0x63c   :  { %v468_v59 = vpop.permute.xlu1 %467 }
 0x63d   :  { %488 = vmatpush.msrb.mxu2 %v468_v59 }
 0x63e   :  { %2890 = vmatmul.msk.f32.vlgmr.msrb.gmra.mxu2 %vm162_vm5, %v466_v58 }
 0x641   :  { %587 = vrot.lane.b32.xlu2 %v3435_v16, %s3237_s19 }
 0x644   :  { %v586_v1 = vpop.permute.xlu1 %585 }
 0x649   :  { %699 = vrot.lane.b32.xlu2 %v3435_v16, %s3240_s24 }
 0x69c   :  { %v374_v35 = vpop.xlane.xlu2 %373 }
 0x69d   :  { %3084 = vrcp.f32 %v374_v35 }
 0x6a3   :  { %v3085_v61 = vpop.eup %3084 }
 0x6a4   :  { %v376_v62 = vmul.f32 %v3085_v61, %v3081_v54  ;;  %v588_v63 = vpop.permute.xlu2 %587 }
 0x6a5   :  { %2896 = vmatpush.xpose.msk.msra.mxu2 %vm162_vm5, %v588_v63 }
 0x6a6   :  { %2886 = vmatmul.msk.f32.vlgmr.msra.gmra.mxu1 %vm162_vm5, %v376_v62 }
 0x6a8   :  { %2897 = vmatmul.msk.f32.vlgmr.msra.gmra.mxu2 %vm162_vm5, %v586_v1 }
 0x6ac   :  { %v700_v2 = vpop.permute.xlu2 %699 }
 0x6ad   :  { %2901 = vmatpush.xpose.msk.msrb.mxu2 %vm162_vm5, %v700_v2  ;;  %v2912_v2 = vld [vmem:[%s4137_s4 + $0x38] sm:$0xff] }
 0x6b0   :  { %2902 = vmatmul.msk.f32.vlgmr.msrb.gmra.mxu2 %vm162_vm5, %v698_v32 }
 0x6c1   :  { %v490_v3 = vpop.f32.mrf.mxu2 }
 0x6c2   :  { %2891 = vmatmul.msk.f32.vlgmr.msrb.gmra.mxu1 %vm162_vm5, %v490_v3 }
 0x723   :  { %v400_v5 = vpop.f32.mrf.mxu1 }
 0x724   :  { %2887 = vmatmul.msk.f32.vlgmr.msrb.gmra.mxu3 %vm162_vm5, %v400_v5  ;;  %v2909_v5 = vld [vmem:[%s4137_s4 + $0x20] sm:$0xff] }
 0x725   :  { %669 = vmatpush.msrb.mxu3 %v3429_v12 }
 0x72b   :  { %v610_v7 = vpop.f32.mrf.mxu2 }
 0x72c   :  { %v613_v9 = vsel %vm519_vm10, %v610_v7, -1e+09  ;;  %2894 = vmatmul.msk.f32.vlgmr.msra.gmra.mxu3 %vm162_vm5, %v3435_v16  ;;  %v3031_v7 = vpack.i.bf16 %v2909_v5, %v2910_v4 }
 0x72d   :  { %v614_v10 = vsel %vm162_vm5, %v613_v9, -inf  ;;  %781 = vmatpush.msra.mxu3 %v3461_v33 }
 0x72e   :  { %615 = vmax.xlane.f32.xlu0 %v614_v10 }
 0x733   :  { %v722_v17 = vpop.f32.mrf.mxu2 }
 0x734   :  { %v725_v18 = vsel %vm519_vm10, %v722_v17, -1e+09 }
 0x735   :  { %v726_v19 = vsel %vm162_vm5, %v725_v18, -inf }
 0x73f   :  { %v513_v39 = vpop.f32.mrf.mxu1 }
 0x742   :  { %789 = vrot.lane.b32.xlu0 %v3435_v16, %s3241_s25 }
 0x7a1   :  { %v616_v20 = vpop.xlane.xlu0 %615 }
 0x7a2   :  { %v617_v23 = vsub.f32 %v613_v9, %v616_v20 }
 0x7a4   :  { %v618_v25 = vmul.f32 1.442695, %v617_v23 }
 0x7a7   :  { %v423_v12 = vpop.f32.mrf.mxu3 }
 0x7a8   :  { %v426_v38 = vadd.f32 %v423_v12, %v335_v37 }
 0x7aa   :  { %v516_v40 = vadd.f32 %v513_v39, %v426_v38 }
 0x7ac   :  { %v880_v43 = vadd.f32 %v3530_v41, %v516_v40 }
 0x7ae   :  { %v3534_v44 = vadd.f32 %v880_v43, %v3335_v0 }
 0x7af   :  { %v544_v13 = vpop.f32.mrf.mxu3 }
 0x7b0   :  { %v547_v14 = vsel %vm519_vm10, %v544_v13, -1e+09  ;;  %v886_v46 = vsel %vm57_vm0, %v3534_v44, 0.0 }
 0x7b1   :  { %v548_v15 = vsel %vm162_vm5, %v547_v14, -inf }
 0x7b2   :  { %549 = vmax.xlane.f32.xlu1 %v548_v15 }
 0x7b4   :  { %v790_v51 = vpop.permute.xlu0 %789 }
 0x7ba   :  { %727 = vmax.xlane.f32.xlu1 %v726_v19 }
 0x825   :  { %v550_v21 = vpop.xlane.xlu1 %549 }
 0x826   :  { %v551_v22 = vsub.f32 %v547_v14, %v550_v21 }
 0x828   :  { %v552_v24 = vmul.f32 1.442695, %v551_v22  ;;  %v3576_v22 = vld [vmem:[%s4146_s13 + $0x2] ss:$0 sm:$0xff] }
 0x82a   :  { %3086 = vpow2.f32 %v552_v24 }
 0x82b   :  { %3088 = vpow2.f32 %v618_v25 }
 0x82d   :  { %v728_v26 = vpop.xlane.xlu1 %727 }
 0x82e   :  { %v729_v27 = vsub.f32 %v725_v18, %v728_v26  ;;  %v3570_v18 = vld [vmem:[%s4145_s12 + $0x2] ss:$0 sm:$0xff] }
 0x830   :  { %v3087_v28 = vpop.eup %3086  ;;  %v730_v29 = vmul.f32 1.442695, %v729_v27 }
 0x831   :  { %v554_v30 = vsel %vm162_vm5, %v3087_v28, 0.0  ;;  %v3089_v31 = vpop.eup %3088 }
 0x832   :  { %3090 = vpow2.f32 %v730_v29  ;;  %555 = vadd.xlane.f32.xlu2 %v554_v30  ;;  %v620_v33 = vsel %vm162_vm5, %v3089_v31, 0.0 }
 0x838   :  { %v3091_v32 = vpop.eup %3090 }
 0x839   :  { %v732_v34 = vsel %vm162_vm5, %v3091_v32, 0.0 }
 0x83a   :  { %621 = vadd.xlane.f32.xlu2 %v620_v33  ;;  %733 = vadd.xlane.f32.xlu1 %v732_v34 }
 0x852   :  { %625 = vrot.lane.b32.xlu2 %v3435_v16, %s3246_s20 }
 0x853   :  { %737 = vrot.lane.b32.xlu1 %v3435_v16, %s3243_s27 }
 0x85a   :  { %787 = vrot.lane.b32.xlu2 %v3435_v16, %s3242_s26 }
 0x87d   :  { %887 = vadd.xlane.f32.xlu1 %v886_v46  ;;  %v3586_v46 = vld [vmem:[%s4138_s5 + $0x1] ss:$0 sm:$0xff] }
 0x8a5   :  { %v556_v47 = vpop.xlane.xlu2 %555 }
 0x8a6   :  { %3092 = vrcp.f32 %v556_v47 }
 0x8ac   :  { %v3093_v48 = vpop.eup %3092 }
 0x8ad   :  { %v622_v49 = vpop.xlane.xlu2 %621  ;;  %v558_v50 = vmul.f32 %v3093_v48, %v3087_v28  ;;  %v734_v0 = vpop.xlane.xlu1 %733 }
 0x8ae   :  { %3094 = vrcp.f32 %v622_v49  ;;  %v3596_v49 = vld [vmem:[%s4134_s1] sm:$0xff] }
 0x8af   :  { %2895 = vmatmul.msk.f32.vlgmr.msrb.gmra.mxu0 %vm162_vm5, %v558_v50  ;;  %3096 = vrcp.f32 %v734_v0  ;;  %v3603_v50 = vld [vmem:[%s4134_s1 + $0x8] sm:$0xff] }
 0x8b0   :  { %2905 = vmatpush.xpose.msk.msrb.mxu0 %vm162_vm5, %v790_v51 }
 0x8b4   :  { %v3095_v42 = vpop.eup %3094 }
 0x8b5   :  { %v624_v52 = vmul.f32 %v3095_v42, %v3089_v31  ;;  %v626_v53 = vpop.permute.xlu2 %625  ;;  %v3097_v54 = vpop.eup %3096 }
 0x8b6   :  { %646 = vmatpush.msra.mxu1 %v626_v53  ;;  %v736_v55 = vmul.f32 %v3097_v54, %v3091_v32 }
 0x8b7   :  { %2898 = vmatmul.msk.f32.vlgmr.msra.gmra.mxu1 %vm162_vm5, %v624_v52 }
 0x8bd   :  { %v788_v63 = vpop.permute.xlu2 %787 }
 0x8c5   :  { %v738_v56 = vpop.permute.xlu1 %737 }
 0x8c6   :  { %758 = vmatpush.msrb.mxu1 %v738_v56 }
 0x8c7   :  { %2903 = vmatmul.msk.f32.vlgmr.msrb.gmra.mxu1 %vm162_vm5, %v736_v55 }
 0x8c8   :  { %871 = vmatpush.msra.mxu1 %v3487_v60 }
 0x8f0   :  { %v888_v57 = vpop.xlane.xlu1 %887 }
 0x8f1   :  { %v892_v58 = vmul.f32 %v888_v57, %v3339_v8 }
 0x8f3   :  { %v894_v59 = vsub.f32 %v3534_v44, %v892_v58 }
 0x8f5   :  { %v896_v35 = vmul.f32 %v894_v59, %v894_v59  ;;  %v907_v21 = vmul.f32 %v3570_v18, %v894_v59 }
 0x8f7   :  { %v898_v61 = vsel %vm57_vm0, %v896_v35, 0.0 }
 0x8f8   :  { %899 = vadd.xlane.f32.xlu2 %v898_v61 }
 0x910   :  { %827 = vrot.lane.b32.xlu2 %v3435_v16, %s3247_s28  ;;  %v2911_v16 = vld [vmem:[%s4137_s4 + $0x30] sm:$0xff]  ;;  %s3250_s28 = smov 8  }
 0x911   :  { %v3026_v3 = vpack.i.bf16 %v2911_v16, %v2912_v2 }
 0x913   :  { %3027 = vrot.lane.b32.xlu0 %v3026_v3, %s3239_s21 }
 0x91b   :  { %3032 = vrot.lane.b32.xlu0 %v3031_v7, %s3239_s21 }
 0x92c   :  { %v582_v62 = vpop.f32.mrf.mxu0 }
 0x92d   :  { %2900 = vmatmul.msk.f32.vlgmr.msra.gmra.mxu0 %vm162_vm5, %v582_v62 }
 0x934   :  { %v648_v1 = vpop.f32.mrf.mxu1 }
 0x935   :  { %2899 = vmatmul.msk.f32.vlgmr.msrb.gmra.mxu3 %vm162_vm5, %v648_v1  ;;  %2906 = vmatmul.msk.f32.vlgmr.msrb.gmra.mxu0 %vm162_vm5, %v788_v63 }
 0x936   :  { %971 = vmatpush.msrb.mxu3 %v2912_v2 }
 0x938   :  { %972 = vmatpush.msrb.mxu3 %v2911_v16 }
 0x93a   :  { %973 = vmatpush.msrb.mxu3 %v2910_v4 }
 0x93c   :  { %974 = vmatpush.msrb.mxu3 %v2909_v5 }
 0x944   :  { %v760_v60 = vpop.f32.mrf.mxu1 }
 0x945   :  { %2904 = vmatmul.msk.f32.vlgmr.msra.gmra.mxu3 %vm162_vm5, %v760_v60  ;;  %v3636_v60 = vld [vmem:[%s4136_s3] sm:$0xff] }
 0x946   :  { %vm1031_vm14 = vcmp.ne.f32.partialorder %v3636_v60, 0.0 }
 0x96b   :  { %v900_v9 = vpop.xlane.xlu2 %899 }
 0x96c   :  { %v904_v10 = vmul.f32 %v900_v9, %v3339_v8 }
 0x96e   :  { %v909_v11 = vadd.f32 1e-05, %v904_v10 }
 0x970   :  { %3098 = vrsqrt.f32 %v909_v11  ;;  %vm917_vm12 = vweird.f32 %v909_v11 }
 0x973   :  { %v828_v12 = vpop.permute.xlu2 %827 }
 0x974   :  { %848 = vmatpush.msra.mxu2 %v828_v12 }
 0x976   :  { %v3099_v13 = vpop.eup %3098 }
 0x977   :  { %v912_v14 = vmul.f32 %v3099_v13, %v909_v11  ;;  %vm918_vm11 = vweird.f32 %v3099_v13 }
 0x978   :  { %vm919_vm13 = vmor %vm917_vm12, %vm918_vm11 }
 0x979   :  { %v913_v15 = vmul.f32 %v3099_v13, %v912_v14 }
 0x97b   :  { %v914_v17 = vmul.f32 0.5, %v913_v15 }
 0x97d   :  { %v915_v19 = vsub.f32 1.5, %v914_v17 }
 0x97f   :  { %v916_v20 = vmul.f32 %v3099_v13, %v915_v19 }
 0x981   :  { %v920_v23 = vsel %vm919_vm13, %v3099_v13, %v916_v20 }
 0x982   :  { %v931_v24 = vmul.f32 %v920_v23, %v907_v21 }
 0x984   :  { %v934_v25 = vadd.f32 %v3576_v22, %v931_v24  ;;  %v3664_v24 = vld [vmem:[%s4139_s6 + $0x20] sm:$0xff] }
 0x985   :  { %v3028_v34 = vpop.permute.xlu0 %3027 }
 0x986   :  { %2919 = vmatmul.msk.f32.vlgmr.msrb.gmra.mxu3 %vm57_vm0, %v934_v25  ;;  %v3030_v37 = vunpack.i.h.bf16 %v3028_v34  ;;  %v3029_v38 = vunpack.i.l.bf16 %v3028_v34 }
 0x988   :  { %1019 = vmatpush.msra.mxu0 %v3029_v38 }
 0x98a   :  { %1020 = vmatpush.msra.mxu0 %v3030_v37 }
 0x98d   :  { %v3033_v39 = vpop.permute.xlu0 %3032 }
 0x98e   :  { %v3035_v40 = vunpack.i.h.bf16 %v3033_v39  ;;  %v3034_v43 = vunpack.i.l.bf16 %v3033_v39 }
 0x990   :  { %1021 = vmatpush.msra.mxu0 %v3034_v43 }
 0x992   :  { %1022 = vmatpush.msra.mxu0 %v3035_v40 }
 0x993   :  { %2921 = vmatmul.msk.f32.vlgmr.msra.gmra.mxu0 %vm57_vm0, %v3596_v49 }
 0x994   :  { %1203 = vmatpush.msrb.mxu0 %v3664_v24 }
 0x99b   :  { %2922 = vmatmul.msk.f32.gmra.mxu0 %vm57_vm0, %v3603_v50 }
 0x9aa   :  { %v694_v26 = vpop.f32.mrf.mxu0 }
 0x9b2   :  { %v812_v27 = vpop.f32.mrf.mxu0 }
 0x9b3   :  { %v815_v28 = vsel %vm519_vm10, %v812_v27, -1e+09 }
 0x9b4   :  { %v816_v29 = vsel %vm162_vm5, %v815_v28, -inf }
 0x9b5   :  { %817 = vmax.xlane.f32.xlu0 %v816_v29 }
 0x9b8   :  { %v671_v30 = vpop.f32.mrf.mxu3 }
 0x9b9   :  { %v695_v31 = vadd.f32 %v694_v26, %v671_v30 }
 0x9c8   :  { %v783_v32 = vpop.f32.mrf.mxu3 }
 0x9c9   :  { %v786_v33 = vadd.f32 %v783_v32, %v695_v31 }
 0xa09   :  { %v976_v47 = vpop.f32.mrf.mxu3 }
 0xa0a   :  { %v3589_v48 = vadd.f32 %v3586_v46, %v976_v47 }
 0xa0c   :  { %1096 = vrot.lane.b32.xlu2 %v3589_v48, %s3244_s29 }
 0xa10   :  { %v1024_v57 = vpop.f32.mrf.mxu0 }
 0xa28   :  { %v818_v51 = vpop.xlane.xlu0 %817 }
 0xa29   :  { %v819_v42 = vsub.f32 %v815_v28, %v818_v51 }
 0xa2b   :  { %v820_v52 = vmul.f32 1.442695, %v819_v42 }
 0xa2d   :  { %3100 = vpow2.f32 %v820_v52 }
 0xa33   :  { %v3101_v53 = vpop.eup %3100 }
 0xa34   :  { %v822_v0 = vsel %vm162_vm5, %v3101_v53, 0.0 }
 0xa35   :  { %823 = vadd.xlane.f32.xlu1 %v822_v0 }
 0xa4e   :  { %998 = vrot.lane.b32.xlu1 %v3586_v46, %s3239_s21 }
 0xa66   :  { %v1097_v63 = vpop.permute.xlu2 %1096 }
 0xaa8   :  { %v824_v54 = vpop.xlane.xlu1 %823 }
 0xaa9   :  { %3102 = vrcp.f32 %v824_v54  ;;  %v2915_v54 = vld [vmem:[%s4139_s6 + $0x28] sm:$0xff] }
 0xaaa   :  { %1180 = vmatpush.msra.mxu3 %v2915_v54 }
 0xaaf   :  { %v3103_v55 = vpop.eup %3102 }
 0xab0   :  { %v826_v56 = vmul.f32 %v3103_v55, %v3101_v53 }
 0xab2   :  { %2907 = vmatmul.msk.f32.vlgmr.msra.gmra.mxu2 %vm162_vm5, %v826_v56 }
 0xac0   :  { %v3611_v58 = vpop.permute.xlu1 %998 }
 0xac1   :  { %v3614_v59 = vadd.f32 %v1024_v57, %v3611_v58 }
 0xac3   :  { %1098 = vrot.lane.b32.xlu0 %v3614_v59, %s3244_s29  ;;  %2923 = vmatpush.xpose.msk.msrb.mxu2 %vm162_vm5, %v3614_v59 }
 0xac4   :  { %1210 = vrot.lane.b32.xlu1 %v3614_v59, %s3245_s22 }
 0xac6   :  { %2924 = vmatmul.msk.f32.vlgmr.msrb.gmra.mxu2 %vm162_vm5, %v3589_v48 }
 0xacb   :  { %1208 = vrot.lane.b32.xlu0 %v3589_v48, %s3245_s22 }
 0xad3   :  { %1070 = vrot.lane.b32.xlu0 %v3614_v59, %s3239_s21 }
 0xb35   :  { %v850_v35 = vpop.f32.mrf.mxu2  ;;  %v1099_v61 = vpop.permute.xlu0 %1098 }
 0xb36   :  { %2908 = vmatmul.msk.f32.vlgmr.msra.gmra.mxu1 %vm162_vm5, %v850_v35  ;;  %2926 = vmatpush.xpose.msk.msra.mxu2 %vm162_vm5, %v1099_v61  ;;  %v1211_v62 = vpop.permute.xlu1 %1210 }
 0xb39   :  { %2927 = vmatmul.msk.f32.vlgmr.msra.gmra.mxu2 %vm162_vm5, %v1097_v63 }
 0xb3a   :  { %2931 = vmatpush.xpose.msk.msrb.mxu2 %vm162_vm5, %v1211_v62 }
 0xb3d   :  { %v1209_v1 = vpop.permute.xlu0 %1208 }
 0xb41   :  { %2932 = vmatmul.msk.f32.vlgmr.msrb.gmra.mxu2 %vm162_vm5, %v1209_v1 }
 0xb45   :  { %v1071_v2 = vpop.permute.xlu0 %1070 }
 0xb46   :  { %1091 = vmatpush.msrb.mxu1 %v1071_v2 }
 0xb49   :  { %v1055_v16 = vpop.f32.mrf.mxu2 }
 0xb4a   :  { %v1058_v3 = vsel %vm1031_vm14, %v1055_v16, -1e+09 }
 0xb4b   :  { %v1059_v4 = vsel %vm162_vm5, %v1058_v3, -inf }
 0xb4c   :  { %1060 = vmax.xlane.f32.xlu2 %v1059_v4 }
 0xbb3   :  { %v873_v5 = vpop.f32.mrf.mxu1 }
 0xbb4   :  { %v876_v7 = vadd.f32 %v873_v5, %v786_v33 }
 0xbb6   :  { %v881_v9 = vadd.f32 %v3530_v41, %v876_v7 }
 0xbb8   :  { %v3644_v10 = vadd.f32 %v881_v9, %v3387_v36 }
 0xbba   :  { %v889_v11 = vsel %vm57_vm0, %v3644_v10, 0.0 }
 0xbbb   :  { %890 = vadd.xlane.f32.xlu0 %v889_v11 }
 0xbbc   :  { %v1121_v12 = vpop.f32.mrf.mxu2 }
 0xbbd   :  { %v1124_v13 = vsel %vm1031_vm14, %v1121_v12, -1e+09 }
 0xbbe   :  { %v1125_v14 = vsel %vm162_vm5, %v1124_v13, -inf }
 0xbbf   :  { %1126 = vmax.xlane.f32.xlu2 %v1125_v14  ;;  %v1061_v15 = vpop.xlane.xlu2 %1060 }
 0xbc0   :  { %v1062_v17 = vsub.f32 %v1058_v3, %v1061_v15 }
 0xbc2   :  { %v1063_v19 = vmul.f32 1.442695, %v1062_v17  ;;  %v2916_v17 = vld [vmem:[%s4139_s6 + $0x30] sm:$0xff] }
 0xbc3   :  { %1292 = vmatpush.msrb.mxu3 %v2916_v17 }
 0xbc4   :  { %3104 = vpow2.f32 %v1063_v19  ;;  %v1233_v20 = vpop.f32.mrf.mxu2  ;;  %v1027_v19 = vpop.f32.mrf.mxu0 }
 0xbc5   :  { %v1236_v36 = vsel %vm1031_vm14, %v1233_v20, -1e+09 }
 0xbc6   :  { %v1237_v41 = vsel %vm162_vm5, %v1236_v36, -inf }
 0xbc7   :  { %1238 = vmax.xlane.f32.xlu2 %v1237_v41 }
 0xbca   :  { %v3105_v21 = vpop.eup %3104 }
 0xbcb   :  { %v1065_v23 = vsel %vm162_vm5, %v3105_v21, 0.0 }
 0xbcc   :  { %1066 = vadd.xlane.f32.xlu1 %v1065_v23 }
 0xbdf   :  { %1298 = vrot.lane.b32.xlu2 %v3589_v48, %s3242_s26 }
 0xbe5   :  { %1300 = vrot.lane.b32.xlu1 %v3614_v59, %s3242_s26 }
 0xbe7   :  { %1136 = vrot.lane.b32.xlu2 %v3614_v59, %s3237_s19 }
 0xc2e   :  { %v891_v28 = vpop.xlane.xlu0 %890 }
 0xc2f   :  { %v893_v29 = vmul.f32 %v891_v28, %v3339_v8 }
 0xc31   :  { %v895_v34 = vsub.f32 %v3644_v10, %v893_v29 }
 0xc32   :  { %v1127_v25 = vpop.xlane.xlu2 %1126 }
 0xc33   :  { %v1128_v26 = vsub.f32 %v1124_v13, %v1127_v25  ;;  %v897_v40 = vmul.f32 %v895_v34, %v895_v34  ;;  %v908_v11 = vmul.f32 %v3570_v18, %v895_v34  ;;  %v3693_v18 = vadd.f32 %v1027_v19, %v3611_v58  ;;  %v3720_v34 = vld [vmem:[%s4136_s3 + $0x8] sm:$0xff] }
 0xc34   :  { %vm1390_vm3 = vcmp.ne.f32.partialorder %v3720_v34, 0.0 }
 0xc35   :  { %v1129_v27 = vmul.f32 1.442695, %v1128_v26  ;;  %v901_v48 = vsel %vm57_vm0, %v897_v40, 0.0 }
 0xc37   :  { %3106 = vpow2.f32 %v1129_v27 }
 0xc3a   :  { %v1239_v30 = vpop.xlane.xlu2 %1238 }
 0xc3b   :  { %v1240_v31 = vsub.f32 %v1236_v36, %v1239_v30 }
 0xc3d   :  { %v3107_v32 = vpop.eup %3106  ;;  %v1241_v33 = vmul.f32 1.442695, %v1240_v31 }
 0xc3e   :  { %v1131_v37 = vsel %vm162_vm5, %v3107_v32, 0.0 }
 0xc3f   :  { %3108 = vpow2.f32 %v1241_v33  ;;  %v1067_v38 = vpop.xlane.xlu1 %1066  ;;  %1132 = vadd.xlane.f32.xlu0 %v1131_v37 }
 0xc40   :  { %3110 = vrcp.f32 %v1067_v38 }
 0xc42   :  { %v1299_v39 = vpop.permute.xlu2 %1298 }
 0xc45   :  { %v3109_v43 = vpop.eup %3108 }
 0xc46   :  { %v3111_v47 = vpop.eup %3110  ;;  %v1243_v51 = vsel %vm162_vm5, %v3109_v43, 0.0 }
 0xc47   :  { %v1069_v42 = vmul.f32 %v3111_v47, %v3105_v21  ;;  %902 = vadd.xlane.f32.xlu0 %v901_v48  ;;  %1244 = vadd.xlane.f32.xlu1 %v1243_v51 }
 0xc49   :  { %2925 = vmatmul.msk.f32.vlgmr.msrb.gmra.mxu1 %vm162_vm5, %v1069_v42 }
 0xc4a   :  { %v1137_v52 = vpop.permute.xlu2 %1136 }
 0xc4b   :  { %1157 = vmatpush.msra.mxu1 %v1137_v52 }
 0xc57   :  { %v1301_v53 = vpop.permute.xlu1 %1300 }
 0xc58   :  { %2935 = vmatpush.xpose.msk.msra.mxu0 %vm162_vm5, %v1301_v53 }
 0xc5b   :  { %1248 = vrot.lane.b32.xlu0 %v3614_v59, %s3240_s24 }
 0xc60   :  { %1338 = vrot.lane.b32.xlu1 %v3614_v59, %s3241_s25 }
 0xcb2   :  { %v1133_v0 = vpop.xlane.xlu0 %1132 }
 0xcb3   :  { %3112 = vrcp.f32 %v1133_v0 }
 0xcb9   :  { %v3113_v55 = vpop.eup %3112 }
 0xcba   :  { %v1135_v56 = vmul.f32 %v3113_v55, %v3107_v32  ;;  %v903_v57 = vpop.xlane.xlu0 %902  ;;  %v1245_v62 = vpop.xlane.xlu1 %1244 }
 0xcbb   :  { %v905_v35 = vmul.f32 %v903_v57, %v3339_v8  ;;  %v3739_v57 = vld [vmem:[%s4139_s6 + $0x38] sm:$0xff] }
 0xcbc   :  { %2928 = vmatmul.msk.f32.vlgmr.msra.gmra.mxu1 %vm162_vm5, %v1135_v56 }
 0xcbd   :  { %v910_v61 = vadd.f32 1e-05, %v905_v35 }
 0xcbf   :  { %3114 = vrsqrt.f32 %v910_v61  ;;  %vm927_vm1 = vweird.f32 %v910_v61 }
 0xcc0   :  { %3116 = vrcp.f32 %v1245_v62 }
 0xcc5   :  { %v3115_v63 = vpop.eup %3114 }
 0xcc6   :  { %v922_v59 = vmul.f32 %v3115_v63, %v910_v61  ;;  %v1093_v1 = vpop.f32.mrf.mxu1  ;;  %v3117_v16 = vpop.eup %3116  ;;  %vm928_vm15 = vweird.f32 %v3115_v63 }
 0xcc7   :  { %2930 = vmatmul.msk.f32.vlgmr.msrb.gmra.mxu0 %vm162_vm5, %v1093_v1  ;;  %v1247_v5 = vmul.f32 %v3117_v16, %v3109_v43  ;;  %vm929_vm2 = vmor %vm927_vm1, %vm928_vm15 }
 0xcc8   :  { %v923_v2 = vmul.f32 %v3115_v63, %v922_v59 }
 0xcca   :  { %v924_v3 = vmul.f32 0.5, %v923_v2 }
 0xccc   :  { %v925_v4 = vsub.f32 1.5, %v924_v3 }
 0xccd   :  { %v1249_v7 = vpop.permute.xlu0 %1248 }
 0xcce   :  { %v926_v9 = vmul.f32 %v3115_v63, %v925_v4  ;;  %1269 = vmatpush.msrb.mxu1 %v1249_v7  ;;  %v3757_v4 = vld [vmem:[%s4137_s4 + $0x50] sm:$0xff] }
 0xccf   :  { %2933 = vmatmul.msk.f32.vlgmr.msrb.gmra.mxu1 %vm162_vm5, %v1247_v5  ;;  %2936 = vmatmul.msk.f32.vlgmr.msra.gmra.mxu0 %vm162_vm5, %v1299_v39  ;;  %v3762_v5 = vld [vmem:[%s4137_s4 + $0x58] sm:$0xff] }
 0xcd0   :  { %v930_v12 = vsel %vm929_vm2, %v3115_v63, %v926_v9  ;;  %1382 = vmatpush.msra.mxu1 %v3739_v57  ;;  %v3036_v7 = vpack.i.bf16 %v3757_v4, %v3762_v5  ;;  %v3770_v9 = vld [vmem:[%s4137_s4 + $0x40] sm:$0xff] }
 0xcd1   :  { %v932_v13 = vmul.f32 %v930_v12, %v908_v11  ;;  %v3775_v11 = vld [vmem:[%s4137_s4 + $0x48] sm:$0xff] }
 0xcd2   :  { %v1339_v14 = vpop.permute.xlu1 %1338  ;;  %v3041_v12 = vpack.i.bf16 %v3770_v9, %v3775_v11 }
 0xcd3   :  { %1359 = vmatpush.msra.mxu2 %v1339_v14  ;;  %v935_v15 = vadd.f32 %v3576_v22, %v932_v13 }
 0xcd5   :  { %2920 = vmatmul.msk.f32.gmra.mxu3 %vm57_vm0, %v935_v15 }
 0xd39   :  { %v1159_v20 = vpop.f32.mrf.mxu1 }
 0xd3a   :  { %2929 = vmatmul.msk.f32.vlgmr.msra.gmra.mxu3 %vm162_vm5, %v1159_v20 }
 0xd3b   :  { %2940 = vmatpush.xpose.msk.msra.mxu3 %vm162_vm5, %v3693_v18 }
 0xd44   :  { %v1205_v36 = vpop.f32.mrf.mxu0 }
 0xd4c   :  { %v1271_v41 = vpop.f32.mrf.mxu1  ;;  %v1323_v22 = vpop.f32.mrf.mxu0 }
 0xd4d   :  { %v1326_v21 = vsel %vm1031_vm14, %v1323_v22, -1e+09  ;;  %2934 = vmatmul.msk.f32.vlgmr.msrb.gmra.mxu3 %vm162_vm5, %v1271_v41 }
 0xd4e   :  { %v1327_v23 = vsel %vm162_vm5, %v1326_v21, -inf  ;;  %1539 = vmatpush.msrb.mxu3 %v2915_v54 }
 0xd4f   :  { %1328 = vmax.xlane.f32.xlu2 %v1327_v23 }
 0xd58   :  { %v979_v58 = vpop.f32.mrf.mxu3 }
 0xd59   :  { %v3703_v25 = vadd.f32 %v3586_v46, %v979_v58 }
 0xd5b   :  { %1455 = vrot.lane.b32.xlu1 %v3703_v25, %s3244_s29  ;;  %2941 = vmatmul.msk.f32.vlgmr.msra.gmra.mxu3 %vm162_vm5, %v3703_v25 }
 0xd5c   :  { %1651 = vmatpush.msra.mxu3 %v2916_v17 }
 0xd63   :  { %1567 = vrot.lane.b32.xlu1 %v3703_v25, %s3245_s22 }
 0xd67   :  { %1457 = vrot.lane.b32.xlu2 %v3693_v18, %s3244_s29 }
 0xdbd   :  { %v1182_v28 = vpop.f32.mrf.mxu3 }
 0xdbe   :  { %v1206_v31 = vadd.f32 %v1205_v36, %v1182_v28 }
 0xdc2   :  { %v1329_v60 = vpop.xlane.xlu2 %1328 }
 0xdc3   :  { %v1330_v26 = vsub.f32 %v1326_v21, %v1329_v60 }
 0xdc5   :  { %v1331_v27 = vmul.f32 1.442695, %v1330_v26 }
 0xdc7   :  { %3118 = vpow2.f32 %v1331_v27 }
 0xdca   :  { %v1458_v46 = vpop.permute.xlu2 %1457 }
 0xdcb   :  { %2943 = vmatpush.xpose.msk.msrb.mxu2 %vm162_vm5, %v1458_v46 }
 0xdcd   :  { %v3119_v29 = vpop.eup %3118  ;;  %v1456_v48 = vpop.permute.xlu1 %1455 }
 0xdce   :  { %v1333_v30 = vsel %vm162_vm5, %v3119_v29, 0.0 }
 0xdcf   :  { %1334 = vadd.xlane.f32.xlu0 %v1333_v30  ;;  %v1756_v30 = vsel %vm57_vm0, %v3596_v49, 0.0 }
 0xdd0   :  { %v1294_v32 = vpop.f32.mrf.mxu3 }
 0xdd1   :  { %v3715_v33 = vadd.f32 %v1294_v32, %v1206_v31  ;;  %v3798_v31 = vld [vmem:[%s4138_s5 + $0x2] ss:$0 sm:$0xff] }
 0xdd5   :  { %v1568_v0 = vpop.permute.xlu1 %1567 }
 0xdde   :  { %v1414_v37 = vpop.f32.mrf.mxu3 }
 0xddf   :  { %v1417_v38 = vsel %vm1390_vm3, %v1414_v37, -1e+09 }
 0xde0   :  { %v1418_v39 = vsel %vm162_vm5, %v1417_v38, -inf }
 0xde1   :  { %1419 = vmax.xlane.f32.xlu2 %v1418_v39 }
 0xde3   :  { %1569 = vrot.lane.b32.xlu0 %v3693_v18, %s3245_s22 }
 0xdeb   :  { %1429 = vrot.lane.b32.xlu0 %v3693_v18, %s3239_s21 }
 0xe42   :  { %v1335_v40 = vpop.xlane.xlu0 %1334 }
 0xe43   :  { %3120 = vrcp.f32 %v1335_v40 }
 0xe49   :  { %v3121_v43 = vpop.eup %3120 }
 0xe4a   :  { %v1337_v47 = vmul.f32 %v3121_v43, %v3119_v29 }
 0xe4c   :  { %2937 = vmatmul.msk.f32.vlgmr.msra.gmra.mxu2 %vm162_vm5, %v1337_v47 }
 0xe54   :  { %2944 = vmatmul.msk.f32.vlgmr.msrb.gmra.mxu2 %vm162_vm5, %v1456_v48  ;;  %v1420_v51 = vpop.xlane.xlu2 %1419 }
 0xe55   :  { %v1421_v42 = vsub.f32 %v1417_v38, %v1420_v51  ;;  %v1570_v52 = vpop.permute.xlu0 %1569 }
 0xe56   :  { %2948 = vmatpush.xpose.msk.msra.mxu2 %vm162_vm5, %v1570_v52 }
 0xe57   :  { %v1422_v53 = vmul.f32 1.442695, %v1421_v42 }
 0xe59   :  { %3122 = vpow2.f32 %v1422_v53 }
 0xe5c   :  { %2949 = vmatmul.msk.f32.vlgmr.msra.gmra.mxu2 %vm162_vm5, %v1568_v0 }
 0xe5d   :  { %v1430_v54 = vpop.permute.xlu0 %1429 }
 0xe5e   :  { %1450 = vmatpush.msrb.mxu0 %v1430_v54 }
 0xe5f   :  { %v3123_v55 = vpop.eup %3122 }
 0xe60   :  { %1562 = vmatpush.msra.mxu0 %v3664_v24  ;;  %v1424_v56 = vsel %vm162_vm5, %v3123_v55, 0.0 }
 0xe61   :  { %1425 = vadd.xlane.f32.xlu1 %v1424_v56 }
 0xecf   :  { %v1361_v35 = vpop.f32.mrf.mxu2 }
 0xed0   :  { %2938 = vmatmul.msk.f32.vlgmr.msra.gmra.mxu1 %vm162_vm5, %v1361_v35 }
 0xed4   :  { %v1426_v61 = vpop.xlane.xlu1 %1425 }
 0xed5   :  { %3124 = vrcp.f32 %v1426_v61 }
 0xed7   :  { %v1480_v62 = vpop.f32.mrf.mxu2 }
 0xed8   :  { %v1483_v63 = vsel %vm1390_vm3, %v1480_v62, -1e+09 }
 0xed9   :  { %v1484_v24 = vsel %vm162_vm5, %v1483_v63, -inf }
 0xeda   :  { %1485 = vmax.xlane.f32.xlu0 %v1484_v24 }
 0xedb   :  { %v3125_v59 = vpop.eup %3124 }
 0xedc   :  { %v1428_v1 = vmul.f32 %v3125_v59, %v3123_v55 }
 0xede   :  { %2942 = vmatmul.msk.f32.vlgmr.msrb.gmra.mxu0 %vm162_vm5, %v1428_v1 }
 0xedf   :  { %v1592_v2 = vpop.f32.mrf.mxu2 }
 0xee0   :  { %v1595_v16 = vsel %vm1390_vm3, %v1592_v2, -1e+09 }
 0xee1   :  { %v1596_v3 = vsel %vm162_vm5, %v1595_v16, -inf }
 0xee2   :  { %1597 = vmax.xlane.f32.xlu2 %v1596_v3 }
 0xeee   :  { %1659 = vrot.lane.b32.xlu0 %v3693_v18, %s3242_s26 }
 0xef6   :  { %1657 = vrot.lane.b32.xlu0 %v3703_v25, %s3242_s26 }
 0xefe   :  { %3037 = vrot.lane.b32.xlu0 %v3036_v7, %s3239_s21 }
 0xf06   :  { %3042 = vrot.lane.b32.xlu0 %v3041_v12, %s3239_s21 }
 0xf4d   :  { %v1486_v13 = vpop.xlane.xlu0 %1485 }
 0xf4e   :  { %v1487_v14 = vsub.f32 %v1483_v63, %v1486_v13 }
 0xf50   :  { %v1488_v15 = vmul.f32 1.442695, %v1487_v14 }
 0xf52   :  { %3126 = vpow2.f32 %v1488_v15 }
 0xf55   :  { %v1598_v17 = vpop.xlane.xlu2 %1597 }
 0xf56   :  { %v1599_v19 = vsub.f32 %v1595_v16, %v1598_v17 }
 0xf58   :  { %v3127_v20 = vpop.eup %3126  ;;  %v1600_v36 = vmul.f32 1.442695, %v1599_v19  ;;  %v3843_v19 = vld [vmem:[%s4146_s13 + $0x3] ss:$0 sm:$0xff] }
 0xf59   :  { %v1490_v41 = vsel %vm162_vm5, %v3127_v20, 0.0 }
 0xf5a   :  { %3128 = vpow2.f32 %v1600_v36  ;;  %1491 = vadd.xlane.f32.xlu1 %v1490_v41 }
 0xf5b   :  { %v1452_v22 = vpop.f32.mrf.mxu0 }
 0xf5c   :  { %2947 = vmatmul.msk.f32.vlgmr.msra.gmra.mxu0 %vm162_vm5, %v1452_v22 }
 0xf60   :  { %v3129_v21 = vpop.eup %3128  ;;  %v1660_v23 = vpop.permute.xlu0 %1659 }
 0xf61   :  { %2952 = vmatpush.xpose.msk.msrb.mxu0 %vm162_vm5, %v1660_v23  ;;  %v1602_v58 = vsel %vm162_vm5, %v3129_v21, 0.0 }
 0xf62   :  { %1603 = vadd.xlane.f32.xlu2 %v1602_v58 }
 0xf68   :  { %v1658_v25 = vpop.permute.xlu0 %1657 }
 0xf69   :  { %2953 = vmatmul.msk.f32.vlgmr.msrb.gmra.mxu0 %vm162_vm5, %v1658_v25 }
 0xf70   :  { %v3038_v60 = vpop.permute.xlu0 %3037 }
 0xf71   :  { %v3040_v26 = vunpack.i.h.bf16 %v3038_v60  ;;  %v3039_v27 = vunpack.i.l.bf16 %v3038_v60 }
 0xf73   :  { %1495 = vrot.lane.b32.xlu1 %v3693_v18, %s3237_s19  ;;  %1889 = vmatpush.msra.mxu0 %v3039_v27 }
 0xf75   :  { %1890 = vmatpush.msra.mxu0 %v3040_v26 }
 0xf78   :  { %v3043_v28 = vpop.permute.xlu0 %3042 }
 0xf79   :  { %v3045_v46 = vunpack.i.h.bf16 %v3043_v28  ;;  %v3044_v29 = vunpack.i.l.bf16 %v3043_v28 }
 0xf7a   :  { %1607 = vrot.lane.b32.xlu2 %v3693_v18, %s3240_s24 }
 0xf7b   :  { %1891 = vmatpush.msra.mxu0 %v3044_v29  ;;  %v1759_v29 = vsel %vm57_vm0, %v3603_v50, 0.0 }
 0xf7d   :  { %1892 = vmatpush.msra.mxu0 %v3045_v46 }
 0xf7e   :  { %2968 = vmatmul.msk.f32.vlgmr.msra.gmra.mxu0 %vm57_vm0, %v3534_v44 }
 0xf86   :  { %2969 = vmatmul.msk.f32.gmra.mxu0 %vm57_vm0, %v3644_v10 }
 0xf9d   :  { %1757 = vadd.xlane.f32.xlu1 %v1756_v30 }
 0xfb6   :  { %1868 = vrot.lane.b32.xlu1 %v3798_v31, %s3239_s21 }
 0xfcd   :  { %v1492_v32 = vpop.xlane.xlu1 %1491 }
 0xfce   :  { %3130 = vrcp.f32 %v1492_v32 }
 0xfd4   :  { %v3131_v39 = vpop.eup %3130 }
 0xfd5   :  { %v1604_v37 = vpop.xlane.xlu2 %1603  ;;  %v1494_v40 = vmul.f32 %v3131_v39, %v3127_v20 }
 0xfd6   :  { %3132 = vrcp.f32 %v1604_v37 }
 0xfd9   :  { %v3802_v38 = vpop.f32.mrf.mxu0 }
 0xfdc   :  { %v3133_v52 = vpop.eup %3132 }
 0xfdd   :  { %v1608_v48 = vpop.permute.xlu2 %1607  ;;  %v1606_v53 = vmul.f32 %v3133_v52, %v3129_v21 }
 0xfe5   :  { %v1496_v43 = vpop.permute.xlu1 %1495 }
 0xfe6   :  { %1516 = vmatpush.msrb.mxu1 %v1496_v43  ;;  %v1682_v47 = vpop.f32.mrf.mxu0 }
 0xfe7   :  { %v1685_v51 = vsel %vm1390_vm3, %v1682_v47, -1e+09  ;;  %2945 = vmatmul.msk.f32.vlgmr.msrb.gmra.mxu1 %vm162_vm5, %v1494_v40 }
 0xfe8   :  { %1628 = vmatpush.msra.mxu1 %v1608_v48  ;;  %v1686_v42 = vsel %vm162_vm5, %v1685_v51, -inf }
 0xfe9   :  { %1687 = vmax.xlane.f32.xlu0 %v1686_v42 }
 0xfea   :  { %1741 = vmatpush.msrb.mxu1 %v3739_v57  ;;  %v3822_v57 = vpop.f32.mrf.mxu1 }
 0xfef   :  { %2950 = vmatmul.msk.f32.vlgmr.msra.gmra.mxu1 %vm162_vm5, %v1606_v53 }
 0xffb   :  { %v1894_v35 = vpop.f32.mrf.mxu0 }
0x1010   :  { %v1758_v0 = vpop.xlane.xlu1 %1757 }
0x1011   :  { %v1762_v54 = vmul.f32 %v1758_v0, %v3339_v8 }
0x1013   :  { %v1764_v55 = vsub.f32 %v3596_v49, %v1762_v54 }
0x1015   :  { %v1766_v56 = vmul.f32 %v1764_v55, %v1764_v55 }
0x1017   :  { %v1768_v34 = vsel %vm57_vm0, %v1766_v56, 0.0 }
0x1018   :  { %1769 = vadd.xlane.f32.xlu2 %v1768_v34 }
0x1028   :  { %v3813_v61 = vpop.permute.xlu1 %1868 }
0x1029   :  { %v3816_v62 = vadd.f32 %v1894_v35, %v3813_v61 }
0x102b   :  { %1966 = vrot.lane.b32.xlu0 %v3816_v62, %s3244_s29 }
0x1030   :  { %1697 = vrot.lane.b32.xlu2 %v3693_v18, %s3241_s25 }
0x105c   :  { %v1688_v63 = vpop.xlane.xlu0 %1687 }
0x105d   :  { %v1689_v49 = vsub.f32 %v1685_v51, %v1688_v63 }
0x105f   :  { %v1690_v24 = vmul.f32 1.442695, %v1689_v49 }
0x1061   :  { %3134 = vpow2.f32 %v1690_v24 }
0x1064   :  { %v1518_v59 = vpop.f32.mrf.mxu1 }
0x1065   :  { %2946 = vmatmul.msk.f32.vlgmr.msrb.gmra.mxu3 %vm162_vm5, %v1518_v59  ;;  %v3889_v59 = vld [vmem:[%s4139_s6 + $0x40] sm:$0xff] }
0x1066   :  { %1841 = vmatpush.msrb.mxu3 %v3762_v5  ;;  %2071 = vmatpush.msrb.mxu0 %v3889_v59 }
0x1067   :  { %v3135_v1 = vpop.eup %3134 }
0x1068   :  { %v1692_v2 = vsel %vm162_vm5, %v3135_v1, 0.0  ;;  %1842 = vmatpush.msrb.mxu3 %v3757_v4 }
0x1069   :  { %1693 = vadd.xlane.f32.xlu2 %v1692_v2 }
0x106a   :  { %1843 = vmatpush.msrb.mxu3 %v3775_v11 }
0x106c   :  { %v1630_v18 = vpop.f32.mrf.mxu1  ;;  %1844 = vmatpush.msrb.mxu3 %v3770_v9  ;;  %v3837_v9 = vld [vmem:[%s4145_s12 + $0x3] ss:$0 sm:$0xff] }
0x106d   :  { %2951 = vmatmul.msk.f32.vlgmr.msra.gmra.mxu3 %vm162_vm5, %v1630_v18  ;;  %v1777_v17 = vmul.f32 %v3837_v9, %v1764_v55 }
0x108b   :  { %v1770_v16 = vpop.xlane.xlu2 %1769 }
0x108c   :  { %v1774_v3 = vmul.f32 %v1770_v16, %v3339_v8 }
0x108e   :  { %v1779_v7 = vadd.f32 1e-05, %v1774_v3 }
0x1090   :  { %3136 = vrsqrt.f32 %v1779_v7  ;;  %vm1787_vm7 = vweird.f32 %v1779_v7 }
0x1093   :  { %v1698_v12 = vpop.permute.xlu2 %1697 }
0x1094   :  { %1718 = vmatpush.msrb.mxu2 %v1698_v12 }
0x1096   :  { %2970 = vmatpush.xpose.msk.msra.mxu2 %vm162_vm5, %v3816_v62  ;;  %v3137_v5 = vpop.eup %3136 }
0x1097   :  { %v1782_v4 = vmul.f32 %v3137_v5, %v1779_v7  ;;  %vm1788_vm4 = vweird.f32 %v3137_v5 }
0x1098   :  { %vm1789_vm8 = vmor %vm1787_vm7, %vm1788_vm4 }
0x1099   :  { %v1783_v13 = vmul.f32 %v3137_v5, %v1782_v4 }
0x109b   :  { %v1784_v14 = vmul.f32 0.5, %v1783_v13 }
0x109d   :  { %v1785_v11 = vsub.f32 1.5, %v1784_v14  ;;  %v1967_v58 = vpop.permute.xlu0 %1966 }
0x109f   :  { %v1786_v15 = vmul.f32 %v3137_v5, %v1785_v11 }
0x10a1   :  { %v1790_v20 = vsel %vm1789_vm8, %v3137_v5, %v1786_v15 }
0x10a2   :  { %v1801_v36 = vmul.f32 %v1790_v20, %v1777_v17 }
0x10a4   :  { %v1804_v41 = vadd.f32 %v3843_v19, %v1801_v36 }
0x10a6   :  { %2966 = vmatmul.msk.f32.vlgmr.msrb.gmra.mxu3 %vm57_vm0, %v1804_v41 }
0x10dc   :  { %v1694_v22 = vpop.xlane.xlu2 %1693 }
0x10dd   :  { %3138 = vrcp.f32 %v1694_v22 }
0x10e3   :  { %v3139_v21 = vpop.eup %3138 }
0x10e4   :  { %v1696_v23 = vmul.f32 %v3139_v21, %v3135_v1 }
0x10e6   :  { %2954 = vmatmul.msk.f32.vlgmr.msrb.gmra.mxu2 %vm162_vm5, %v1696_v23 }
0x10e7   :  { %2973 = vmatpush.xpose.msk.msrb.mxu2 %vm162_vm5, %v1967_v58 }
0x10e8   :  { %v1541_v25 = vpop.f32.mrf.mxu3 }
0x10e9   :  { %v1565_v60 = vadd.f32 %v3802_v38, %v1541_v25 }
0x10f0   :  { %v1653_v26 = vpop.f32.mrf.mxu3 }
0x10f1   :  { %v3850_v27 = vadd.f32 %v1653_v26, %v1565_v60 }
0x1129   :  { %v1846_v28 = vpop.f32.mrf.mxu3 }
0x112a   :  { %v3853_v46 = vadd.f32 %v3798_v31, %v1846_v28 }
0x112c   :  { %2076 = vrot.lane.b32.xlu2 %v3853_v46, %s3245_s22  ;;  %1964 = vrot.lane.b32.xlu1 %v3853_v46, %s3244_s29 }
0x112d   :  { %2971 = vmatmul.msk.f32.vlgmr.msra.gmra.mxu2 %vm162_vm5, %v3853_v46 }
0x1134   :  { %2078 = vrot.lane.b32.xlu1 %v3816_v62, %s3245_s22 }
0x1155   :  { %1760 = vadd.xlane.f32.xlu2 %v1759_v29 }
0x1169   :  { %v1720_v30 = vpop.f32.mrf.mxu2 }
0x116a   :  { %2955 = vmatmul.msk.f32.vlgmr.msrb.gmra.mxu1 %vm162_vm5, %v1720_v30  ;;  %v1897_v30 = vpop.f32.mrf.mxu0 }
0x1186   :  { %v2077_v38 = vpop.permute.xlu2 %2076 }
0x119e   :  { %v1965_v32 = vpop.permute.xlu1 %1964 }
0x119f   :  { %2974 = vmatmul.msk.f32.vlgmr.msrb.gmra.mxu2 %vm162_vm5, %v1965_v32  ;;  %v3907_v32 = vadd.f32 %v1897_v30, %v3813_v61 }
0x11a6   :  { %v2079_v37 = vpop.permute.xlu1 %2078 }
0x11a7   :  { %2978 = vmatpush.xpose.msk.msra.mxu2 %vm162_vm5, %v2079_v37 }
0x11aa   :  { %2979 = vmatmul.msk.f32.vlgmr.msra.gmra.mxu2 %vm162_vm5, %v2077_v38  ;;  %v2962_v38 = vld [vmem:[%s4139_s6 + $0x48] sm:$0xff] }
0x11ab   :  { %2048 = vmatpush.msra.mxu3 %v2962_v38 }
0x11b0   :  { %v1923_v39 = vpop.f32.mrf.mxu2 }
0x11b1   :  { %v1926_v40 = vsel %vm158_vm6, %v1923_v39, -1e+09 }
0x11b2   :  { %v1927_v43 = vsel %vm162_vm5, %v1926_v40, -inf }
0x11b3   :  { %1928 = vmax.xlane.f32.xlu1 %v1927_v43 }
0x11c8   :  { %v1761_v47 = vpop.xlane.xlu2 %1760 }
0x11c9   :  { %v1763_v48 = vmul.f32 %v1761_v47, %v3339_v8 }
0x11cb   :  { %v1765_v51 = vsub.f32 %v3603_v50, %v1763_v48 }
0x11cd   :  { %v1767_v42 = vmul.f32 %v1765_v51, %v1765_v51  ;;  %v1778_v11 = vmul.f32 %v3837_v9, %v1765_v51 }
0x11cf   :  { %v1771_v52 = vsel %vm57_vm0, %v1767_v42, 0.0 }
0x11d0   :  { %1772 = vadd.xlane.f32.xlu1 %v1771_v52 }
0x11e9   :  { %1938 = vrot.lane.b32.xlu1 %v3816_v62, %s3239_s21 }
0x11f1   :  { %2168 = vrot.lane.b32.xlu1 %v3816_v62, %s3242_s26 }
0x1222   :  { %v1989_v53 = vpop.f32.mrf.mxu2 }
0x1223   :  { %v1992_v0 = vsel %vm158_vm6, %v1989_v53, -1e+09 }
0x1224   :  { %v1993_v54 = vsel %vm162_vm5, %v1992_v0, -inf }
0x1225   :  { %1994 = vmax.xlane.f32.xlu0 %v1993_v54 }
0x1226   :  { %v1929_v55 = vpop.xlane.xlu1 %1928 }
0x1227   :  { %v1930_v56 = vsub.f32 %v1926_v40, %v1929_v55 }
0x1229   :  { %v1931_v50 = vmul.f32 1.442695, %v1930_v56 }
0x122b   :  { %3140 = vpow2.f32 %v1931_v50 }
0x122d   :  { %v2101_v34 = vpop.f32.mrf.mxu2 }
0x122e   :  { %v2104_v35 = vsel %vm158_vm6, %v2101_v34, -1e+09 }
0x122f   :  { %v2105_v63 = vsel %vm162_vm5, %v2104_v35, -inf }
0x1230   :  { %2106 = vmax.xlane.f32.xlu2 %v2105_v63 }
0x1231   :  { %v3141_v49 = vpop.eup %3140 }
0x1232   :  { %v1933_v24 = vsel %vm162_vm5, %v3141_v49, 0.0 }
0x1233   :  { %1934 = vadd.xlane.f32.xlu0 %v1933_v24 }
0x1243   :  { %v1773_v1 = vpop.xlane.xlu1 %1772 }
0x1244   :  { %v1775_v2 = vmul.f32 %v1773_v1, %v3339_v8 }
0x1246   :  { %v1780_v18 = vadd.f32 1e-05, %v1775_v2 }
0x1248   :  { %3142 = vrsqrt.f32 %v1780_v18  ;;  %vm1797_vm9 = vweird.f32 %v1780_v18 }
0x124e   :  { %v3143_v3 = vpop.eup %3142 }
0x124f   :  { %v1792_v12 = vmul.f32 %v3143_v3, %v1780_v18  ;;  %vm1798_vm11 = vweird.f32 %v3143_v3 }
0x1250   :  { %vm1799_vm12 = vmor %vm1797_vm9, %vm1798_vm11  ;;  %vm2788_vm9 = vcmask 523264  }
0x1251   :  { %v1793_v5 = vmul.f32 %v3143_v3, %v1792_v12 }
0x1253   :  { %v1794_v4 = vmul.f32 0.5, %v1793_v5 }
0x1255   :  { %v1795_v13 = vsub.f32 1.5, %v1794_v4 }
0x1257   :  { %v1796_v14 = vmul.f32 %v3143_v3, %v1795_v13 }
0x1259   :  { %v1800_v15 = vsel %vm1799_vm12, %v3143_v3, %v1796_v14 }
0x125a   :  { %v1802_v17 = vmul.f32 %v1800_v15, %v1778_v11 }
0x125b   :  { %v1939_v16 = vpop.permute.xlu1 %1938 }
0x125c   :  { %1959 = vmatpush.msra.mxu1 %v1939_v16  ;;  %v1805_v20 = vadd.f32 %v3843_v19, %v1802_v17 }
0x125e   :  { %2967 = vmatmul.msk.f32.gmra.mxu3 %vm57_vm0, %v1805_v20 }
0x1263   :  { %v2169_v7 = vpop.permute.xlu1 %2168 }
0x1264   :  { %2982 = vmatpush.xpose.msk.msra.mxu0 %vm162_vm5, %v2169_v7 }
0x1298   :  { %v1995_v36 = vpop.xlane.xlu0 %1994 }
0x1299   :  { %v1996_v41 = vsub.f32 %v1992_v0, %v1995_v36  ;;  %v2963_v0 = vld [vmem:[%s4139_s6 + $0x50] sm:$0xff] }
0x129a   :  { %2160 = vmatpush.msrb.mxu3 %v2963_v0 }
0x129b   :  { %v1997_v22 = vmul.f32 1.442695, %v1996_v41 }
0x129d   :  { %3144 = vpow2.f32 %v1997_v22 }
0x12a3   :  { %v3145_v21 = vpop.eup %3144  ;;  %v2107_v23 = vpop.xlane.xlu2 %2106 }
0x12a4   :  { %v2108_v58 = vsub.f32 %v2104_v35, %v2107_v23  ;;  %v1999_v25 = vsel %vm162_vm5, %v3145_v21, 0.0 }
0x12a5   :  { %2000 = vadd.xlane.f32.xlu2 %v1999_v25 }
0x12a6   :  { %v2109_v60 = vmul.f32 1.442695, %v2108_v58  ;;  %v1935_v26 = vpop.xlane.xlu0 %1934 }
0x12a7   :  { %3146 = vrcp.f32 %v1935_v26 }
0x12a8   :  { %3148 = vpow2.f32 %v2109_v60 }
0x12ad   :  { %v3147_v9 = vpop.eup %3146 }
0x12ae   :  { %v3149_v28 = vpop.eup %3148  ;;  %v1937_v29 = vmul.f32 %v3147_v9, %v3141_v49  ;;  %v3961_v9 = vld [vmem:[%s4139_s6 + $0x58] sm:$0xff] }
0x12af   :  { %v2111_v19 = vsel %vm162_vm5, %v3149_v28, 0.0 }
0x12b0   :  { %2972 = vmatmul.msk.f32.vlgmr.msra.gmra.mxu1 %vm162_vm5, %v1937_v29  ;;  %2112 = vadd.xlane.f32.xlu0 %v2111_v19 }
0x12bd   :  { %2004 = vrot.lane.b32.xlu2 %v3816_v62, %s3237_s19 }
0x12c4   :  { %2116 = vrot.lane.b32.xlu0 %v3816_v62, %s3240_s24 }
0x12c5   :  { %2166 = vrot.lane.b32.xlu2 %v3853_v46, %s3242_s26  ;;  %v3915_v46 = vpop.f32.mrf.mxu1 }
0x12cd   :  { %2294 = vrot.lane.b32.xlu2 %v3907_v32, %s3239_s21  ;;  %s2844_s21 = sshll.u32 %s4147_s14, 4  ;;  %s2845_s21 = int_to_ptr.hbm [resolvable:$true] %s2844_s21 }
0x12e1   :  { %v1849_v63 = vpop.f32.mrf.mxu3 }
0x12e2   :  { %v1850_v49 = vadd.f32 %v3798_v31, %v1849_v63  ;;  %v3053_v63 = vld [vmem:[%s4140_s7 + $0x1] ss:$0 sm:$0xff] }
0x1318   :  { %v2001_v37 = vpop.xlane.xlu2 %2000 }
0x1319   :  { %3150 = vrcp.f32 %v2001_v37 }
0x131f   :  { %v3151_v39 = vpop.eup %3150 }
0x1320   :  { %v2003_v40 = vmul.f32 %v3151_v39, %v3145_v21  ;;  %v2005_v43 = vpop.permute.xlu2 %2004 }
0x1321   :  { %2025 = vmatpush.msrb.mxu1 %v2005_v43 }
0x1322   :  { %2975 = vmatmul.msk.f32.vlgmr.msrb.gmra.mxu1 %vm162_vm5, %v2003_v40 }
0x1323   :  { %v2113_v47 = vpop.xlane.xlu0 %2112 }
0x1324   :  { %3152 = vrcp.f32 %v2113_v47 }
0x1328   :  { %v2167_v61 = vpop.permute.xlu2 %2166 }
0x132a   :  { %v3153_v42 = vpop.eup %3152 }
0x132b   :  { %v2115_v52 = vmul.f32 %v3153_v42, %v3149_v28 }
0x132d   :  { %v1961_v48 = vpop.f32.mrf.mxu1 }
0x132e   :  { %2977 = vmatmul.msk.f32.vlgmr.msrb.gmra.mxu0 %vm162_vm5, %v1961_v48 }
0x1330   :  { %v2295_v51 = vpop.permute.xlu2 %2294 }
0x1331   :  { %2315 = vmatpush.msrb.mxu0 %v2295_v51 }
0x1336   :  { %2983 = vmatmul.msk.f32.vlgmr.msra.gmra.mxu0 %vm162_vm5, %v2167_v61  ;;  %v2117_v53 = vpop.permute.xlu0 %2116 }
0x1337   :  { %2137 = vmatpush.msra.mxu1 %v2117_v53  ;;  %2427 = vmatpush.msra.mxu0 %v3889_v59 }
0x1338   :  { %2980 = vmatmul.msk.f32.vlgmr.msra.gmra.mxu1 %vm162_vm5, %v2115_v52 }
0x1339   :  { %2250 = vmatpush.msrb.mxu1 %v3961_v9 }
0x139f   :  { %v2027_v54 = vpop.f32.mrf.mxu1 }
0x13a0   :  { %2976 = vmatmul.msk.f32.vlgmr.msra.gmra.mxu3 %vm162_vm5, %v2027_v54 }
0x13a1   :  { %2986 = vmatpush.xpose.msk.msra.mxu3 %vm162_vm5, %v3907_v32 }
0x13ab   :  { %v2073_v55 = vpop.f32.mrf.mxu0 }
0x13b3   :  { %v2191_v56 = vpop.f32.mrf.mxu0 }
0x13b4   :  { %v2194_v50 = vsel %vm158_vm6, %v2191_v56, -1e+09 }
0x13b5   :  { %v2139_v34 = vpop.f32.mrf.mxu1  ;;  %v2195_v35 = vsel %vm162_vm5, %v2194_v50, -inf }
0x13b6   :  { %2196 = vmax.xlane.f32.xlu2 %v2195_v35  ;;  %2981 = vmatmul.msk.f32.vlgmr.msrb.gmra.mxu3 %vm162_vm5, %v2139_v34  ;;  %v1387_v35 = vadd.f32 %v3822_v57, %v3715_v33 }
0x13b7   :  { %2404 = vmatpush.msrb.mxu3 %v2962_v38 }
0x13be   :  { %2987 = vmatmul.msk.f32.vlgmr.msra.gmra.mxu3 %vm162_vm5, %v1850_v49 }
0x13bf   :  { %2516 = vmatpush.msra.mxu3 %v2963_v0 }
0x13ce   :  { %2320 = vrot.lane.b32.xlu2 %v1850_v49, %s3244_s29 }
0x1423   :  { %v2050_v24 = vpop.f32.mrf.mxu3 }
0x1424   :  { %v2074_v1 = vadd.f32 %v2073_v55, %v2050_v24 }
0x1429   :  { %v2197_v59 = vpop.xlane.xlu2 %2196 }
0x142a   :  { %v2198_v2 = vsub.f32 %v2194_v50, %v2197_v59 }
0x142c   :  { %v2199_v16 = vmul.f32 1.442695, %v2198_v2 }
0x142e   :  { %3154 = vpow2.f32 %v2199_v16 }
0x1431   :  { %v2321_v25 = vpop.permute.xlu2 %2320 }
0x1434   :  { %v3155_v12 = vpop.eup %3154 }
0x1435   :  { %v2201_v5 = vsel %vm162_vm5, %v3155_v12, 0.0 }
0x1439   :  { %v2162_v45 = vpop.f32.mrf.mxu3 }
0x143a   :  { %v3934_v18 = vadd.f32 %v2162_v45, %v2074_v1  ;;  %v1746_v1 = vadd.f32 %v3915_v46, %v3850_v27 }
0x143c   :  { %v1751_v45 = vadd.f32 %v3053_v63, %v1746_v1 }
0x143e   :  { %v3997_v33 = vadd.f32 %v1751_v45, %v3644_v10 }
0x1440   :  { %v2624_v57 = vsel %vm57_vm0, %v3997_v33, 0.0 }
0x1441   :  { %v2279_v3 = vpop.f32.mrf.mxu3 }
0x1442   :  { %v2282_v7 = vsel %vm519_vm10, %v2279_v3, -1e+09 }
0x1443   :  { %v2283_v31 = vsel %vm162_vm5, %v2282_v7, -inf }
0x1444   :  { %2284 = vmax.xlane.f32.xlu0 %v2283_v31 }
0x144c   :  { %2202 = vadd.xlane.f32.xlu0 %v2201_v5 }
0x1460   :  { %2322 = vrot.lane.b32.xlu0 %v3907_v32, %s3244_s29 }
0x1468   :  { %2432 = vrot.lane.b32.xlu0 %v1850_v49, %s3245_s22 }
0x1470   :  { %2522 = vrot.lane.b32.xlu0 %v1850_v49, %s3242_s26  ;;  %v1750_v49 = vadd.f32 %v3053_v63, %v1387_v35  ;;  %v2725_v63 = vld [vmem:[%s4141_s8 + $0x10] sm:$0xff] }
0x1472   :  { %v3988_v24 = vadd.f32 %v1750_v49, %v3534_v44 }
0x1474   :  { %v2621_v59 = vsel %vm57_vm0, %v3988_v24, 0.0 }
0x14b7   :  { %v2285_v4 = vpop.xlane.xlu0 %2284 }
0x14b8   :  { %v2286_v13 = vsub.f32 %v2282_v7, %v2285_v4 }
0x14ba   :  { %v2287_v14 = vmul.f32 1.442695, %v2286_v13 }
0x14bc   :  { %3156 = vpow2.f32 %v2287_v14 }
0x14bf   :  { %v2203_v41 = vpop.xlane.xlu0 %2202 }
0x14c2   :  { %v3157_v11 = vpop.eup %3156 }
0x14c3   :  { %v2289_v15 = vsel %vm162_vm5, %v3157_v11, 0.0 }
0x14c4   :  { %2290 = vadd.xlane.f32.xlu1 %v2289_v15  ;;  %v3057_v15 = vld [vmem:[%s4140_s7 + $0x2] ss:$0 sm:$0xff] }
0x14d2   :  { %v2323_v58 = vpop.permute.xlu0 %2322 }
0x14da   :  { %v2433_v26 = vpop.permute.xlu0 %2432 }
0x14dd   :  { %2206 = vrot.lane.b32.xlu1 %v3816_v62, %s3241_s25 }
0x14e2   :  { %v2523_v29 = vpop.permute.xlu0 %2522 }
0x14e5   :  { %2434 = vrot.lane.b32.xlu1 %v3907_v32, %s3245_s22  ;;  %s2857_s22 = sshll.u32 %s4148_s15, 4  ;;  %s2858_s22 = int_to_ptr.hbm [resolvable:$true] %s2857_s22 }
0x14ed   :  { %2524 = vrot.lane.b32.xlu1 %v3907_v32, %s3242_s26  ;;  %s3251_s26 = smov [#allocation4]  }
0x14ee   :  { %s2855_s14 = sshll.u32 %s3251_s26, 4  ;;  %s2856_s14 = int_to_ptr.vmem [resolvable:$true] %s2855_s14 }
0x1537   :  { %v2291_v17 = vpop.xlane.xlu1 %2290 }
0x1538   :  { %3158 = vrcp.f32 %v2291_v17 }
0x1539   :  { %3160 = vrcp.f32 %v2203_v41 }
0x153e   :  { %v3159_v20 = vpop.eup %3158 }
0x153f   :  { %v2293_v36 = vmul.f32 %v3159_v20, %v3157_v11  ;;  %v3161_v22 = vpop.eup %3160 }
0x1540   :  { %v2205_v21 = vmul.f32 %v3161_v22, %v3155_v12 }
0x1541   :  { %2988 = vmatmul.msk.f32.vlgmr.msrb.gmra.mxu0 %vm162_vm5, %v2293_v36 }
0x154f   :  { %v2207_v23 = vpop.permute.xlu1 %2206 }
0x1550   :  { %2227 = vmatpush.msrb.mxu2 %v2207_v23 }
0x1551   :  { %2984 = vmatmul.msk.f32.vlgmr.msrb.gmra.mxu2 %vm162_vm5, %v2205_v21 }
0x1552   :  { %2989 = vmatpush.xpose.msk.msra.mxu2 %vm162_vm5, %v2323_v58 }
0x1557   :  { %v2435_v62 = vpop.permute.xlu1 %2434 }
0x1558   :  { %2994 = vmatpush.xpose.msk.msrb.mxu2 %vm162_vm5, %v2435_v62 }
0x1559   :  { %2990 = vmatmul.msk.f32.vlgmr.msra.gmra.mxu2 %vm162_vm5, %v2321_v25 }
0x155f   :  { %v2525_v60 = vpop.permute.xlu1 %2524 }
0x1560   :  { %2998 = vmatpush.xpose.msk.msrb.mxu0 %vm162_vm5, %v2525_v60 }
0x1561   :  { %2995 = vmatmul.msk.f32.vlgmr.msrb.gmra.mxu2 %vm162_vm5, %v2433_v26 }
0x15be   :  { %v2317_v28 = vpop.f32.mrf.mxu0 }
0x15bf   :  { %2993 = vmatmul.msk.f32.vlgmr.msra.gmra.mxu0 %vm162_vm5, %v2317_v28 }
0x15c7   :  { %2999 = vmatmul.msk.f32.vlgmr.msrb.gmra.mxu0 %vm162_vm5, %v2523_v29 }
0x15d4   :  { %v2229_v19 = vpop.f32.mrf.mxu2 }
0x15d5   :  { %2985 = vmatmul.msk.f32.vlgmr.msrb.gmra.mxu1 %vm162_vm5, %v2229_v19 }
0x15dc   :  { %v2345_v30 = vpop.f32.mrf.mxu2 }
0x15dd   :  { %v2348_v37 = vsel %vm519_vm10, %v2345_v30, -1e+09 }
0x15de   :  { %v2349_v38 = vsel %vm162_vm5, %v2348_v37, -inf }
0x15df   :  { %2350 = vmax.xlane.f32.xlu2 %v2349_v38 }
0x15e4   :  { %v2457_v39 = vpop.f32.mrf.mxu2 }
0x15e5   :  { %v2460_v40 = vsel %vm519_vm10, %v2457_v39, -1e+09 }
0x15e6   :  { %v2461_v43 = vsel %vm162_vm5, %v2460_v40, -inf }
0x15e7   :  { %2462 = vmax.xlane.f32.xlu1 %v2461_v43 }
0x163c   :  { %v3973_v61 = vpop.f32.mrf.mxu0 }
0x1644   :  { %v2547_v47 = vpop.f32.mrf.mxu0 }
0x1645   :  { %v2550_v48 = vsel %vm519_vm10, %v2547_v47, -1e+09 }
0x1646   :  { %v2551_v51 = vsel %vm162_vm5, %v2550_v48, -inf }
0x1647   :  { %2552 = vmax.xlane.f32.xlu0 %v2551_v51 }
0x1652   :  { %v2351_v42 = vpop.xlane.xlu2 %2350  ;;  %v2252_v14 = vpop.f32.mrf.mxu1 }
0x1653   :  { %v2352_v52 = vsub.f32 %v2348_v37, %v2351_v42  ;;  %v2255_v11 = vadd.f32 %v2252_v14, %v3934_v18 }
0x1655   :  { %v2353_v53 = vmul.f32 1.442695, %v2352_v52  ;;  %v2615_v17 = vadd.f32 %v3057_v15, %v2255_v11 }
0x1657   :  { %3162 = vpow2.f32 %v2353_v53 }
0x165a   :  { %v2463_v0 = vpop.xlane.xlu1 %2462 }
0x165b   :  { %v2464_v54 = vsub.f32 %v2460_v40, %v2463_v0  ;;  %2360 = vrot.lane.b32.xlu0 %v3907_v32, %s3237_s19  ;;  %v3183_v0 = vld [vmem:[%s4134_s1 + $0x8] sm:$0xff] }
0x165d   :  { %v3163_v55 = vpop.eup %3162  ;;  %v2465_v56 = vmul.f32 1.442695, %v2464_v54 }
0x165e   :  { %v2355_v50 = vsel %vm162_vm5, %v3163_v55, 0.0 }
0x165f   :  { %3164 = vpow2.f32 %v2465_v56  ;;  %2356 = vadd.xlane.f32.xlu2 %v2355_v50 }
0x1665   :  { %v3165_v6 = vpop.eup %3164 }
0x1666   :  { %v2467_v34 = vsel %vm162_vm5, %v3165_v6, 0.0 }
0x1667   :  { %2468 = vadd.xlane.f32.xlu1 %v2467_v34  ;;  %v2726_v34 = vld [vmem:[%s4141_s8 + $0x18] sm:$0xff] }
0x1680   :  { %2472 = vrot.lane.b32.xlu1 %v3907_v32, %s3240_s24 }
0x1685   :  { %2622 = vadd.xlane.f32.xlu0 %v2621_v59  ;;  %v2724_v59 = vld [vmem:[%s4141_s8 + $0x8] sm:$0xff] }
0x16aa   :  { %2625 = vadd.xlane.f32.xlu1 %v2624_v57 }
0x16ba   :  { %v2553_v44 = vpop.xlane.xlu0 %2552 }
0x16bb   :  { %v2554_v2 = vsub.f32 %v2550_v48, %v2553_v44  ;;  %v2723_v44 = vld [vmem:[%s4141_s8] sm:$0xff] }
0x16bd   :  { %v2555_v16 = vmul.f32 1.442695, %v2554_v2 }
0x16bf   :  { %3166 = vpow2.f32 %v2555_v16 }
0x16c5   :  { %v3167_v3 = vpop.eup %3166 }
0x16c6   :  { %v2557_v7 = vsel %vm162_vm5, %v3167_v3, 0.0 }
0x16c7   :  { %2558 = vadd.xlane.f32.xlu2 %v2557_v7 }
0x16cd   :  { %v2361_v31 = vpop.permute.xlu0 %2360 }
0x16ce   :  { %2381 = vmatpush.msra.mxu1 %v2361_v31 }
0x16d2   :  { %v2357_v12 = vpop.xlane.xlu2 %2356 }
0x16d3   :  { %3168 = vrcp.f32 %v2357_v12 }
0x16d9   :  { %v3169_v27 = vpop.eup %3168 }
0x16da   :  { %v2359_v46 = vmul.f32 %v3169_v27, %v3163_v55  ;;  %v2469_v10 = vpop.xlane.xlu1 %2468 }
0x16db   :  { %3170 = vrcp.f32 %v2469_v10 }
0x16dc   :  { %2991 = vmatmul.msk.f32.vlgmr.msra.gmra.mxu1 %vm162_vm5, %v2359_v46 }
0x16df   :  { %2562 = vrot.lane.b32.xlu2 %v3907_v32, %s3241_s25  ;;  %v3182_v32 = vld [vmem:[%s4134_s1] sm:$0xff] }
0x16e0   :  { %v4014_v20 = vadd.f32 %v3182_v32, %v2615_v17 }
0x16e1   :  { %v3171_v5 = vpop.eup %3170 }
0x16e2   :  { %v2471_v4 = vmul.f32 %v3171_v5, %v3165_v6  ;;  %v2673_v36 = vsel %vm57_vm0, %v4014_v20, 0.0 }
0x16f2   :  { %v2473_v13 = vpop.permute.xlu1 %2472 }
0x16f3   :  { %2493 = vmatpush.msrb.mxu1 %v2473_v13 }
0x16f4   :  { %2996 = vmatmul.msk.f32.vlgmr.msrb.gmra.mxu1 %vm162_vm5, %v2471_v4 }
0x16f5   :  { %2606 = vmatpush.msra.mxu1 %v3961_v9 }
0x16f8   :  { %v2623_v48 = vpop.xlane.xlu0 %2622 }
0x16f9   :  { %v2627_v52 = vmul.f32 %v2623_v48, %v3339_v8 }
0x16fb   :  { %v2629_v55 = vsub.f32 %v3988_v24, %v2627_v52 }
0x1708   :  { %2674 = vadd.xlane.f32.xlu2 %v2673_v36 }
0x171d   :  { %v2626_v41 = vpop.xlane.xlu1 %2625 }
0x171e   :  { %v2628_v22 = vmul.f32 %v2626_v41, %v3339_v8  ;;  %v3058_v41 = vld [vmem:[%s4145_s12 + $0x1] ss:$0 sm:$0xff] }
0x1720   :  { %v4020_v18 = vsub.f32 %v3997_v33, %v2628_v22 }
0x1722   :  { %v2632_v21 = vmul.f32 %v4020_v18, %v4020_v18 }
0x1724   :  { %v2636_v23 = vsel %vm57_vm0, %v2632_v21, 0.0 }
0x1725   :  { %2637 = vadd.xlane.f32.xlu1 %v2636_v23 }
0x173a   :  { %v2559_v58 = vpop.xlane.xlu2 %2558 }
0x173b   :  { %3172 = vrcp.f32 %v2559_v58 }
0x1741   :  { %v3173_v62 = vpop.eup %3172 }
0x1742   :  { %v2561_v25 = vmul.f32 %v3173_v62, %v3167_v3  ;;  %v2563_v60 = vpop.permute.xlu2 %2562  ;;  %v2642_v62 = vmul.f32 %v3058_v41, %v2629_v55 }
0x1743   :  { %2583 = vmatpush.msra.mxu2 %v2563_v60 }
0x1744   :  { %3000 = vmatmul.msk.f32.vlgmr.msra.gmra.mxu2 %vm162_vm5, %v2561_v25 }
0x1759   :  { %v2383_v26 = vpop.f32.mrf.mxu1 }
0x175a   :  { %2992 = vmatmul.msk.f32.vlgmr.msrb.gmra.mxu3 %vm162_vm5, %v2383_v26 }
0x175b   :  { %2755 = vmatpush.msrb.mxu3 %v2726_v34 }
0x175d   :  { %2756 = vmatpush.msrb.mxu3 %v2725_v63 }
0x175f   :  { %2757 = vmatpush.msrb.mxu3 %v2724_v59  ;;  %v2776_v59 = vld [vmem:[%s4143_s10] sm:$0xff] }
0x1761   :  { %2758 = vmatpush.msrb.mxu3 %v2723_v44 }
0x1771   :  { %v2495_v9 = vpop.f32.mrf.mxu1 }
0x1772   :  { %2997 = vmatmul.msk.f32.vlgmr.msra.gmra.mxu3 %vm162_vm5, %v2495_v9  ;;  %v3060_v9 = vld [vmem:[%s4146_s13 + $0x1] ss:$0 sm:$0xff] }
0x177b   :  { %v2675_v28 = vpop.xlane.xlu2 %2674 }
0x177c   :  { %v2679_v29 = vmul.f32 %v2675_v28, %v3339_v8 }
0x177e   :  { %v4030_v19 = vsub.f32 %v4014_v20, %v2679_v29 }
0x1780   :  { %v2683_v30 = vmul.f32 %v4030_v19, %v4030_v19 }
0x1782   :  { %v2685_v37 = vsel %vm57_vm0, %v2683_v30, 0.0 }
0x1783   :  { %2686 = vadd.xlane.f32.xlu2 %v2685_v37 }
0x1798   :  { %v2638_v6 = vpop.xlane.xlu1 %2637 }
0x1799   :  { %v2640_v35 = vmul.f32 %v2638_v6, %v3339_v8 }
0x179b   :  { %v2645_v1 = vadd.f32 1e-05, %v2640_v35  ;;  %v2778_v35 = vld [vmem:[%s4143_s10 + $0x10] sm:$0xff] }
0x179d   :  { %3174 = vrsqrt.f32 %v2645_v1  ;;  %vm2662_vm14 = vweird.f32 %v2645_v1 }
0x17a3   :  { %v3175_v46 = vpop.eup %3174 }
0x17a4   :  { %v2657_v5 = vmul.f32 %v3175_v46, %v2645_v1  ;;  %vm2663_vm13 = vweird.f32 %v3175_v46 }
0x17a5   :  { %vm2664_vm15 = vmor %vm2662_vm14, %vm2663_vm13 }
0x17a6   :  { %v2658_v13 = vmul.f32 %v3175_v46, %v2657_v5 }
0x17c7   :  { %v2585_v38 = vpop.f32.mrf.mxu2 }
0x17c8   :  { %3001 = vmatmul.msk.f32.vlgmr.msra.gmra.mxu1 %vm162_vm5, %v2585_v38  ;;  %v2643_v38 = vmul.f32 %v3058_v41, %v4020_v18  ;;  %v3061_v18 = vld [vmem:[%s4146_s13 + $0x4] ss:$0 sm:$0xff] }
0x17dd   :  { %v2406_v39 = vpop.f32.mrf.mxu3 }
0x17de   :  { %v2430_v43 = vadd.f32 %v3973_v61, %v2406_v39  ;;  %v2631_v61 = vmul.f32 %v2629_v55, %v2629_v55  ;;  %v2780_v55 = vld [vmem:[%s4143_s10 + $0x20] sm:$0xff] }
0x17e0   :  { %v2633_v50 = vsel %vm57_vm0, %v2631_v61, 0.0 }
0x17f5   :  { %v2518_v40 = vpop.f32.mrf.mxu3 }
0x17f6   :  { %v2521_v47 = vadd.f32 %v2518_v40, %v2430_v43  ;;  %v2687_v45 = vpop.xlane.xlu2 %2686  ;;  %v3059_v43 = vld [vmem:[%s4145_s12 + $0x4] ss:$0 sm:$0xff] }
0x17f7   :  { %v2691_v16 = vmul.f32 %v2687_v45, %v3339_v8 }
0x17f9   :  { %v2696_v31 = vadd.f32 1e-05, %v2691_v16 }
0x17fb   :  { %3176 = vrsqrt.f32 %v2696_v31  ;;  %vm2704_vm2 = vweird.f32 %v2696_v31 }
0x1801   :  { %v3177_v4 = vpop.eup %3176 }
0x1802   :  { %v2699_v17 = vmul.f32 %v3177_v4, %v2696_v31  ;;  %vm2705_vm1 = vweird.f32 %v3177_v4  ;;  %v3062_v31 = vld [vmem:[%s4142_s9] ss:$0 sm:$0xff]  ;;  %s3248_s9 = smov [#allocation2]  }
0x1803   :  { %vm2706_vm3 = vmor %vm2704_vm2, %vm2705_vm1  ;;  %s2842_s20 = sshll.u32 %s3248_s9, 4  ;;  %s2843_s20 = int_to_ptr.vmem [resolvable:$true] %s2842_s20 }
0x1804   :  { %v2700_v21 = vmul.f32 %v3177_v4, %v2699_v17 }
0x1806   :  { %v2701_v60 = vmul.f32 0.5, %v2700_v21 }
0x1808   :  { %v2702_v30 = vsub.f32 1.5, %v2701_v60 }
0x180a   :  { %v2703_v40 = vmul.f32 %v3177_v4, %v2702_v30 }
0x180c   :  { %v2707_v48 = vsel %vm2706_vm3, %v3177_v4, %v2703_v40 }
0x1845   :  { %v2608_v51 = vpop.f32.mrf.mxu1 }
0x1846   :  { %v2611_v42 = vadd.f32 %v2608_v51, %v2521_v47  ;;  %v2694_v51 = vmul.f32 %v3059_v43, %v4030_v19  ;;  %v2781_v19 = vld [vmem:[%s4143_s10 + $0x28] sm:$0xff] }
0x1848   :  { %v2616_v53 = vadd.f32 %v3057_v15, %v2611_v42  ;;  %v2659_v15 = vmul.f32 0.5, %v2658_v13  ;;  %v2718_v42 = vmul.f32 %v2707_v48, %v2694_v51 }
0x184a   :  { %v4041_v54 = vadd.f32 %v3183_v0, %v2616_v53  ;;  %v2660_v22 = vsub.f32 1.5, %v2659_v15  ;;  %v2721_v52 = vadd.f32 %v3061_v18, %v2718_v42  ;;  %v2783_v53 = vld [vmem:[%s4143_s10 + $0x38] sm:$0xff]  ;;  %v2782_v0 = vld [vmem:[%s4143_s10 + $0x30] sm:$0xff] }
0x184b   :  { %2809 = vmatpush.msra.mxu0 %v2783_v53 }
0x184c   :  { %v2676_v56 = vsel %vm57_vm0, %v4041_v54, 0.0  ;;  %v2661_v25 = vmul.f32 %v3175_v46, %v2660_v22 }
0x184d   :  { %2677 = vadd.xlane.f32.xlu0 %v2676_v56  ;;  %2810 = vmatpush.msra.mxu0 %v2782_v0 }
0x184e   :  { %v2665_v37 = vsel %vm2664_vm15, %v3175_v46, %v2661_v25 }
0x184f   :  { %v2667_v39 = vmul.f32 %v2665_v37, %v2643_v38  ;;  %2811 = vmatpush.msra.mxu0 %v2781_v19 }
0x1851   :  { %v2670_v47 = vadd.f32 %v3060_v9, %v2667_v39  ;;  %2812 = vmatpush.msra.mxu0 %v2780_v55 }
0x1855   :  { %2634 = vadd.xlane.f32.xlu0 %v2633_v50  ;;  %v2779_v50 = vld [vmem:[%s4143_s10 + $0x18] sm:$0xff] }
0x1856   :  { %2813 = vmatpush.msra.mxu0 %v2779_v50 }
0x1858   :  { %2814 = vmatpush.msra.mxu0 %v2778_v35 }
0x18c0   :  { %v2678_v49 = vpop.xlane.xlu0 %2677 }
0x18c1   :  { %v2680_v57 = vmul.f32 %v2678_v49, %v3339_v8  ;;  %v2777_v49 = vld [vmem:[%s4143_s10 + $0x8] sm:$0xff] }
0x18c2   :  { %2815 = vmatpush.msra.mxu0 %v2777_v49 }
0x18c3   :  { %v4062_v2 = vsub.f32 %v4041_v54, %v2680_v57 }
0x18c4   :  { %2816 = vmatpush.msra.mxu0 %v2776_v59 }
0x18c5   :  { %v2684_v3 = vmul.f32 %v4062_v2, %v4062_v2  ;;  %v2695_v44 = vmul.f32 %v3059_v43, %v4062_v2 }
0x18c7   :  { %v2688_v7 = vsel %vm57_vm0, %v2684_v3, 0.0 }
0x18c8   :  { %2689 = vadd.xlane.f32.xlu0 %v2688_v7  ;;  %v2635_v12 = vpop.xlane.xlu0 %2634 }
0x18c9   :  { %v2639_v27 = vmul.f32 %v2635_v12, %v3339_v8 }
0x18cb   :  { %v2644_v10 = vadd.f32 1e-05, %v2639_v27 }
0x18cd   :  { %3178 = vrsqrt.f32 %v2644_v10  ;;  %vm2652_vm6 = vweird.f32 %v2644_v10 }
0x18d3   :  { %v3179_v14 = vpop.eup %3178 }
0x18d4   :  { %v2647_v11 = vmul.f32 %v3179_v14, %v2644_v10  ;;  %vm2653_vm5 = vweird.f32 %v3179_v14 }
0x18d5   :  { %vm2654_vm10 = vmor %vm2652_vm6, %vm2653_vm5 }
0x18d6   :  { %v2648_v32 = vmul.f32 %v3179_v14, %v2647_v11 }
0x18d8   :  { %v2649_v36 = vmul.f32 0.5, %v2648_v32  ;;  %v3063_v32 = vld [vmem:[%s4144_s11] ss:$0 sm:$0xff]  ;;  %s3249_s11 = smov 128  }
0x18da   :  { %v2650_v23 = vsub.f32 1.5, %v2649_v36 }
0x18dc   :  { %v2651_v58 = vmul.f32 %v3179_v14, %v2650_v23 }
0x18de   :  { %v2655_v26 = vsel %vm2654_vm10, %v3179_v14, %v2651_v58 }
0x18df   :  { %v2666_v28 = vmul.f32 %v2655_v26, %v2642_v62 }
0x18e1   :  { %v2669_v29 = vadd.f32 %v3060_v9, %v2666_v28 }
0x18e3   :  { %3002 = vmatmul.msk.f32.vlgmr.msrb.gmra.mxu3 %vm57_vm0, %v2669_v29 }
0x18eb   :  { %3003 = vmatmul.msk.f32.gmra.mxu3 %vm57_vm0, %v2670_v47 }
0x18f3   :  { %3004 = vmatmul.msk.f32.gmra.mxu3 %vm57_vm0, %v2721_v52 }
0x193b   :  { %v2690_v56 = vpop.xlane.xlu0 %2689 }
0x193c   :  { %v2692_v61 = vmul.f32 %v2690_v56, %v3339_v8 }
0x193e   :  { %v2697_v6 = vadd.f32 1e-05, %v2692_v61 }
0x1940   :  { %3180 = vrsqrt.f32 %v2697_v6  ;;  %vm2714_vm7 = vweird.f32 %v2697_v6 }
0x1946   :  { %v3181_v34 = vpop.eup %3180 }
0x1947   :  { %v2709_v63 = vmul.f32 %v3181_v34, %v2697_v6  ;;  %vm2715_vm4 = vweird.f32 %v3181_v34 }
0x1948   :  { %vm2716_vm8 = vmor %vm2714_vm7, %vm2715_vm4 }
0x1949   :  { %v2710_v8 = vmul.f32 %v3181_v34, %v2709_v63 }
0x194b   :  { %v2711_v1 = vmul.f32 0.5, %v2710_v8 }
0x194d   :  { %v2712_v45 = vsub.f32 1.5, %v2711_v1 }
0x194f   :  { %v2713_v57 = vmul.f32 %v3181_v34, %v2712_v45 }
0x1951   :  { %v2717_v16 = vsel %vm2716_vm8, %v3181_v34, %v2713_v57 }
0x1952   :  { %v2719_v3 = vmul.f32 %v2717_v16, %v2695_v44 }
0x1954   :  { %v2722_v7 = vadd.f32 %v3061_v18, %v2719_v3 }
0x1956   :  { %3005 = vmatmul.msk.f32.gmra.mxu3 %vm57_vm0, %v2722_v7 }
0x1966   :  { %v2760_v12 = vpop.f32.mrf.mxu3 }
0x1967   :  { %v2761_v27 = vadd.f32 %v3062_v31, %v2760_v12 }
0x1969   :  { %v2772_v46 = vmax.f32 %v2761_v27, 0.0 }
0x196b   :  { %3006 = vmatmul.msk.f32.vlgmr.msra.gmra.mxu0 %vm2788_vm9, %v2772_v46 }
0x196e   :  { %v2763_v10 = vpop.f32.mrf.mxu3 }
0x196f   :  { %v2764_v5 = vadd.f32 %v3062_v31, %v2763_v10 }
0x1971   :  { %v2773_v4 = vmax.f32 %v2764_v5, 0.0 }
0x1973   :  { %3007 = vmatmul.msk.f32.gmra.mxu0 %vm2788_vm9, %v2773_v4 }
0x1976   :  { %v2766_v2 = vpop.f32.mrf.mxu3 }
0x1977   :  { %v2767_v13 = vadd.f32 %v3062_v31, %v2766_v2 }
0x1979   :  { %v2774_v14 = vmax.f32 %v2767_v13, 0.0 }
0x197b   :  { %3008 = vmatmul.msk.f32.gmra.mxu0 %vm2788_vm9, %v2774_v14 }
0x19d9   :  { %v2769_v11 = vpop.f32.mrf.mxu3 }
0x19da   :  { %v2770_v15 = vadd.f32 %v3062_v31, %v2769_v11 }
0x19dc   :  { %v2775_v17 = vmax.f32 %v2770_v15, 0.0 }
0x19de   :  { %3009 = vmatmul.msk.f32.gmra.mxu0 %vm2788_vm9, %v2775_v17 }
0x19e8   :  { %v2818_v36 = vpop.f32.mrf.mxu0 }
0x19e9   :  { %v2819_v41 = vadd.f32 %v3063_v32, %v2818_v36 }
0x19eb   :  { %v2830_v22 = vadd.f32 %v2819_v41, %v3988_v24 }
0x19ed   :  { %2832 = vst.msk [vmem:[#allocation2] sm:$0xff] %vm57_vm0, %v2830_v22 }
0x19f0   :  { %v2821_v21 = vpop.f32.mrf.mxu0 }
0x19f1   :  { %v2822_v23 = vadd.f32 %v3063_v32, %v2821_v21 }
0x19f3   :  { %v2831_v58 = vadd.f32 %v2822_v23, %v3997_v33 }
0x19f5   :  { %2833 = vst.msk [vmem:[#allocation2 + $0x8] sm:$0xff] %vm57_vm0, %v2831_v58 }
0x19f6   :  { %2850 = dma.vmem_to_hbm [thread:$0]  %s2843_s20, 256, %s2845_s21, [#allocation3], %s3249_s11, %s3249_s11, %s3250_s28  }
0x19f8   :  { %v2824_v24 = vpop.f32.mrf.mxu0 }
0x19f9   :  { %v2825_v62 = vadd.f32 %v3063_v32, %v2824_v24 }
0x19fb   :  { %v2834_v25 = vadd.f32 %v2825_v62, %v4014_v20 }
0x19fd   :  { %2836 = vst.msk [vmem:[#allocation4] sm:$0xff] %vm57_vm0, %v2834_v25 }
0x1a5b   :  { %v2827_v60 = vpop.f32.mrf.mxu0 }
0x1a5c   :  { %v2828_v26 = vadd.f32 %v3063_v32, %v2827_v60 }
0x1a5e   :  { %v2835_v33 = vadd.f32 %v2828_v26, %v4041_v54 }
0x1a60   :  { %2837 = vst.msk [vmem:[#allocation4 + $0x8] sm:$0xff] %vm57_vm0, %v2835_v33 }
0x1a61   :  { %2863 = dma.vmem_to_hbm [thread:$0]  %s2856_s14, 256, %s2858_s22, [#allocation5], %s3249_s11, %s3249_s11, %s3250_s28  }
0x1a62   :  { %3232 = dma.done.wait [#allocation3], 256  }
0x1a63   :  { %3233 = vsyncadd [#allocation3], 4294967040 }
0x1a64   :  { %3234 = dma.done.wait [#allocation5], 256  }
0x1a65   :  { %3235 = vsyncadd [#allocation5], 4294967040 }
0x1a66   :  { %2872 = vsyncpa [#allocation3], 1 }
0x1a67   :  { %2873 = vsyncpa [#allocation5], 1 }

</bundles_post_ra>
